<compile_context>
chip_gen: v6e
topology: v6e:2x2x1
jax: 0.10.0
libtpu: 0.0.40
codegen_flags: <defaults>
</compile_context>

<pallas_src>
import functools

import jax
import jax.numpy as jnp
from jax.experimental import pallas as pl
from jax.experimental.pallas import tpu as pltpu

LANE = 128
MXU_DTYPE = jnp.bfloat16  # MXU input dtype (accumulation stays f32). jnp.float32 to disable.


def _round_up(n, m):
    return ((n + m - 1) // m) * m


# ----------------------------- Pallas kernel --------------------------------


def _unet_block_reverse_kernel(x_ref, w1_ref, s1_ref, b1_ref,
                               w2_ref, s2_ref, b2_ref,
                               o_ref, xpad_ref, ypad_ref):
    # x_ref:    (1, H, W, Ci)   NHWC input, channels zero-padded to lane-dense Ci
    # w1_ref:   (9*Ci, Co)      im2col weights: row = (dy*3 + dx)*Ci + ci  (bf16)
    # s*_ref:   (1, Co)         BatchNorm scale / bias (f32), applied AFTER ReLU
    # w2_ref:   (9*Co, Co)      im2col weights for conv2 (bf16)
    # o_ref:    (1, H, W, Co)
    # xpad_ref: (H+2, W+2, Ci)  VMEM scratch: zero-padded conv1 input
    # ypad_ref: (H+2, W+2, Co)  VMEM scratch: zero-padded conv2 input (conv1 output)
    H, W = o_ref.shape[1], o_ref.shape[2]
    Co = o_ref.shape[3]

    def conv3x3(pad_ref, w_ref):
        c = pad_ref.shape[-1]
        taps = [pad_ref[dy:dy + H, dx:dx + W, :].reshape(H * W, c)
                for dy in range(3) for dx in range(3)]
        patches = jnp.concatenate(taps, axis=-1).astype(MXU_DTYPE)    # (H*W, 9*c)
        return jnp.dot(patches, w_ref[...],                           # single MXU matmul
                       preferred_element_type=jnp.float32)            # (H*W, Co) f32

    # ---- layer 1: Conv3x3 -> ReLU -> BatchNorm ----
    xpad_ref[...] = jnp.zeros_like(xpad_ref)
    xpad_ref[1:H + 1, 1:W + 1, :] = x_ref[0]
    y = conv3x3(xpad_ref, w1_ref)
    y = jnp.maximum(y, 0.0)                      # ReLU (before norm: "reverse" block)
    y = y * s1_ref[...] + b1_ref[...]            # BN (eval-mode affine), f32

    # ---- layer 2: Conv3x3 -> ReLU -> BatchNorm ----
    ypad_ref[...] = jnp.zeros_like(ypad_ref)
    ypad_ref[1:H + 1, 1:W + 1, :] = y.reshape(H, W, Co)
    z = conv3x3(ypad_ref, w2_ref)
    z = jnp.maximum(z, 0.0)
    z = z * s2_ref[...] + b2_ref[...]

    o_ref[...] = z.reshape(1, H, W, Co).astype(o_ref.dtype)


# ------------------------------ wrapper --------------------------------------


@functools.partial(jax.jit, static_argnames=("cout",))
def unet_block_reverse_forward(x_nchw, kparams, *, cout):
    B, Cin, H, W = x_nchw.shape
    Ci = kparams["w1"].shape[0] // 9          # lane-padded input channels
    Co = kparams["w1"].shape[1]               # lane-padded output channels

    # NCHW -> NHWC + channel pad to the lane width (single XLA relayout; would be
    # dropped entirely in an NHWC end-to-end model).
    x = jnp.transpose(x_nchw, (0, 2, 3, 1))
    x = jnp.pad(x, ((0, 0), (0, 0), (0, 0), (0, Ci - Cin)))

    out = pl.pallas_call(
        _unet_block_reverse_kernel,
        out_shape=jax.ShapeDtypeStruct((B, H, W, Co), x_nchw.dtype),
        grid=(B,),
        in_specs=[
            pl.BlockSpec((1, H, W, Ci), lambda b: (b, 0, 0, 0)),   # x
            pl.BlockSpec((9 * Ci, Co), lambda b: (0, 0)),          # w1 (im2col)
            pl.BlockSpec((1, Co), lambda b: (0, 0)),               # s1
            pl.BlockSpec((1, Co), lambda b: (0, 0)),               # b1
            pl.BlockSpec((9 * Co, Co), lambda b: (0, 0)),          # w2 (im2col)
            pl.BlockSpec((1, Co), lambda b: (0, 0)),               # s2
            pl.BlockSpec((1, Co), lambda b: (0, 0)),               # b2
        ],
        out_specs=pl.BlockSpec((1, H, W, Co), lambda b: (b, 0, 0, 0)),
        scratch_shapes=[
            pltpu.VMEM((H + 2, W + 2, Ci), jnp.float32),
            pltpu.VMEM((H + 2, W + 2, Co), jnp.float32),
        ],
        compiler_params=pltpu.CompilerParams(
            dimension_semantics=("parallel",)),
    )(x, kparams["w1"], kparams["s1"], kparams["b1"],
      kparams["w2"], kparams["s2"], kparams["b2"])

    # Drop channel padding; NHWC -> NCHW to match the PyTorch module.
    return jnp.transpose(out[..., :cout], (0, 3, 1, 2))


# -------------------------- parameter preparation ----------------------------


def make_unet_block_reverse_params(key, in_channels, out_channels, dtype=jnp.float32):
    """Deterministic synthetic parameters matching UNetBlockReverse shapes (PyTorch layout)."""
    ks = jax.random.split(key, 10)
    w1 = 0.1 * jax.random.normal(ks[0], (out_channels, in_channels, 3, 3), dtype)   # OIHW
    w2 = 0.1 * jax.random.normal(ks[1], (out_channels, out_channels, 3, 3), dtype)  # OIHW

    def bn(kg, kb, km, kv):
        gamma = 1.0 + 0.1 * jax.random.normal(kg, (out_channels,), dtype)
        beta = 0.1 * jax.random.normal(kb, (out_channels,), dtype)
        mean = 0.1 * jax.random.normal(km, (out_channels,), dtype)
        var = jax.random.uniform(kv, (out_channels,), dtype, 0.5, 1.5)
        return gamma, beta, mean, var

    return dict(w1=w1, w2=w2, bn1=bn(*ks[2:6]), bn2=bn(*ks[6:10]))


def prepare_kernel_params(raw, eps=1e-5, mxu_dtype=MXU_DTYPE):
    """Fold BN to (scale, bias), pad channels to the lane width, im2col-reshape weights."""
    w1, w2 = raw["w1"], raw["w2"]
    cout, cin = w1.shape[0], w1.shape[1]
    ci = _round_up(cin, LANE)
    co = _round_up(cout, LANE)

    def prep_w(w_oihw, c_in_pad, c_out_pad):
        c_out, c_in = w_oihw.shape[0], w_oihw.shape[1]
        w = jnp.transpose(w_oihw, (2, 3, 1, 0))                      # OIHW -> HWIO
        w = jnp.pad(w, ((0, 0), (0, 0), (0, c_in_pad - c_in), (0, c_out_pad - c_out)))
        return w.reshape(9 * c_in_pad, c_out_pad).astype(mxu_dtype)  # row = (dy*3+dx)*Cin+ci

    def prep_bn(gamma, beta, mean, var, c_out_pad):
        scale = gamma / jnp.sqrt(var + eps)
        bias = beta - mean * scale
        scale = jnp.pad(scale, (0, c_out_pad - scale.shape[0]))
        bias = jnp.pad(bias, (0, c_out_pad - bias.shape[0]))
        return (scale.reshape(1, c_out_pad).astype(jnp.float32),
                bias.reshape(1, c_out_pad).astype(jnp.float32))

    s1, b1 = prep_bn(*raw["bn1"], co)
    s2, b2 = prep_bn(*raw["bn2"], co)
    return dict(w1=prep_w(w1, ci, co), w2=prep_w(w2, co, co),
                s1=s1, b1=b1, s2=s2, b2=b2)


# ------------------------------ reference ------------------------------------


def reference_forward(x_nchw, raw, eps=1e-5):
    """Pure-JAX f32 reference of UNetBlockReverse (Conv -> ReLU -> BN, twice)."""
    def conv(x, w):
        return jax.lax.conv_general_dilated(
            x, w, window_strides=(1, 1), padding=((1, 1), (1, 1)),
            dimension_numbers=("NCHW", "OIHW", "NCHW"))

    def bn(x, p):
        gamma, beta, mean, var = p
        scale = gamma / jnp.sqrt(var + eps)
        bias = beta - mean * scale
        return x * scale[None, :, None, None] + bias[None, :, None, None]

    y = bn(jnp.maximum(conv(x_nchw, raw["w1"]), 0.0), raw["bn1"])
    y = bn(jnp.maximum(conv(y, raw["w2"]), 0.0), raw["bn2"])
    return y


if __name__ == "__main__":
    B, Cin, Cout, H, W = 2, 4, 8, 16, 16
    key = jax.random.PRNGKey(0)
    kx, kp = jax.random.split(key)
    x = jax.random.normal(kx, (B, Cin, H, W), jnp.float32)           # NCHW, like PyTorch

    raw = make_unet_block_reverse_params(kp, Cin, Cout)
    kparams = prepare_kernel_params(raw)

    out = unet_block_reverse_forward(x, kparams, cout=Cout)
    out = jax.block_until_ready(out)
    assert out.shape == (B, Cout, H, W), out.shape

    # Correctness vs. pure-JAX f32 reference (loose tolerance: bf16 MXU inputs).
    ref = jax.block_until_ready(reference_forward(x, raw))
    err = float(jnp.max(jnp.abs(out - ref)))
    assert err < 5e-2, f"max abs error vs reference: {err}"
    print("KERNEL_OK")
</pallas_src>

<mosaic_0001>
module attributes {stable_mosaic.version = 11 : i64} {
  func.func @_unet_block_reverse_kernel(%arg0: i32, %arg1: memref<1x16x16x128xf32, #tpu.memory_space<vmem>>, %arg2: memref<1152x128xbf16, #tpu.memory_space<vmem>>, %arg3: memref<1x128xf32, #tpu.memory_space<vmem>>, %arg4: memref<1x128xf32, #tpu.memory_space<vmem>>, %arg5: memref<1152x128xbf16, #tpu.memory_space<vmem>>, %arg6: memref<1x128xf32, #tpu.memory_space<vmem>>, %arg7: memref<1x128xf32, #tpu.memory_space<vmem>>, %arg8: memref<1x16x16x128xf32, #tpu.memory_space<vmem>>, %arg9: memref<18x18x128xf32, #tpu.memory_space<vmem>>, %arg10: memref<18x18x128xf32, #tpu.memory_space<vmem>>) attributes {dimension_semantics = [#tpu.dimension_semantics<parallel>], iteration_bounds = array<i64: 2>, scalar_prefetch = 0 : i64, scratch_operands = 2 : i64, tpu.core_type = #tpu.core_type<tc>, window_params = [{transform_indices = @transform_0, window_bounds = array<i64: 1, 16, 16, 128>}, {pipeline_mode = #tpu.pipeline_mode<synchronous>, transform_indices = @transform_1, window_bounds = array<i64: 1152, 128>}, {pipeline_mode = #tpu.pipeline_mode<synchronous>, transform_indices = @transform_2, window_bounds = array<i64: 1, 128>}, {pipeline_mode = #tpu.pipeline_mode<synchronous>, transform_indices = @transform_3, window_bounds = array<i64: 1, 128>}, {pipeline_mode = #tpu.pipeline_mode<synchronous>, transform_indices = @transform_4, window_bounds = array<i64: 1152, 128>}, {pipeline_mode = #tpu.pipeline_mode<synchronous>, transform_indices = @transform_5, window_bounds = array<i64: 1, 128>}, {pipeline_mode = #tpu.pipeline_mode<synchronous>, transform_indices = @transform_6, window_bounds = array<i64: 1, 128>}, {transform_indices = @transform_7, window_bounds = array<i64: 1, 16, 16, 128>}]} {
    %cst = arith.constant 0.000000e+00 : f32
    %0 = vector.broadcast %cst : f32 to vector<18x18x128xf32>
    %c0 = arith.constant 0 : index
    %c0_0 = arith.constant 0 : index
    %c0_1 = arith.constant 0 : index
    %1 = vector.load %arg9[%c0, %c0_0, %c0_1] : memref<18x18x128xf32, #tpu.memory_space<vmem>>, vector<18x18x128xf32>
    tpu.vector_store %arg9[%c0, %c0_0, %c0_1], %0 {strides = array<i32>} : memref<18x18x128xf32, #tpu.memory_space<vmem>>, vector<18x18x128xf32>,
    %c0_2 = arith.constant 0 : index
    %c0_3 = arith.constant 0 : index
    %c0_4 = arith.constant 0 : index
    %c0_5 = arith.constant 0 : index
    %2 = vector.load %arg1[%c0_2, %c0_3, %c0_4, %c0_5] : memref<1x16x16x128xf32, #tpu.memory_space<vmem>>, vector<1x16x16x128xf32>
    %3 = vector.shape_cast %2 : vector<1x16x16x128xf32> to vector<16x16x128xf32>
    %c1 = arith.constant 1 : index
    %c1_6 = arith.constant 1 : index
    %c0_7 = arith.constant 0 : index
    %4 = vector.load %arg9[%c1, %c1_6, %c0_7] : memref<18x18x128xf32, #tpu.memory_space<vmem>>, vector<16x16x128xf32>
    tpu.vector_store %arg9[%c1, %c1_6, %c0_7], %3 {strides = array<i32>} : memref<18x18x128xf32, #tpu.memory_space<vmem>>, vector<16x16x128xf32>,
    %c0_8 = arith.constant 0 : index
    %c0_9 = arith.constant 0 : index
    %c0_10 = arith.constant 0 : index
    %5 = vector.load %arg9[%c0_8, %c0_9, %c0_10] : memref<18x18x128xf32, #tpu.memory_space<vmem>>, vector<16x16x128xf32>
    %6 = vector.shape_cast %5 : vector<16x16x128xf32> to vector<256x128xf32>
    %c0_11 = arith.constant 0 : index
    %c1_12 = arith.constant 1 : index
    %c0_13 = arith.constant 0 : index
    %7 = vector.load %arg9[%c0_11, %c1_12, %c0_13] : memref<18x18x128xf32, #tpu.memory_space<vmem>>, vector<16x16x128xf32>
    %8 = vector.shape_cast %7 : vector<16x16x128xf32> to vector<256x128xf32>
    %c0_14 = arith.constant 0 : index
    %c2 = arith.constant 2 : index
    %c0_15 = arith.constant 0 : index
    %9 = vector.load %arg9[%c0_14, %c2, %c0_15] : memref<18x18x128xf32, #tpu.memory_space<vmem>>, vector<16x16x128xf32>
    %10 = vector.shape_cast %9 : vector<16x16x128xf32> to vector<256x128xf32>
    %c1_16 = arith.constant 1 : index
    %c0_17 = arith.constant 0 : index
    %c0_18 = arith.constant 0 : index
    %11 = vector.load %arg9[%c1_16, %c0_17, %c0_18] : memref<18x18x128xf32, #tpu.memory_space<vmem>>, vector<16x16x128xf32>
    %12 = vector.shape_cast %11 : vector<16x16x128xf32> to vector<256x128xf32>
    %c1_19 = arith.constant 1 : index
    %c1_20 = arith.constant 1 : index
    %c0_21 = arith.constant 0 : index
    %13 = vector.load %arg9[%c1_19, %c1_20, %c0_21] : memref<18x18x128xf32, #tpu.memory_space<vmem>>, vector<16x16x128xf32>
    %14 = vector.shape_cast %13 : vector<16x16x128xf32> to vector<256x128xf32>
    %c1_22 = arith.constant 1 : index
    %c2_23 = arith.constant 2 : index
    %c0_24 = arith.constant 0 : index
    %15 = vector.load %arg9[%c1_22, %c2_23, %c0_24] : memref<18x18x128xf32, #tpu.memory_space<vmem>>, vector<16x16x128xf32>
    %16 = vector.shape_cast %15 : vector<16x16x128xf32> to vector<256x128xf32>
    %c2_25 = arith.constant 2 : index
    %c0_26 = arith.constant 0 : index
    %c0_27 = arith.constant 0 : index
    %17 = vector.load %arg9[%c2_25, %c0_26, %c0_27] : memref<18x18x128xf32, #tpu.memory_space<vmem>>, vector<16x16x128xf32>
    %18 = vector.shape_cast %17 : vector<16x16x128xf32> to vector<256x128xf32>
    %c2_28 = arith.constant 2 : index
    %c1_29 = arith.constant 1 : index
    %c0_30 = arith.constant 0 : index
    %19 = vector.load %arg9[%c2_28, %c1_29, %c0_30] : memref<18x18x128xf32, #tpu.memory_space<vmem>>, vector<16x16x128xf32>
    %20 = vector.shape_cast %19 : vector<16x16x128xf32> to vector<256x128xf32>
    %c2_31 = arith.constant 2 : index
    %c2_32 = arith.constant 2 : index
    %c0_33 = arith.constant 0 : index
    %21 = vector.load %arg9[%c2_31, %c2_32, %c0_33] : memref<18x18x128xf32, #tpu.memory_space<vmem>>, vector<16x16x128xf32>
    %22 = vector.shape_cast %21 : vector<16x16x128xf32> to vector<256x128xf32>
    %23 = tpu.concatenate %6, %8, %10, %12, %14, %16, %18, %20, %22 in 1 : vector<256x128xf32>, vector<256x128xf32>, vector<256x128xf32>, vector<256x128xf32>, vector<256x128xf32>, vector<256x128xf32>, vector<256x128xf32>, vector<256x128xf32>, vector<256x128xf32> -> vector<256x1152xf32>
    %24 = arith.truncf %23 : vector<256x1152xf32> to vector<256x1152xbf16>
    %c0_34 = arith.constant 0 : index
    %c0_35 = arith.constant 0 : index
    %25 = vector.load %arg2[%c0_34, %c0_35] : memref<1152x128xbf16, #tpu.memory_space<vmem>>, vector<1152x128xbf16>
    %cst_36 = arith.constant dense<0.000000e+00> : vector<256x128xf32>
    %26 = tpu.matmul %24, %25, %cst_36 {dimension_numbers = #tpu.dot_dimension_numbers<[1], [0], [0], [1], [0, 0, 1, 1], [], []>} : vector<256x1152xbf16>, vector<1152x128xbf16>, vector<256x128xf32> -> vector<256x128xf32>
    %cst_37 = arith.constant 0.000000e+00 : f32
    %27 = vector.broadcast %cst_37 : f32 to vector<256x128xf32>
    %28 = arith.maximumf %26, %27 : vector<256x128xf32>
    %c0_38 = arith.constant 0 : index
    %c0_39 = arith.constant 0 : index
    %29 = vector.load %arg3[%c0_38, %c0_39] : memref<1x128xf32, #tpu.memory_space<vmem>>, vector<1x128xf32>
    %30 = vector.broadcast %29 : vector<1x128xf32> to vector<256x128xf32>
    %31 = arith.mulf %28, %30 : vector<256x128xf32>
    %c0_40 = arith.constant 0 : index
    %c0_41 = arith.constant 0 : index
    %32 = vector.load %arg4[%c0_40, %c0_41] : memref<1x128xf32, #tpu.memory_space<vmem>>, vector<1x128xf32>
    %33 = vector.broadcast %32 : vector<1x128xf32> to vector<256x128xf32>
    %34 = arith.addf %31, %33 : vector<256x128xf32>
    %cst_42 = arith.constant 0.000000e+00 : f32
    %35 = vector.broadcast %cst_42 : f32 to vector<18x18x128xf32>
    %c0_43 = arith.constant 0 : index
    %c0_44 = arith.constant 0 : index
    %c0_45 = arith.constant 0 : index
    %36 = vector.load %arg10[%c0_43, %c0_44, %c0_45] : memref<18x18x128xf32, #tpu.memory_space<vmem>>, vector<18x18x128xf32>
    tpu.vector_store %arg10[%c0_43, %c0_44, %c0_45], %35 {strides = array<i32>} : memref<18x18x128xf32, #tpu.memory_space<vmem>>, vector<18x18x128xf32>,
    %37 = vector.shape_cast %34 : vector<256x128xf32> to vector<16x16x128xf32>
    %c1_46 = arith.constant 1 : index
    %c1_47 = arith.constant 1 : index
    %c0_48 = arith.constant 0 : index
    %38 = vector.load %arg10[%c1_46, %c1_47, %c0_48] : memref<18x18x128xf32, #tpu.memory_space<vmem>>, vector<16x16x128xf32>
    tpu.vector_store %arg10[%c1_46, %c1_47, %c0_48], %37 {strides = array<i32>} : memref<18x18x128xf32, #tpu.memory_space<vmem>>, vector<16x16x128xf32>,
    %c0_49 = arith.constant 0 : index
    %c0_50 = arith.constant 0 : index
    %c0_51 = arith.constant 0 : index
    %39 = vector.load %arg10[%c0_49, %c0_50, %c0_51] : memref<18x18x128xf32, #tpu.memory_space<vmem>>, vector<16x16x128xf32>
    %40 = vector.shape_cast %39 : vector<16x16x128xf32> to vector<256x128xf32>
    %c0_52 = arith.constant 0 : index
    %c1_53 = arith.constant 1 : index
    %c0_54 = arith.constant 0 : index
    %41 = vector.load %arg10[%c0_52, %c1_53, %c0_54] : memref<18x18x128xf32, #tpu.memory_space<vmem>>, vector<16x16x128xf32>
    %42 = vector.shape_cast %41 : vector<16x16x128xf32> to vector<256x128xf32>
    %c0_55 = arith.constant 0 : index
    %c2_56 = arith.constant 2 : index
    %c0_57 = arith.constant 0 : index
    %43 = vector.load %arg10[%c0_55, %c2_56, %c0_57] : memref<18x18x128xf32, #tpu.memory_space<vmem>>, vector<16x16x128xf32>
    %44 = vector.shape_cast %43 : vector<16x16x128xf32> to vector<256x128xf32>
    %c1_58 = arith.constant 1 : index
    %c0_59 = arith.constant 0 : index
    %c0_60 = arith.constant 0 : index
    %45 = vector.load %arg10[%c1_58, %c0_59, %c0_60] : memref<18x18x128xf32, #tpu.memory_space<vmem>>, vector<16x16x128xf32>
    %46 = vector.shape_cast %45 : vector<16x16x128xf32> to vector<256x128xf32>
    %c1_61 = arith.constant 1 : index
    %c1_62 = arith.constant 1 : index
    %c0_63 = arith.constant 0 : index
    %47 = vector.load %arg10[%c1_61, %c1_62, %c0_63] : memref<18x18x128xf32, #tpu.memory_space<vmem>>, vector<16x16x128xf32>
    %48 = vector.shape_cast %47 : vector<16x16x128xf32> to vector<256x128xf32>
    %c1_64 = arith.constant 1 : index
    %c2_65 = arith.constant 2 : index
    %c0_66 = arith.constant 0 : index
    %49 = vector.load %arg10[%c1_64, %c2_65, %c0_66] : memref<18x18x128xf32, #tpu.memory_space<vmem>>, vector<16x16x128xf32>
    %50 = vector.shape_cast %49 : vector<16x16x128xf32> to vector<256x128xf32>
    %c2_67 = arith.constant 2 : index
    %c0_68 = arith.constant 0 : index
    %c0_69 = arith.constant 0 : index
    %51 = vector.load %arg10[%c2_67, %c0_68, %c0_69] : memref<18x18x128xf32, #tpu.memory_space<vmem>>, vector<16x16x128xf32>
    %52 = vector.shape_cast %51 : vector<16x16x128xf32> to vector<256x128xf32>
    %c2_70 = arith.constant 2 : index
    %c1_71 = arith.constant 1 : index
    %c0_72 = arith.constant 0 : index
    %53 = vector.load %arg10[%c2_70, %c1_71, %c0_72] : memref<18x18x128xf32, #tpu.memory_space<vmem>>, vector<16x16x128xf32>
    %54 = vector.shape_cast %53 : vector<16x16x128xf32> to vector<256x128xf32>
    %c2_73 = arith.constant 2 : index
    %c2_74 = arith.constant 2 : index
    %c0_75 = arith.constant 0 : index
    %55 = vector.load %arg10[%c2_73, %c2_74, %c0_75] : memref<18x18x128xf32, #tpu.memory_space<vmem>>, vector<16x16x128xf32>
    %56 = vector.shape_cast %55 : vector<16x16x128xf32> to vector<256x128xf32>
    %57 = tpu.concatenate %40, %42, %44, %46, %48, %50, %52, %54, %56 in 1 : vector<256x128xf32>, vector<256x128xf32>, vector<256x128xf32>, vector<256x128xf32>, vector<256x128xf32>, vector<256x128xf32>, vector<256x128xf32>, vector<256x128xf32>, vector<256x128xf32> -> vector<256x1152xf32>
    %58 = arith.truncf %57 : vector<256x1152xf32> to vector<256x1152xbf16>
    %c0_76 = arith.constant 0 : index
    %c0_77 = arith.constant 0 : index
    %59 = vector.load %arg5[%c0_76, %c0_77] : memref<1152x128xbf16, #tpu.memory_space<vmem>>, vector<1152x128xbf16>
    %cst_78 = arith.constant dense<0.000000e+00> : vector<256x128xf32>
    %60 = tpu.matmul %58, %59, %cst_78 {dimension_numbers = #tpu.dot_dimension_numbers<[1], [0], [0], [1], [0, 0, 1, 1], [], []>} : vector<256x1152xbf16>, vector<1152x128xbf16>, vector<256x128xf32> -> vector<256x128xf32>
    %cst_79 = arith.constant 0.000000e+00 : f32
    %61 = vector.broadcast %cst_79 : f32 to vector<256x128xf32>
    %62 = arith.maximumf %60, %61 : vector<256x128xf32>
    %c0_80 = arith.constant 0 : index
    %c0_81 = arith.constant 0 : index
    %63 = vector.load %arg6[%c0_80, %c0_81] : memref<1x128xf32, #tpu.memory_space<vmem>>, vector<1x128xf32>
    %64 = vector.broadcast %63 : vector<1x128xf32> to vector<256x128xf32>
    %65 = arith.mulf %62, %64 : vector<256x128xf32>
    %c0_82 = arith.constant 0 : index
    %c0_83 = arith.constant 0 : index
    %66 = vector.load %arg7[%c0_82, %c0_83] : memref<1x128xf32, #tpu.memory_space<vmem>>, vector<1x128xf32>
    %67 = vector.broadcast %66 : vector<1x128xf32> to vector<256x128xf32>
    %68 = arith.addf %65, %67 : vector<256x128xf32>
    %69 = vector.shape_cast %68 : vector<256x128xf32> to vector<1x16x16x128xf32>
    %c0_84 = arith.constant 0 : index
    %c0_85 = arith.constant 0 : index
    %c0_86 = arith.constant 0 : index
    %c0_87 = arith.constant 0 : index
    %70 = vector.load %arg8[%c0_84, %c0_85, %c0_86, %c0_87] : memref<1x16x16x128xf32, #tpu.memory_space<vmem>>, vector<1x16x16x128xf32>
    tpu.vector_store %arg8[%c0_84, %c0_85, %c0_86, %c0_87], %69 {strides = array<i32>} : memref<1x16x16x128xf32, #tpu.memory_space<vmem>>, vector<1x16x16x128xf32>,
    return
  }
  func.func @transform_0(%arg0: i32) -> (i32, i32, i32, i32) {
    %c0_i32 = arith.constant 0 : i32
    %c0_i32_0 = arith.constant 0 : i32
    %c0_i32_1 = arith.constant 0 : i32
    %c0_i32_2 = arith.constant 0 : i32
    return %arg0, %c0_i32, %c0_i32_0, %c0_i32_1 : i32, i32, i32, i32
  }
  func.func @transform_1(%arg0: i32) -> (i32, i32) {
    %c0_i32 = arith.constant 0 : i32
    %c0_i32_0 = arith.constant 0 : i32
    %c0_i32_1 = arith.constant 0 : i32
    return %c0_i32, %c0_i32_0 : i32, i32
  }
  func.func @transform_2(%arg0: i32) -> (i32, i32) {
    %c0_i32 = arith.constant 0 : i32
    %c0_i32_0 = arith.constant 0 : i32
    %c0_i32_1 = arith.constant 0 : i32
    return %c0_i32, %c0_i32_0 : i32, i32
  }
  func.func @transform_3(%arg0: i32) -> (i32, i32) {
    %c0_i32 = arith.constant 0 : i32
    %c0_i32_0 = arith.constant 0 : i32
    %c0_i32_1 = arith.constant 0 : i32
    return %c0_i32, %c0_i32_0 : i32, i32
  }
  func.func @transform_4(%arg0: i32) -> (i32, i32) {
    %c0_i32 = arith.constant 0 : i32
    %c0_i32_0 = arith.constant 0 : i32
    %c0_i32_1 = arith.constant 0 : i32
    return %c0_i32, %c0_i32_0 : i32, i32
  }
  func.func @transform_5(%arg0: i32) -> (i32, i32) {
    %c0_i32 = arith.constant 0 : i32
    %c0_i32_0 = arith.constant 0 : i32
    %c0_i32_1 = arith.constant 0 : i32
    return %c0_i32, %c0_i32_0 : i32, i32
  }
  func.func @transform_6(%arg0: i32) -> (i32, i32) {
    %c0_i32 = arith.constant 0 : i32
    %c0_i32_0 = arith.constant 0 : i32
    %c0_i32_1 = arith.constant 0 : i32
    return %c0_i32, %c0_i32_0 : i32, i32
  }
  func.func @transform_7(%arg0: i32) -> (i32, i32, i32, i32) {
    %c0_i32 = arith.constant 0 : i32
    %c0_i32_0 = arith.constant 0 : i32
    %c0_i32_1 = arith.constant 0 : i32
    %c0_i32_2 = arith.constant 0 : i32
    return %arg0, %c0_i32, %c0_i32_0, %c0_i32_1 : i32, i32, i32, i32
  }
}

</mosaic_0001>

<bundles_post_ra>
// kernel: unet_block_reverse_forward.1
= control target key start
LH: loop header
LB: loop body
LE: loop exit
PB: predicated region body
PF: predicated region fallthrough
CT: control target
= control target key end

     0   :  { %s5827_s24 = smov 0   ;;  %s7967_s0 = inlined_call_operand.vmem [shape: f32[2,16,16,128], index: 0, kind: input, shape index: {}]   ;;  %s7968_s1 = inlined_call_operand.vmem [shape: bf16[1152,128], index: 1, kind: input, shape index: {}]   ;;  %s7969_s2 = inlined_call_operand.vmem [shape: f32[1,128], index: 2, kind: input, shape index: {}]   ;;  %s7970_s3 = inlined_call_operand.vmem [shape: f32[1,128], index: 3, kind: input, shape index: {}]   ;;  %s7971_s4 = inlined_call_operand.vmem [shape: bf16[1152,128], index: 4, kind: input, shape index: {}]   ;;  %s7972_s5 = inlined_call_operand.vmem [shape: f32[1,128], index: 5, kind: input, shape index: {}]   ;;  %s7973_s6 = inlined_call_operand.vmem [shape: f32[1,128], index: 6, kind: input, shape index: {}]   ;;  %s7974_s7 = inlined_call_operand.vmem [shape: f32[2,16,16,128], index: 7, kind: output, shape index: {}]  }
   0x1 LB: > { %s4421_s25 = sadd.s32 4294967295, %s5783_s24   ;;  %p4425_p0 = scmp.ge.s32.totalorder %s5783_s24, 1  ;;  %s5783_s24 = sphi %s5827_s24, %s17_s24  }
   0x2   : > { %p237_p1 = scmp.lt.s32.totalorder %s5783_s24, 3 }
   0x4   : > { %p238_p2 = pnand %p4425_p0, %p237_p1 }
   0x6   : > { %241 = sbr.rel (%p238_p2) target bundleno = 1054 (0x41e), region = 48 }
   0xb   : > { %v5838_v0 = vld [vmem:[%s7968_s1 + $0x78] sm:$0xff]   ;;  %v5785_v2 = vmov 0.0   ;;  %v5635_v5 = vld [vmem:[%s7968_s1 + $0x70] sm:$0xff]   ;;  %v5639_v9 = vld [vmem:[%s7968_s1 + $0x68] sm:$0xff]   ;;  %p269_p3 = scmp.lt.s32.totalorder %s4421_s25, 1  ;;  %v5786_v41 = vmov 0.0|0.0  }
   0xc   : > { %v5843_v1 = vld [vmem:[%s7968_s1 + $0xf8] sm:$0xff]   ;;  %280 = vst [vmem:[#allocation2] sm:$0xff] %v5785_v2  ;;  %281 = vst [vmem:[#allocation2 + $0x8] sm:$0xff] %v5785_v2  ;;  %4582 = vmatprep.subr.bf16.mxu0 %v5838_v0  ;;  %v5636_v6 = vld [vmem:[%s7968_s1 + $0xf0] sm:$0xff]  }
   0xd   : > { %282 = vst [vmem:[#allocation2 + $0x10] sm:$0x3] %v5785_v2  ;;  %283 = vst [vmem:[#allocation2 + $0x18] sm:$0xff] %v5785_v2  ;;  %v5633_v3 = vld [vmem:[%s7968_s1 + $0x38] sm:$0xff]   ;;  %4694 = vmatprep.subr.bf16.mxu1 %v5843_v1  ;;  %v5637_v7 = vld [vmem:[%s7968_s1 + $0x30] sm:$0xff]   ;;  %s8088_s25 = smov (!%p269_p3, %s4421_s25), 1 }
   0xe   : > { %284 = vst [vmem:[#allocation2 + $0x20] sm:$0xff] %v5785_v2  ;;  %285 = vst [vmem:[#allocation2 + $0x28] sm:$0x3] %v5785_v2  ;;  %v5634_v4 = vld [vmem:[%s7968_s1 + $0xb8] sm:$0xff]   ;;  %4583 = vmatpush3.bf16.msra.mxu0 %v5633_v3  ;;  %v5638_v8 = vld [vmem:[%s7968_s1 + $0xb0] sm:$0xff]   ;;  %s4580_s15 = sshll.u32 %s8088_s25, 8 }
   0xf   : > { %286 = vst [vmem:[#allocation2 + $0x30] sm:$0xff] %v5785_v2  ;;  %287 = vst [vmem:[#allocation2 + $0x38] sm:$0xff] %v5785_v2  ;;  %4695 = vmatpush3.bf16.msra.mxu1 %v5634_v4  ;;  %4584 = vmatprep.subr.bf16.mxu0 %v5635_v5  ;;  %v5640_v10 = vld [vmem:[%s7968_s1 + $0xe8] sm:$0xff]   ;;  %v5643_v13 = vld [vmem:[%s7968_s1 + $0x60] sm:$0xff]   ;;  %s6051_s26 = scalar_lea.vmem %s7967_s0, %s4580_s15  ;;  %s7772_s28 = scalar_lea.vmem %s7974_s7, %s4580_s15 }
  0x10   : > { %288 = vst [vmem:[#allocation2 + $0x40] sm:$0x3] %v5785_v2  ;;  %289 = vst [vmem:[#allocation2 + $0x48] sm:$0xff] %v5785_v2  ;;  %4696 = vmatprep.subr.bf16.mxu1 %v5636_v6  ;;  %v5641_v11 = vld [vmem:[%s7968_s1 + $0x28] sm:$0xff]   ;;  %v5644_v14 = vld [vmem:[%s7968_s1 + $0xe0] sm:$0xff]  }
  0x11   : > { %290 = vst [vmem:[#allocation2 + $0x50] sm:$0xff] %v5785_v2  ;;  %291 = vst [vmem:[#allocation2 + $0x58] sm:$0x3] %v5785_v2  ;;  %v5642_v12 = vld [vmem:[%s7968_s1 + $0xa8] sm:$0xff]   ;;  %v5645_v15 = vld [vmem:[%s7968_s1 + $0x20] sm:$0xff]  }
  0x12   : > { %292 = vst [vmem:[#allocation2 + $0x60] sm:$0xff] %v5785_v2  ;;  %293 = vst [vmem:[#allocation2 + $0x68] sm:$0xff] %v5785_v2  ;;  %4585 = vmatpush3.bf16.msra.mxu0 %v5637_v7  ;;  %v5646_v16 = vld [vmem:[%s7968_s1 + $0xa0] sm:$0xff]   ;;  %v5647_v17 = vld [vmem:[%s7968_s1 + $0x58] sm:$0xff]  }
  0x13   : > { %294 = vst [vmem:[#allocation2 + $0x70] sm:$0x3] %v5785_v2  ;;  %295 = vst [vmem:[#allocation2 + $0x78] sm:$0xff] %v5785_v2  ;;  %4697 = vmatpush3.bf16.msra.mxu1 %v5638_v8  ;;  %4586 = vmatprep.subr.bf16.mxu0 %v5639_v9  ;;  %v5648_v18 = vld [vmem:[%s7968_s1 + $0xd8] sm:$0xff]   ;;  %v5651_v21 = vld [vmem:[%s7968_s1 + $0x50] sm:$0xff]  }
  0x14   : > { %296 = vst [vmem:[#allocation2 + $0x80] sm:$0xff] %v5785_v2  ;;  %297 = vst [vmem:[#allocation2 + $0x88] sm:$0x3] %v5785_v2  ;;  %4698 = vmatprep.subr.bf16.mxu1 %v5640_v10  ;;  %v5649_v19 = vld [vmem:[%s7968_s1 + $0x18] sm:$0xff]   ;;  %v5652_v22 = vld [vmem:[%s7968_s1 + $0xd0] sm:$0xff]  }
  0x15   : > { %298 = vst [vmem:[#allocation2 + $0x90] sm:$0xff] %v5785_v2  ;;  %299 = vst [vmem:[#allocation2 + $0x98] sm:$0xff] %v5785_v2  ;;  %v5650_v20 = vld [vmem:[%s7968_s1 + $0x98] sm:$0xff]   ;;  %v5653_v23 = vld [vmem:[%s7968_s1 + $0x10] sm:$0xff]  }
  0x16   : > { %300 = vst [vmem:[#allocation2 + $0xa0] sm:$0x3] %v5785_v2  ;;  %301 = vst [vmem:[#allocation2 + $0xa8] sm:$0xff] %v5785_v2  ;;  %4587 = vmatpush3.bf16.msra.mxu0 %v5641_v11  ;;  %v5654_v24 = vld [vmem:[%s7968_s1 + $0x90] sm:$0xff]   ;;  %v5655_v25 = vld [vmem:[%s7968_s1 + $0x48] sm:$0xff]  }
  0x17   : > { %302 = vst [vmem:[#allocation2 + $0xb0] sm:$0xff] %v5785_v2  ;;  %303 = vst [vmem:[#allocation2 + $0xb8] sm:$0x3] %v5785_v2  ;;  %4699 = vmatpush3.bf16.msra.mxu1 %v5642_v12  ;;  %4588 = vmatprep.subr.bf16.mxu0 %v5643_v13  ;;  %v5656_v26 = vld [vmem:[%s7968_s1 + $0xc8] sm:$0xff]   ;;  %v5659_v29 = vld [vmem:[%s7968_s1 + $0x40] sm:$0xff]  }
  0x18   : > { %304 = vst [vmem:[#allocation2 + $0xc0] sm:$0xff] %v5785_v2  ;;  %305 = vst [vmem:[#allocation2 + $0xc8] sm:$0xff] %v5785_v2  ;;  %4700 = vmatprep.subr.bf16.mxu1 %v5644_v14  ;;  %v5657_v27 = vld [vmem:[%s7968_s1 + $0x8] sm:$0xff]   ;;  %v5660_v30 = vld [vmem:[%s7968_s1 + $0xc0] sm:$0xff]  }
  0x19   : > { %306 = vst [vmem:[#allocation2 + $0xd0] sm:$0x3] %v5785_v2  ;;  %307 = vst [vmem:[#allocation2 + $0xd8] sm:$0xff] %v5785_v2  ;;  %v5658_v28 = vld [vmem:[%s7968_s1 + $0x88] sm:$0xff]   ;;  %v5661_v31 = vld [vmem:[%s7968_s1] sm:$0xff]  }
  0x1a   : > { %308 = vst [vmem:[#allocation2 + $0xe0] sm:$0xff] %v5785_v2  ;;  %309 = vst [vmem:[#allocation2 + $0xe8] sm:$0x3] %v5785_v2  ;;  %4589 = vmatpush3.bf16.msra.mxu0 %v5645_v15  ;;  %v5662_v32 = vld [vmem:[%s7968_s1 + $0x80] sm:$0xff]   ;;  %v432_v34 = vld [vmem:[#allocation2 + $0x9] sm:$0xff] }
  0x1b   : > { %310 = vst [vmem:[#allocation2 + $0xf0] sm:$0xff] %v5785_v2  ;;  %311 = vst [vmem:[#allocation2 + $0xf8] sm:$0xff] %v5785_v2  ;;  %4701 = vmatpush3.bf16.msra.mxu1 %v5646_v16  ;;  %4590 = vmatprep.subr.bf16.mxu0 %v5647_v17  ;;  %v431_v33 = vld [vmem:[#allocation2 + $0x1] sm:$0xff]  ;;  %v5663_v38 = vld [vmem:[%s7968_s1 + $0x178] sm:$0xff]  }
  0x1c   : > { %312 = vst [vmem:[#allocation2 + $0x100] sm:$0x3] %v5785_v2  ;;  %313 = vst [vmem:[#allocation2 + $0x108] sm:$0xff] %v5785_v2  ;;  %4702 = vmatprep.subr.bf16.mxu1 %v5648_v18  ;;  %v334_v35 = vld [vmem:[%s6051_s26] sm:$0xff]  ;;  %v689_v36 = vpack.c.bf16 %v432_v34, %v431_v33  ;;  %v335_v37 = vld [vmem:[%s6051_s26 + $0x8] sm:$0xff] }
  0x1d   : > { %314 = vst [vmem:[#allocation2 + $0x110] sm:$0xff] %v5785_v2  ;;  %315 = vst [vmem:[#allocation2 + $0x118] sm:$0x3] %v5785_v2  ;;  %v6064_v39 = vpack.c.bf16 %v335_v37, %v334_v35  ;;  %v5664_v40 = vld [vmem:[%s7968_s1 + $0x138] sm:$0xff]   ;;  %v463_v42 = vld [vmem:[#allocation2 + $0x2] sm:$0xff] }
  0x1e   : > { %316 = vst [vmem:[#allocation2 + $0x120] sm:$0xff] %v5785_v2  ;;  %317 = vst [vmem:[#allocation2 + $0x128] sm:$0xff] %v5785_v2  ;;  %4591 = vmatpush3.bf16.msra.mxu0 %v5649_v19  ;;  %1440 = vmatprep.mubr.bf16.mxu0 %v689_v36  ;;  %v464_v43 = vld [vmem:[#allocation2 + $0xa] sm:$0xff]  ;;  %v337_v45 = vld [vmem:[%s6051_s26 + $0x18] sm:$0xff] }
  0x1f   : > { %318 = vst [vmem:[#allocation2 + $0x130] sm:$0x3] %v5785_v2  ;;  %319 = vst [vmem:[#allocation2 + $0x138] sm:$0xff] %v5785_v2  ;;  %4703 = vmatpush3.bf16.msra.mxu1 %v5650_v20  ;;  %4592 = vmatprep.subr.bf16.mxu0 %v5651_v21  ;;  %v336_v44 = vld [vmem:[%s6051_s26 + $0x10] sm:$0xff]  ;;  %v338_v46 = vld [vmem:[%s6051_s26 + $0x20] sm:$0xff]  ;;  %v690_v56 = vpack.c.bf16 %v464_v43, %v463_v42 }
  0x20   : > { %320 = vst [vmem:[#allocation2 + $0x140] sm:$0xff] %v5785_v2  ;;  %321 = vst [vmem:[#allocation2 + $0x148] sm:$0x3] %v5785_v2  ;;  %4704 = vmatprep.subr.bf16.mxu1 %v5652_v22  ;;  %v339_v47 = vld [vmem:[%s6051_s26 + $0x28] sm:$0xff]  ;;  %v5665_v48 = vld [vmem:[%s7968_s1 + $0x170] sm:$0xff]   ;;  %v6094_v57 = vpack.c.bf16 %v337_v45, %v336_v44 }
  0x21   : > { %322 = vst [vmem:[#allocation2 + $0x150] sm:$0xff] %v5785_v2  ;;  %323 = vst [vmem:[#allocation2 + $0x158] sm:$0xff] %v5785_v2  ;;  %v5666_v49 = vld [vmem:[%s7968_s1 + $0x130] sm:$0xff]   ;;  %v6084_v51 = vld [vmem:[%s6051_s26 + $0x38] sm:$0xff]  ;;  %v6114_v6 = vpack.c.bf16 %v339_v47, %v338_v46 }
  0x22   : > { %324 = vst [vmem:[#allocation2 + $0x160] sm:$0x3] %v5785_v2  ;;  %325 = vst [vmem:[#allocation2 + $0x168] sm:$0xff] %v5785_v2  ;;  %4593 = vmatpush3.bf16.msra.mxu0 %v5653_v23  ;;  %v6081_v50 = vld [vmem:[%s6051_s26 + $0x30] sm:$0xff]  ;;  %v6089_v53 = vld [vmem:[%s6051_s26 + $0x40] sm:$0xff] }
  0x23   : > { %326 = vst [vmem:[#allocation2 + $0x170] sm:$0xff] %v5785_v2  ;;  %327 = vst [vmem:[#allocation2 + $0x178] sm:$0x3] %v5785_v2  ;;  %4705 = vmatpush3.bf16.msra.mxu1 %v5654_v24  ;;  %4594 = vmatprep.subr.bf16.mxu0 %v5655_v25  ;;  %v6092_v54 = vld [vmem:[%s6051_s26 + $0x48] sm:$0xff]  ;;  %v6117_v7 = vld [vmem:[%s6051_s26 + $0x58] sm:$0xff] }
  0x24   : > { %328 = vst [vmem:[#allocation2 + $0x180] sm:$0xff] %v5785_v2  ;;  %329 = vst [vmem:[#allocation2 + $0x188] sm:$0xff] %v5785_v2  ;;  %4706 = vmatprep.subr.bf16.mxu1 %v5656_v26  ;;  %v5667_v59 = vld [vmem:[%s7968_s1 + $0x168] sm:$0xff]   ;;  %v6123_v9 = vld [vmem:[%s6051_s26 + $0x60] sm:$0xff]  ;;  %v6172_v26 = vpack.c.bf16 %v6084_v51, %v6081_v50  ;;  %v6197_v36 = vpack.c.bf16 %v6092_v54, %v6089_v53 }
  0x25   : > { %330 = vst [vmem:[#allocation2 + $0x190] sm:$0x3] %v5785_v2  ;;  %331 = vst [vmem:[#allocation2 + $0x198] sm:$0xff] %v5785_v2  ;;  %v5668_v60 = vld [vmem:[%s7968_s1 + $0x128] sm:$0xff]   ;;  %v5669_v11 = vld [vmem:[%s7968_s1 + $0x160] sm:$0xff]  }
  0x26   : > { %332 = vst [vmem:[#allocation2 + $0x1a0] sm:$0xff] %v5785_v2  ;;  %333 = vst [vmem:[#allocation2 + $0x1a8] sm:$0x3] %v5785_v2  ;;  %4595 = vmatpush3.bf16.msra.mxu0 %v5657_v27  ;;  %v6126_v10 = vld [vmem:[%s6051_s26 + $0x68] sm:$0xff]  ;;  %v5670_v14 = vld [vmem:[%s7968_s1 + $0x120] sm:$0xff]  }
  0x27   : > { %2323 = vst [vmem:[#allocation3] sm:$0xff] %v5785_v2  ;;  %2324 = vst [vmem:[#allocation3 + $0x8] sm:$0xff] %v5785_v2  ;;  %4707 = vmatpush3.bf16.msra.mxu1 %v5658_v28  ;;  %4596 = vmatprep.subr.bf16.mxu0 %v5659_v29  ;;  %v6138_v15 = vld [vmem:[%s6051_s26 + $0x70] sm:$0xff]  ;;  %v6143_v17 = vld [vmem:[%s6051_s26 + $0x78] sm:$0xff] }
  0x28   : > { %2325 = vst [vmem:[#allocation3 + $0x10] sm:$0x3] %v5785_v2  ;;  %2326 = vst [vmem:[#allocation3 + $0x18] sm:$0xff] %v5785_v2  ;;  %4708 = vmatprep.subr.bf16.mxu1 %v5660_v30  ;;  %v6147_v18 = vld [vmem:[%s6051_s26 + $0x80] sm:$0xff]  ;;  %v6150_v19 = vld [vmem:[%s6051_s26 + $0x88] sm:$0xff] }
  0x29   : > { %2327 = vst [vmem:[#allocation3 + $0x20] sm:$0xff] %v5785_v2  ;;  %2328 = vst [vmem:[#allocation3 + $0x28] sm:$0x3] %v5785_v2  ;;  %v5671_v21 = vld [vmem:[%s7968_s1 + $0x158] sm:$0xff]   ;;  %v6163_v23 = vld [vmem:[%s6051_s26 + $0x90] sm:$0xff] }
  0x2a   : > { %2329 = vst [vmem:[#allocation3 + $0x30] sm:$0xff] %v5785_v2  ;;  %2330 = vst [vmem:[#allocation3 + $0x38] sm:$0xff] %v5785_v2  ;;  %4597 = vmatpush3.bf16.msra.mxu0 %v5661_v31  ;;  %v5672_v22 = vld [vmem:[%s7968_s1 + $0x118] sm:$0xff]   ;;  %v6179_v28 = vld [vmem:[%s6051_s26 + $0xa0] sm:$0xff] }
  0x2b   : > { %2331 = vst [vmem:[#allocation3 + $0x40] sm:$0x3] %v5785_v2  ;;  %2332 = vst [vmem:[#allocation3 + $0x48] sm:$0xff] %v5785_v2  ;;  %4709 = vmatpush3.bf16.msra.mxu1 %v5662_v32  ;;  %4806 = vmatprep.subr.bf16.mxu0 %v5663_v38  ;;  %v6166_v24 = vld [vmem:[%s6051_s26 + $0x98] sm:$0xff]  ;;  %v6182_v29 = vld [vmem:[%s6051_s26 + $0xa8] sm:$0xff] }
  0x2c   : > { %2333 = vst [vmem:[#allocation3 + $0x50] sm:$0xff] %v5785_v2  ;;  %2334 = vst [vmem:[#allocation3 + $0x58] sm:$0x3] %v5785_v2  ;;  %v5673_v34 = vld [vmem:[%s7968_s1 + $0x150] sm:$0xff]   ;;  %v6211_v42 = vld [vmem:[%s6051_s26 + $0xc0] sm:$0xff] }
  0x2d   : > { %2335 = vst [vmem:[#allocation3 + $0x60] sm:$0xff] %v5785_v2  ;;  %2336 = vst [vmem:[#allocation3 + $0x68] sm:$0xff] %v5785_v2  ;;  %1441 = vmatmul.mubr.bf16.vlgmr.msra.gmra.mxu0 %v5786_v41  ;;  %v6208_v41 = vld [vmem:[%s6051_s26 + $0xb8] sm:$0xff] }
  0x2e   : > { %2337 = vst [vmem:[#allocation3 + $0x70] sm:$0x3] %v5785_v2  ;;  %2338 = vst [vmem:[#allocation3 + $0x78] sm:$0xff] %v5785_v2  ;;  %4807 = vmatpush3.bf16.msra.mxu0 %v5664_v40  ;;  %1448 = vmatprep.mubr.bf16.mxu0 %v6064_v39  ;;  %v6205_v40 = vld [vmem:[%s6051_s26 + $0xb0] sm:$0xff] }
  0x2f   : > { %2339 = vst [vmem:[#allocation3 + $0x80] sm:$0xff] %v5785_v2  ;;  %2340 = vst [vmem:[#allocation3 + $0x88] sm:$0x3] %v5785_v2  ;;  %4808 = vmatprep.subr.bf16.mxu0 %v5665_v48  ;;  %v5675_v48 = vld [vmem:[%s7968_s1 + $0x148] sm:$0xff]  }
  0x30   : > { %2341 = vst [vmem:[#allocation3 + $0x90] sm:$0xff] %v5785_v2  ;;  %2342 = vst [vmem:[#allocation3 + $0x98] sm:$0xff] %v5785_v2 }
  0x31   : > { %2343 = vst [vmem:[#allocation3 + $0xa0] sm:$0x3] %v5785_v2  ;;  %2344 = vst [vmem:[#allocation3 + $0xa8] sm:$0xff] %v5785_v2 }
  0x32   : > { %2345 = vst [vmem:[#allocation3 + $0xb0] sm:$0xff] %v5785_v2  ;;  %2346 = vst [vmem:[#allocation3 + $0xb8] sm:$0x3] %v5785_v2  ;;  %4809 = vmatpush3.bf16.msra.mxu0 %v5666_v49  ;;  %v5676_v49 = vld [vmem:[%s7968_s1 + $0x108] sm:$0xff]  }
  0x33   : > { %2347 = vst [vmem:[#allocation3 + $0xc0] sm:$0xff] %v5785_v2  ;;  %2348 = vst [vmem:[#allocation3 + $0xc8] sm:$0xff] %v5785_v2  ;;  %4810 = vmatprep.subr.bf16.mxu0 %v5667_v59 }
  0x34   : > { %2349 = vst [vmem:[#allocation3 + $0xd0] sm:$0x3] %v5785_v2  ;;  %2350 = vst [vmem:[#allocation3 + $0xd8] sm:$0xff] %v5785_v2 }
  0x35   : > { %2351 = vst [vmem:[#allocation3 + $0xe0] sm:$0xff] %v5785_v2  ;;  %2352 = vst [vmem:[#allocation3 + $0xe8] sm:$0x3] %v5785_v2 }
  0x36   : > { %2353 = vst [vmem:[#allocation3 + $0xf0] sm:$0xff] %v5785_v2  ;;  %2354 = vst [vmem:[#allocation3 + $0xf8] sm:$0xff] %v5785_v2  ;;  %4811 = vmatpush3.bf16.msra.mxu0 %v5668_v60 }
  0x37   : > { %2355 = vst [vmem:[#allocation3 + $0x100] sm:$0x3] %v5785_v2  ;;  %2356 = vst [vmem:[#allocation3 + $0x108] sm:$0xff] %v5785_v2  ;;  %4812 = vmatprep.subr.bf16.mxu0 %v5669_v11  ;;  %v362_v11 = vld [vmem:[%s6051_s26 + $0xe0] sm:$0xff] }
  0x38   : > { %2357 = vst [vmem:[#allocation3 + $0x110] sm:$0xff] %v5785_v2  ;;  %2358 = vst [vmem:[#allocation3 + $0x118] sm:$0x3] %v5785_v2 }
  0x39   : > { %2359 = vst [vmem:[#allocation3 + $0x120] sm:$0xff] %v5785_v2  ;;  %2360 = vst [vmem:[#allocation3 + $0x128] sm:$0xff] %v5785_v2 }
  0x3a   : > { %2361 = vst [vmem:[#allocation3 + $0x130] sm:$0x3] %v5785_v2  ;;  %2362 = vst [vmem:[#allocation3 + $0x138] sm:$0xff] %v5785_v2  ;;  %4813 = vmatpush3.bf16.msra.mxu0 %v5670_v14 }
  0x3b   : > { %2363 = vst [vmem:[#allocation3 + $0x140] sm:$0xff] %v5785_v2  ;;  %2364 = vst [vmem:[#allocation3 + $0x148] sm:$0x3] %v5785_v2  ;;  %4814 = vmatprep.subr.bf16.mxu0 %v5671_v21 }
  0x3c   : > { %2365 = vst [vmem:[#allocation3 + $0x150] sm:$0xff] %v5785_v2  ;;  %2366 = vst [vmem:[#allocation3 + $0x158] sm:$0xff] %v5785_v2 }
  0x3d   : > { %2367 = vst [vmem:[#allocation3 + $0x160] sm:$0x3] %v5785_v2  ;;  %2368 = vst [vmem:[#allocation3 + $0x168] sm:$0xff] %v5785_v2 }
  0x3e   : > { %2369 = vst [vmem:[#allocation3 + $0x170] sm:$0xff] %v5785_v2  ;;  %2370 = vst [vmem:[#allocation3 + $0x178] sm:$0x3] %v5785_v2  ;;  %4815 = vmatpush3.bf16.msra.mxu0 %v5672_v22 }
  0x3f   : > { %2371 = vst [vmem:[#allocation3 + $0x180] sm:$0xff] %v5785_v2  ;;  %2372 = vst [vmem:[#allocation3 + $0x188] sm:$0xff] %v5785_v2  ;;  %4816 = vmatprep.subr.bf16.mxu0 %v5673_v34 }
  0x40   : > { %2373 = vst [vmem:[#allocation3 + $0x190] sm:$0x3] %v5785_v2  ;;  %2374 = vst [vmem:[#allocation3 + $0x198] sm:$0xff] %v5785_v2 }
  0x41   : > { %2375 = vst [vmem:[#allocation3 + $0x1a0] sm:$0xff] %v5785_v2  ;;  %2376 = vst [vmem:[#allocation3 + $0x1a8] sm:$0x3] %v5785_v2  ;;  %v6108_v2 = vld [vmem:[%s6051_s26 + $0x50] sm:$0xff] }
  0x42   : > { %367 = vst [vmem:[#allocation2 + $0x19] sm:$0xff] %v334_v35  ;;  %368 = vst [vmem:[#allocation2 + $0x21] sm:$0xff] %v335_v37  ;;  %v5674_v37 = vld [vmem:[%s7968_s1 + $0x110] sm:$0xff]  }
  0x43   : > { %369 = vst [vmem:[#allocation2 + $0x31] sm:$0xff] %v336_v44  ;;  %370 = vst [vmem:[#allocation2 + $0x39] sm:$0xff] %v337_v45  ;;  %4817 = vmatpush3.bf16.msra.mxu0 %v5674_v37  ;;  %v6218_v45 = vld [vmem:[%s6051_s26 + $0xc8] sm:$0xff]  ;;  %v6309_v37 = vpack.c.bf16 %v6143_v17, %v6138_v15 }
  0x44   : > { %371 = vst [vmem:[#allocation2 + $0x49] sm:$0xff] %v338_v46  ;;  %372 = vst [vmem:[#allocation2 + $0x51] sm:$0xff] %v339_v47  ;;  %4818 = vmatprep.subr.bf16.mxu0 %v5675_v48 }
  0x45   : > { %373 = vst [vmem:[#allocation2 + $0x61] sm:$0xff] %v6081_v50  ;;  %374 = vst [vmem:[#allocation2 + $0x69] sm:$0xff] %v6084_v51  ;;  %v5677_v50 = vld [vmem:[%s7968_s1 + $0x1f8] sm:$0xff]  }
  0x46   : > { %375 = vst [vmem:[#allocation2 + $0x79] sm:$0xff] %v6089_v53  ;;  %376 = vst [vmem:[#allocation2 + $0x81] sm:$0xff] %v6092_v54  ;;  %v5678_v51 = vld [vmem:[%s7968_s1 + $0x1b8] sm:$0xff]   ;;  %v6240_v53 = vpack.c.bf16 %v6117_v7, %v6108_v2  ;;  %4918 = vmatprep.subr.bf16.mxu1 %v5677_v50  ;;  %v5679_v54 = vld [vmem:[%s7968_s1 + $0x1f0] sm:$0xff]  }
  0x47   : > { %377 = vst [vmem:[#allocation2 + $0x91] sm:$0xff] %v6108_v2  ;;  %378 = vst [vmem:[#allocation2 + $0x99] sm:$0xff] %v6117_v7  ;;  %4819 = vmatpush3.bf16.msra.mxu0 %v5676_v49  ;;  %v5682_v2 = vld [vmem:[%s7968_s1 + $0x1a8] sm:$0xff]   ;;  %v6275_v7 = vpack.c.bf16 %v6126_v10, %v6123_v9 }
  0x48   : > { %379 = vst [vmem:[#allocation2 + $0xa9] sm:$0xff] %v6123_v9  ;;  %380 = vst [vmem:[#allocation2 + $0xb1] sm:$0xff] %v6126_v10  ;;  %v5685_v9 = vld [vmem:[%s7968_s1 + $0x140] sm:$0xff]  }
  0x49   : > { %v495_v52 = vld [vmem:[#allocation2 + $0x18] sm:$0xff]  ;;  %v496_v55 = vld [vmem:[#allocation2 + $0x20] sm:$0xff]  ;;  %381 = vst [vmem:[#allocation2 + $0xc1] sm:$0xff] %v6138_v15  ;;  %382 = vst [vmem:[#allocation2 + $0xc9] sm:$0xff] %v6143_v17  ;;  %4820 = vmatprep.subr.bf16.mxu0 %v5685_v9 }
  0x4a   : > { %v691_v58 = vpack.c.bf16 %v496_v55, %v495_v52  ;;  %v497_v61 = vld [vmem:[#allocation2 + $0x30] sm:$0xff]  ;;  %v498_v62 = vld [vmem:[#allocation2 + $0x38] sm:$0xff]  ;;  %v466_v1 = vld [vmem:[#allocation2 + $0x22] sm:$0xff]  ;;  %383 = vst [vmem:[#allocation2 + $0xd9] sm:$0xff] %v6147_v18 }
  0x4b   : > { %v6104_v63 = vpack.c.bf16 %v498_v62, %v497_v61  ;;  %v465_v0 = vld [vmem:[#allocation2 + $0x1a] sm:$0xff]  ;;  %v499_v3 = vld [vmem:[#allocation2 + $0x48] sm:$0xff]  ;;  %v500_v4 = vld [vmem:[#allocation2 + $0x50] sm:$0xff]  ;;  %384 = vst [vmem:[#allocation2 + $0xe1] sm:$0xff] %v6150_v19 }
  0x4c   : > { %1601 = vmatprep.mubr.bf16.mxu1 %v691_v58  ;;  %1449 = vmatmul.mubr.bf16.gmra.mxu0 %v691_v58  ;;  %v6112_v5 = vpack.c.bf16 %v466_v1, %v465_v0  ;;  %v6119_v8 = vpack.c.bf16 %v500_v4, %v499_v3  ;;  %v467_v12 = vld [vmem:[#allocation2 + $0x32] sm:$0xff]  ;;  %v468_v13 = vld [vmem:[#allocation2 + $0x3a] sm:$0xff]  ;;  %v502_v20 = vld [vmem:[#allocation2 + $0x68] sm:$0xff]  ;;  %385 = vst [vmem:[#allocation2 + $0xf1] sm:$0xff] %v6163_v23 }
  0x4d   : > { %1602 = vmatmul.mubr.bf16.vlgmr.msra.gmra.mxu1 %v690_v56  ;;  %1456 = vmatprep.mubr.bf16.mxu0 %v6094_v57  ;;  %v501_v16 = vld [vmem:[#allocation2 + $0x60] sm:$0xff]  ;;  %v6168_v25 = vpack.c.bf16 %v468_v13, %v467_v12  ;;  %386 = vst [vmem:[#allocation2 + $0xf9] sm:$0xff] %v6166_v24  ;;  %387 = vst [vmem:[#allocation2 + $0x109] sm:$0xff] %v6179_v28  ;;  %v469_v30 = vld [vmem:[#allocation2 + $0x4a] sm:$0xff] }
  0x4e   : > { %1609 = vmatprep.mubr.bf16.mxu1 %v6104_v63  ;;  %v6176_v27 = vpack.c.bf16 %v502_v20, %v501_v16  ;;  %388 = vst [vmem:[#allocation2 + $0x111] sm:$0xff] %v6182_v29  ;;  %v470_v31 = vld [vmem:[#allocation2 + $0x52] sm:$0xff]  ;;  %v504_v33 = vld [vmem:[#allocation2 + $0x80] sm:$0xff]  ;;  %389 = vst [vmem:[#allocation2 + $0x121] sm:$0xff] %v6205_v40  ;;  %4919 = vmatpush3.bf16.msra.mxu1 %v5678_v51 }
  0x4f   : > { %v503_v32 = vld [vmem:[#allocation2 + $0x78] sm:$0xff]  ;;  %v6193_v35 = vpack.c.bf16 %v470_v31, %v469_v30  ;;  %390 = vst [vmem:[#allocation2 + $0x129] sm:$0xff] %v6208_v41  ;;  %391 = vst [vmem:[#allocation2 + $0x139] sm:$0xff] %v6211_v42  ;;  %v471_v43 = vld [vmem:[#allocation2 + $0x62] sm:$0xff]  ;;  %4920 = vmatprep.subr.bf16.mxu1 %v5679_v54 }
  0x50   : > { %v6202_v38 = vpack.c.bf16 %v504_v33, %v503_v32  ;;  %v472_v44 = vld [vmem:[#allocation2 + $0x6a] sm:$0xff]  ;;  %v506_v47 = vld [vmem:[#allocation2 + $0x98] sm:$0xff]  ;;  %392 = vst [vmem:[#allocation2 + $0x141] sm:$0xff] %v6218_v45  ;;  %v474_v60 = vld [vmem:[#allocation2 + $0x82] sm:$0xff] }
  0x51   : > { %v505_v46 = vld [vmem:[#allocation2 + $0x90] sm:$0xff]  ;;  %v6236_v52 = vpack.c.bf16 %v472_v44, %v471_v43  ;;  %v6252_v58 = vld [vmem:[%s6051_s26 + $0xd8] sm:$0xff]  ;;  %v507_v61 = vld [vmem:[#allocation2 + $0xa8] sm:$0xff]  ;;  %395 = vst [vmem:[#allocation2 + $0x169] sm:$0xff] %v362_v11 }
  0x52   : > { %v6246_v55 = vld [vmem:[%s6051_s26 + $0xd0] sm:$0xff]  ;;  %v6248_v56 = vpack.c.bf16 %v506_v47, %v505_v46  ;;  %v473_v59 = vld [vmem:[#allocation2 + $0x7a] sm:$0xff]  ;;  %394 = vst [vmem:[#allocation2 + $0x159] sm:$0xff] %v6252_v58  ;;  %v5681_v1 = vld [vmem:[%s7968_s1 + $0x1e8] sm:$0xff]  }
  0x53   : > { %393 = vst [vmem:[#allocation2 + $0x151] sm:$0xff] %v6246_v55  ;;  %v508_v62 = vld [vmem:[#allocation2 + $0xb0] sm:$0xff]  ;;  %v5683_v3 = vld [vmem:[%s7968_s1 + $0x1e0] sm:$0xff]   ;;  %v6271_v4 = vpack.c.bf16 %v474_v60, %v473_v59  ;;  %v363_v12 = vld [vmem:[%s6051_s26 + $0xe8] sm:$0xff] }
  0x54   : > { %1457 = vmatmul.mubr.bf16.gmra.mxu0 %v6104_v63  ;;  %v5680_v0 = vld [vmem:[%s7968_s1 + $0x1b0] sm:$0xff]   ;;  %v6279_v13 = vpack.c.bf16 %v508_v62, %v507_v61  ;;  %396 = vst [vmem:[#allocation2 + $0x171] sm:$0xff] %v363_v12  ;;  %v6281_v14 = vpack.c.bf16 %v363_v12, %v362_v11  ;;  %v5684_v16 = vld [vmem:[%s7968_s1 + $0x1a0] sm:$0xff]   ;;  %v510_v22 = vld [vmem:[#allocation2 + $0xc8] sm:$0xff]  ;;  %v6346_v61 = vpack.c.bf16 %v6150_v19, %v6147_v18 }
  0x55   : > { %1610 = vmatmul.mubr.bf16.gmra.mxu1 %v6112_v5  ;;  %1464 = vmatprep.mubr.bf16.mxu0 %v6114_v6  ;;  %v475_v20 = vld [vmem:[#allocation2 + $0x92] sm:$0xff]  ;;  %v476_v21 = vld [vmem:[#allocation2 + $0x9a] sm:$0xff]  ;;  %v477_v48 = vld [vmem:[#allocation2 + $0xaa] sm:$0xff]  ;;  %v6362_v11 = vpack.c.bf16 %v6166_v24, %v6163_v23  ;;  %v6374_v23 = vpack.c.bf16 %v6182_v29, %v6179_v28  ;;  %v6386_v28 = vpack.c.bf16 %v6208_v41, %v6205_v40 }
  0x56   : > { %1617 = vmatprep.mubr.bf16.mxu1 %v6119_v8  ;;  %4921 = vmatpush3.bf16.msra.mxu1 %v5680_v0  ;;  %v509_v10 = vld [vmem:[#allocation2 + $0xc0] sm:$0xff]  ;;  %v5687_v31 = vld [vmem:[%s7968_s1 + $0x1d8] sm:$0xff]   ;;  %v5689_v33 = vld [vmem:[%s7968_s1 + $0x1d0] sm:$0xff]   ;;  %v6305_v34 = vpack.c.bf16 %v476_v21, %v475_v20  ;;  %v6398_v40 = vpack.c.bf16 %v6218_v45, %v6211_v42  ;;  %v6410_v42 = vpack.c.bf16 %v6252_v58, %v6246_v55 }
  0x57   : > { %4922 = vmatprep.subr.bf16.mxu1 %v5681_v1  ;;  %v5686_v30 = vld [vmem:[%s7968_s1 + $0x100] sm:$0xff]   ;;  %v5688_v32 = vld [vmem:[%s7968_s1 + $0x198] sm:$0xff]   ;;  %v6312_v43 = vld [vmem:[%s6051_s26 + $0xf0] sm:$0xff]  ;;  %v6314_v44 = vpack.c.bf16 %v510_v22, %v509_v10 }
  0x58   : > { %4821 = vmatpush3.bf16.msra.mxu0 %v5686_v30  ;;  %v6317_v46 = vld [vmem:[%s6051_s26 + $0xf8] sm:$0xff]  ;;  %397 = vst [vmem:[#allocation2 + $0x181] sm:$0xff] %v6312_v43  ;;  %v5690_v47 = vld [vmem:[%s7968_s1 + $0x190] sm:$0xff]   ;;  %v5691_v17 = vld [vmem:[%s7968_s1 + $0x1c8] sm:$0xff]  }
  0x59   : > { %398 = vst [vmem:[#allocation2 + $0x189] sm:$0xff] %v6317_v46  ;;  %v478_v15 = vld [vmem:[#allocation2 + $0xb2] sm:$0xff]  ;;  %v512_v50 = vld [vmem:[#allocation2 + $0xe0] sm:$0xff]  ;;  %v5692_v51 = vld [vmem:[%s7968_s1 + $0x188] sm:$0xff]  }
  0x5a   : > { %4923 = vmatpush3.bf16.msra.mxu1 %v5682_v2  ;;  %v511_v49 = vld [vmem:[#allocation2 + $0xd8] sm:$0xff]  ;;  %v5693_v54 = vld [vmem:[%s7968_s1 + $0x1c0] sm:$0xff]   ;;  %v6342_v60 = vpack.c.bf16 %v478_v15, %v477_v48  ;;  %v480_v2 = vld [vmem:[#allocation2 + $0xca] sm:$0xff] }
  0x5b   : > { %4924 = vmatprep.subr.bf16.mxu1 %v5683_v3  ;;  %v6340_v59 = vld [vmem:[%s7968_s1 + $0x238] sm:$0xff]   ;;  %v6348_v62 = vpack.c.bf16 %v512_v50, %v511_v49  ;;  %v5694_v0 = vld [vmem:[%s7968_s1 + $0x180] sm:$0xff]   ;;  %v513_v18 = vld [vmem:[#allocation2 + $0xf0] sm:$0xff] }
  0x5c   : > { %1465 = vmatmul.mubr.bf16.gmra.mxu0 %v6119_v8  ;;  %5526 = vmatprep.subr.bf16.mxu0 %v6340_v59  ;;  %v479_v1 = vld [vmem:[#allocation2 + $0xc2] sm:$0xff]  ;;  %v514_v19 = vld [vmem:[#allocation2 + $0xf8] sm:$0xff]  ;;  %v516_v9 = vld [vmem:[#allocation2 + $0x110] sm:$0xff] }
  0x5d   : > { %1618 = vmatmul.mubr.bf16.gmra.mxu1 %v6168_v25  ;;  %1472 = vmatprep.mubr.bf16.mxu0 %v6172_v26  ;;  %v6358_v3 = vpack.c.bf16 %v480_v2, %v479_v1  ;;  %v6364_v12 = vpack.c.bf16 %v514_v19, %v513_v18  ;;  %v482_v20 = vld [vmem:[#allocation2 + $0xe2] sm:$0xff]  ;;  %v483_v22 = vld [vmem:[#allocation2 + $0xf2] sm:$0xff]  ;;  %v484_v30 = vld [vmem:[#allocation2 + $0xfa] sm:$0xff] }
  0x5e   : > { %1625 = vmatprep.mubr.bf16.mxu1 %v6176_v27  ;;  %4925 = vmatpush3.bf16.msra.mxu1 %v5684_v16  ;;  %v481_v16 = vld [vmem:[#allocation2 + $0xda] sm:$0xff]  ;;  %v515_v21 = vld [vmem:[#allocation2 + $0x108] sm:$0xff]  ;;  %v486_v48 = vld [vmem:[#allocation2 + $0x112] sm:$0xff] }
  0x5f   : > { %4926 = vmatprep.subr.bf16.mxu1 %v5687_v31  ;;  %v6370_v10 = vpack.c.bf16 %v482_v20, %v481_v16  ;;  %v6376_v24 = vpack.c.bf16 %v516_v9, %v515_v21  ;;  %v517_v31 = vld [vmem:[#allocation2 + $0x120] sm:$0xff]  ;;  %v519_v15 = vld [vmem:[#allocation2 + $0x138] sm:$0xff]  ;;  %v523_v19 = vld [vmem:[#allocation2 + $0x168] sm:$0xff] }
  0x60   : > { %v487_v50 = vld [vmem:[#allocation2 + $0x122] sm:$0xff]  ;;  %v489_v2 = vld [vmem:[#allocation2 + $0x13a] sm:$0xff]  ;;  %v524_v16 = vld [vmem:[#allocation2 + $0x170] sm:$0xff] }
  0x61   : > { %v490_v18 = vld [vmem:[#allocation2 + $0x142] sm:$0xff]  ;;  %v6420_v21 = vpack.c.bf16 %v524_v16, %v523_v19  ;;  %v491_v55 = vld [vmem:[#allocation2 + $0x152] sm:$0xff]  ;;  %v492_v58 = vld [vmem:[#allocation2 + $0x15a] sm:$0xff] }
  0x62   : > { %4927 = vmatpush3.bf16.msra.mxu1 %v5688_v32  ;;  %v518_v32 = vld [vmem:[#allocation2 + $0x128] sm:$0xff]  ;;  %v6418_v20 = vpack.c.bf16 %v490_v18, %v489_v2  ;;  %v525_v9 = vld [vmem:[#allocation2 + $0x180] sm:$0xff]  ;;  %v5704_v16 = vld [vmem:[%s7971_s4 + $0x38] sm:$0xff]  }
  0x63   : > { %4928 = vmatprep.subr.bf16.mxu1 %v5689_v33  ;;  %v6382_v33 = vpack.c.bf16 %v484_v30, %v483_v22  ;;  %v6388_v29 = vpack.c.bf16 %v518_v32, %v517_v31  ;;  %v526_v22 = vld [vmem:[#allocation2 + $0x188] sm:$0xff]  ;;  %v6426_v30 = vpack.c.bf16 %v492_v58, %v491_v55 }
  0x64   : > { %1473 = vmatmul.mubr.bf16.gmra.mxu0 %v6176_v27  ;;  %v6428_v31 = vpack.c.bf16 %v526_v22, %v525_v9  ;;  %v493_v32 = vld [vmem:[#allocation2 + $0x16a] sm:$0xff] }
  0x65   : > { %1626 = vmatmul.mubr.bf16.gmra.mxu1 %v6193_v35  ;;  %1480 = vmatprep.mubr.bf16.mxu0 %v6197_v36 }
  0x66   : > { %1633 = vmatprep.mubr.bf16.mxu1 %v6202_v38  ;;  %4929 = vmatpush3.bf16.msra.mxu1 %v5690_v47  ;;  %v485_v47 = vld [vmem:[#allocation2 + $0x10a] sm:$0xff] }
  0x67   : > { %4930 = vmatprep.subr.bf16.mxu1 %v5691_v17  ;;  %v520_v17 = vld [vmem:[#allocation2 + $0x140] sm:$0xff]  ;;  %v6394_v49 = vpack.c.bf16 %v486_v48, %v485_v47  ;;  %v494_v47 = vld [vmem:[#allocation2 + $0x172] sm:$0xff] }
  0x68   : > { %v6400_v41 = vpack.c.bf16 %v520_v17, %v519_v15  ;;  %v6434_v48 = vpack.c.bf16 %v494_v47, %v493_v32  ;;  %v5696_v15 = vld [vmem:[%s7968_s1 + $0x230] sm:$0xff]   ;;  %v5698_v17 = vld [vmem:[%s7968_s1 + $0x220] sm:$0xff]  }
  0x6a   : > { %4931 = vmatpush3.bf16.msra.mxu1 %v5692_v51  ;;  %v488_v51 = vld [vmem:[#allocation2 + $0x12a] sm:$0xff] }
  0x6b   : > { %4932 = vmatprep.subr.bf16.mxu1 %v5693_v54  ;;  %v521_v54 = vld [vmem:[#allocation2 + $0x150] sm:$0xff]  ;;  %v6406_v1 = vpack.c.bf16 %v488_v51, %v487_v50 }
  0x6c   : > { %1481 = vmatmul.mubr.bf16.gmra.mxu0 %v6202_v38 }
  0x6d   : > { %1634 = vmatmul.mubr.bf16.gmra.mxu1 %v6236_v52  ;;  %1488 = vmatprep.mubr.bf16.mxu0 %v6240_v53 }
  0x6e   : > { %1641 = vmatprep.mubr.bf16.mxu1 %v6248_v56  ;;  %4933 = vmatpush3.bf16.msra.mxu1 %v5694_v0  ;;  %v522_v0 = vld [vmem:[#allocation2 + $0x158] sm:$0xff] }
  0x6f   : > { %v6412_v45 = vpack.c.bf16 %v522_v0, %v521_v54 }
  0x74   : > { %1489 = vmatmul.mubr.bf16.gmra.mxu0 %v6248_v56 }
  0x75   : > { %1642 = vmatmul.mubr.bf16.gmra.mxu1 %v6271_v4  ;;  %1496 = vmatprep.mubr.bf16.mxu0 %v6275_v7 }
  0x76   : > { %1649 = vmatprep.mubr.bf16.mxu1 %v6279_v13 }
  0x7c   : > { %1497 = vmatmul.mubr.bf16.gmra.mxu0 %v6279_v13 }
  0x7d   : > { %1650 = vmatmul.mubr.bf16.gmra.mxu1 %v6305_v34  ;;  %1504 = vmatprep.mubr.bf16.mxu0 %v6309_v37 }
  0x7e   : > { %1657 = vmatprep.mubr.bf16.mxu1 %v6314_v44 }
  0x84   : > { %1505 = vmatmul.mubr.bf16.gmra.mxu0 %v6314_v44 }
  0x85   : > { %1658 = vmatmul.mubr.bf16.gmra.mxu1 %v6342_v60  ;;  %1512 = vmatprep.mubr.bf16.mxu0 %v6346_v61 }
  0x86   : > { %1665 = vmatprep.mubr.bf16.mxu1 %v6348_v62 }
  0x8c   : > { %1513 = vmatmul.mubr.bf16.gmra.mxu0 %v6348_v62 }
  0x8d   : > { %1666 = vmatmul.mubr.bf16.gmra.mxu1 %v6358_v3  ;;  %1520 = vmatprep.mubr.bf16.mxu0 %v6362_v11 }
  0x8e   : > { %1673 = vmatprep.mubr.bf16.mxu1 %v6364_v12 }
  0x94   : > { %1521 = vmatmul.mubr.bf16.gmra.mxu0 %v6364_v12 }
  0x95   : > { %1674 = vmatmul.mubr.bf16.gmra.mxu1 %v6370_v10  ;;  %1528 = vmatprep.mubr.bf16.mxu0 %v6374_v23 }
  0x96   : > { %1681 = vmatprep.mubr.bf16.mxu1 %v6376_v24 }
  0x9c   : > { %1529 = vmatmul.mubr.bf16.gmra.mxu0 %v6376_v24 }
  0x9d   : > { %1682 = vmatmul.mubr.bf16.gmra.mxu1 %v6382_v33  ;;  %1536 = vmatprep.mubr.bf16.mxu0 %v6386_v28 }
  0x9e   : > { %1689 = vmatprep.mubr.bf16.mxu1 %v6388_v29 }
  0xa4   : > { %1537 = vmatmul.mubr.bf16.gmra.mxu0 %v6388_v29 }
  0xa5   : > { %1690 = vmatmul.mubr.bf16.gmra.mxu1 %v6394_v49  ;;  %1544 = vmatprep.mubr.bf16.mxu0 %v6398_v40 }
  0xa6   : > { %1697 = vmatprep.mubr.bf16.mxu1 %v6400_v41 }
  0xac   : > { %1545 = vmatmul.mubr.bf16.gmra.mxu0 %v6400_v41 }
  0xad   : > { %1698 = vmatmul.mubr.bf16.gmra.mxu1 %v6406_v1  ;;  %1552 = vmatprep.mubr.bf16.mxu0 %v6410_v42 }
  0xae   : > { %1705 = vmatprep.mubr.bf16.mxu1 %v6412_v45 }
  0xb4   : > { %1553 = vmatmul.mubr.bf16.gmra.mxu0 %v6412_v45 }
  0xb5   : > { %1706 = vmatmul.mubr.bf16.gmra.mxu1 %v6418_v20  ;;  %1560 = vmatprep.mubr.bf16.mxu0 %v6281_v14 }
  0xb6   : > { %1713 = vmatprep.mubr.bf16.mxu1 %v6420_v21 }
  0xbc   : > { %1561 = vmatmul.mubr.bf16.gmra.mxu0 %v6420_v21 }
  0xbd   : > { %1714 = vmatmul.mubr.bf16.gmra.mxu1 %v6426_v30  ;;  %1762 = vmatprep.mubr.bf16.mxu0 %v6112_v5  ;;  %v5697_v5 = vld [vmem:[%s7968_s1 + $0x228] sm:$0xff]  }
  0xbe   : > { %1721 = vmatprep.mubr.bf16.mxu1 %v6428_v31 }
  0xc4   : > { %1763 = vmatmul.mubr.bf16.vlgmr.msra.gmra.mxu0 %v6064_v39  ;;  %v5699_v39 = vld [vmem:[%s7968_s1 + $0x218] sm:$0xff]  }
  0xc5   : > { %1722 = vmatmul.mubr.bf16.gmra.mxu1 %v6434_v48  ;;  %5527 = vmatpush3.bf16.msra.mxu0 %v6340_v59 }
  0xc6   : > { %1923 = vmatprep.mubr.bf16.mxu1 %v6094_v57  ;;  %1770 = vmatprep.mubr.bf16.mxu0 %v6168_v25  ;;  %v5700_v25 = vld [vmem:[%s7968_s1 + $0x210] sm:$0xff]  }
  0xc7   : > { %5528 = vmatprep.subr.bf16.mxu0 %v5696_v15 }
  0xc9   : > { %5529 = vmatpush3.bf16.msra.mxu0 %v5696_v15 }
  0xca   : > { %5530 = vmatprep.subr.bf16.mxu0 %v5697_v5 }
  0xcc   : > { %1771 = vmatmul.mubr.bf16.gmra.mxu0 %v6094_v57  ;;  %v5701_v57 = vld [vmem:[%s7968_s1 + $0x208] sm:$0xff]  }
  0xcd   : > { %1924 = vmatmul.mubr.bf16.vlgmr.msra.gmra.mxu1 %v6104_v63  ;;  %1778 = vmatprep.mubr.bf16.mxu0 %v6193_v35  ;;  %v5702_v63 = vld [vmem:[%s7968_s1 + $0x200] sm:$0xff]  }
  0xce   : > { %1931 = vmatprep.mubr.bf16.mxu1 %v6114_v6  ;;  %5531 = vmatpush3.bf16.msra.mxu0 %v5697_v5 }
  0xcf   : > { %5532 = vmatprep.subr.bf16.mxu0 %v5698_v17 }
  0xd2   : > { %5533 = vmatpush3.bf16.msra.mxu0 %v5698_v17 }
  0xd3   : > { %5534 = vmatprep.subr.bf16.mxu0 %v5699_v39 }
  0xd4   : > { %1779 = vmatmul.mubr.bf16.gmra.mxu0 %v6114_v6 }
  0xd5   : > { %1932 = vmatmul.mubr.bf16.gmra.mxu1 %v6119_v8  ;;  %1786 = vmatprep.mubr.bf16.mxu0 %v6236_v52 }
  0xd6   : > { %1939 = vmatprep.mubr.bf16.mxu1 %v6172_v26  ;;  %5535 = vmatpush3.bf16.msra.mxu0 %v5699_v39 }
  0xd7   : > { %5536 = vmatprep.subr.bf16.mxu0 %v5700_v25 }
  0xda   : > { %5537 = vmatpush3.bf16.msra.mxu0 %v5700_v25 }
  0xdb   : > { %5538 = vmatprep.subr.bf16.mxu0 %v5701_v57 }
  0xdc   : > { %1787 = vmatmul.mubr.bf16.gmra.mxu0 %v6172_v26 }
  0xdd   : > { %1940 = vmatmul.mubr.bf16.gmra.mxu1 %v6176_v27  ;;  %1794 = vmatprep.mubr.bf16.mxu0 %v6271_v4 }
  0xde   : > { %1947 = vmatprep.mubr.bf16.mxu1 %v6197_v36  ;;  %5539 = vmatpush3.bf16.msra.mxu0 %v5701_v57 }
  0xdf   : > { %5540 = vmatprep.subr.bf16.mxu0 %v5702_v63 }
  0xe2   : > { %5541 = vmatpush3.bf16.msra.mxu0 %v5702_v63 }
  0xe4   : > { %1795 = vmatmul.mubr.bf16.gmra.mxu0 %v6197_v36 }
  0xe5   : > { %1948 = vmatmul.mubr.bf16.gmra.mxu1 %v6202_v38  ;;  %1802 = vmatprep.mubr.bf16.mxu0 %v6305_v34 }
  0xe6   : > { %1955 = vmatprep.mubr.bf16.mxu1 %v6240_v53 }
  0xec   : > { %1803 = vmatmul.mubr.bf16.gmra.mxu0 %v6240_v53 }
  0xed   : > { %1956 = vmatmul.mubr.bf16.gmra.mxu1 %v6248_v56  ;;  %1810 = vmatprep.mubr.bf16.mxu0 %v6342_v60  ;;  %v4598_v6 = vpop.f32.mrf.mxu0 }
  0xee   : > { %1963 = vmatprep.mubr.bf16.mxu1 %v6275_v7 }
  0xef   : > { %v4599_v8 = vpop.f32.mrf.mxu0 }
  0xf0   : > { %v4600_v26 = vadd.f32 %v4599_v8, %v4598_v6 }
  0xf1   : > { %v4601_v27 = vpop.f32.mrf.mxu0 }
  0xf3   : > { %v4602_v35 = vpop.f32.mrf.mxu0 }
  0xf4   : > { %1811 = vmatmul.mubr.bf16.gmra.mxu0 %v6275_v7  ;;  %v4603_v36 = vadd.f32 %v4602_v35, %v4601_v27 }
  0xf5   : > { %1964 = vmatmul.mubr.bf16.gmra.mxu1 %v6279_v13  ;;  %1818 = vmatprep.mubr.bf16.mxu0 %v6358_v3 }
  0xf6   : > { %1971 = vmatprep.mubr.bf16.mxu1 %v6309_v37 }
  0xfc   : > { %1819 = vmatmul.mubr.bf16.gmra.mxu0 %v6309_v37 }
  0xfd   : > { %1972 = vmatmul.mubr.bf16.gmra.mxu1 %v6314_v44  ;;  %1826 = vmatprep.mubr.bf16.mxu0 %v6370_v10 }
  0xfe   : > { %1979 = vmatprep.mubr.bf16.mxu1 %v6346_v61 }
 0x104   : > { %1827 = vmatmul.mubr.bf16.gmra.mxu0 %v6346_v61 }
 0x105   : > { %1980 = vmatmul.mubr.bf16.gmra.mxu1 %v6348_v62  ;;  %1834 = vmatprep.mubr.bf16.mxu0 %v6382_v33 }
 0x106   : > { %1987 = vmatprep.mubr.bf16.mxu1 %v6362_v11 }
 0x10c   : > { %v4604_v38 = vpop.f32.mrf.mxu0  ;;  %1835 = vmatmul.mubr.bf16.gmra.mxu0 %v6362_v11 }
 0x10d   : > { %v4710_v52 = vpop.f32.mrf.mxu1  ;;  %1988 = vmatmul.mubr.bf16.gmra.mxu1 %v6364_v12  ;;  %1842 = vmatprep.mubr.bf16.mxu0 %v6394_v49 }
 0x10e   : > { %1995 = vmatprep.mubr.bf16.mxu1 %v6374_v23  ;;  %v4605_v53 = vpop.f32.mrf.mxu0 }
 0x10f   : > { %v4711_v56 = vpop.f32.mrf.mxu1  ;;  %v4606_v4 = vadd.f32 %v4605_v53, %v4604_v38 }
 0x110   : > { %v4712_v7 = vadd.f32 %v4711_v56, %v4710_v52  ;;  %v4607_v13 = vpop.f32.mrf.mxu0 }
 0x111   : > { %v4713_v34 = vpop.f32.mrf.mxu1 }
 0x112   : > { %v6498_v37 = vadd.f32 %v4712_v7, %v4600_v26  ;;  %v4608_v44 = vpop.f32.mrf.mxu0 }
 0x113   : > { %v4714_v59 = vpop.f32.mrf.mxu1  ;;  %v4609_v60 = vadd.f32 %v4608_v44, %v4607_v13 }
 0x114   : > { %v4715_v61 = vadd.f32 %v4714_v59, %v4713_v34  ;;  %v4610_v62 = vpop.f32.mrf.mxu0  ;;  %1843 = vmatmul.mubr.bf16.gmra.mxu0 %v6374_v23  ;;  %v589_v34 = vld [vmem:[#allocation2 + $0x182] sm:$0xff] }
 0x115   : > { %v4716_v3 = vpop.f32.mrf.mxu1  ;;  %1996 = vmatmul.mubr.bf16.gmra.mxu1 %v6376_v24  ;;  %1850 = vmatprep.mubr.bf16.mxu0 %v6406_v1  ;;  %v5703_v1 = vld [vmem:[%s7971_s4 + $0x78] sm:$0xff]  }
 0x116   : > { %v6503_v11 = vadd.f32 %v4715_v61, %v4603_v36  ;;  %2003 = vmatprep.mubr.bf16.mxu1 %v6386_v28  ;;  %v4611_v12 = vpop.f32.mrf.mxu0  ;;  %5054 = vmatprep.subr.bf16.mxu1 %v5703_v1 }
 0x117   : > { %v4717_v10 = vpop.f32.mrf.mxu1  ;;  %v4612_v33 = vadd.f32 %v4611_v12, %v4610_v62  ;;  %5055 = vmatpush3.bf16.msra.mxu1 %v5704_v16  ;;  %v821_v12 = vpack.c.bf16 %v6317_v46, %v6312_v43  ;;  %v654_v43 = vld [vmem:[#allocation2 + $0x199] sm:$0xff]  ;;  %v655_v46 = vld [vmem:[#allocation2 + $0x1a1] sm:$0xff] }
 0x118   : > { %v4718_v49 = vadd.f32 %v4717_v10, %v4716_v3  ;;  %v4613_v50 = vpop.f32.mrf.mxu0 }
 0x119   : > { %v4719_v51 = vpop.f32.mrf.mxu1 }
 0x11a   : > { %v6506_v54 = vadd.f32 %v4718_v49, %v4606_v4  ;;  %v4614_v0 = vpop.f32.mrf.mxu0  ;;  %v5706_v4 = vld [vmem:[%s7971_s4 + $0x30] sm:$0xff]  }
 0x11b   : > { %v4720_v2 = vpop.f32.mrf.mxu1  ;;  %v4615_v23 = vadd.f32 %v4614_v0, %v4613_v50 }
 0x11c   : > { %v4721_v18 = vadd.f32 %v4720_v2, %v4719_v51  ;;  %v4616_v19 = vpop.f32.mrf.mxu0  ;;  %1851 = vmatmul.mubr.bf16.gmra.mxu0 %v6386_v28 }
 0x11d   : > { %v4722_v24 = vpop.f32.mrf.mxu1  ;;  %2004 = vmatmul.mubr.bf16.gmra.mxu1 %v6388_v29  ;;  %1858 = vmatprep.mubr.bf16.mxu0 %v6418_v20 }
 0x11e   : > { %v6517_v55 = vadd.f32 %v4721_v18, %v4609_v60  ;;  %2011 = vmatprep.mubr.bf16.mxu1 %v6398_v40  ;;  %v4617_v58 = vpop.f32.mrf.mxu0  ;;  %v657_v18 = vld [vmem:[#allocation2 + $0x3a] sm:$0xff] }
 0x11f   : > { %v4723_v9 = vpop.f32.mrf.mxu1  ;;  %v4618_v28 = vadd.f32 %v4617_v58, %v4616_v19 }
 0x120   : > { %v4724_v22 = vadd.f32 %v4723_v9, %v4722_v24  ;;  %v4619_v29 = vpop.f32.mrf.mxu0 }
 0x121   : > { %v4725_v20 = vpop.f32.mrf.mxu1 }
 0x122   : > { %v6520_v32 = vadd.f32 %v4724_v22, %v4612_v33  ;;  %v4620_v47 = vpop.f32.mrf.mxu0 }
 0x123   : > { %v4726_v15 = vpop.f32.mrf.mxu1  ;;  %v4621_v5 = vadd.f32 %v4620_v47, %v4619_v29 }
 0x124   : > { %v4727_v17 = vadd.f32 %v4726_v15, %v4725_v20  ;;  %v4622_v39 = vpop.f32.mrf.mxu0  ;;  %1859 = vmatmul.mubr.bf16.gmra.mxu0 %v6398_v40  ;;  %v658_v15 = vld [vmem:[#allocation2 + $0x4a] sm:$0xff] }
 0x125   : > { %v4728_v25 = vpop.f32.mrf.mxu1  ;;  %2012 = vmatmul.mubr.bf16.gmra.mxu1 %v6400_v41  ;;  %1866 = vmatprep.mubr.bf16.mxu0 %v6426_v30  ;;  %v5705_v30 = vld [vmem:[%s7971_s4 + $0x70] sm:$0xff]  }
 0x126   : > { %v6525_v57 = vadd.f32 %v4727_v17, %v4615_v23  ;;  %2019 = vmatprep.mubr.bf16.mxu1 %v6410_v42  ;;  %v4623_v63 = vpop.f32.mrf.mxu0  ;;  %5056 = vmatprep.subr.bf16.mxu1 %v5705_v30  ;;  %v656_v23 = vld [vmem:[#allocation2 + $0x32] sm:$0xff] }
 0x127   : > { %v4729_v6 = vpop.f32.mrf.mxu1  ;;  %v4624_v8 = vadd.f32 %v4623_v63, %v4622_v39  ;;  %5057 = vmatpush3.bf16.msra.mxu1 %v5706_v4  ;;  %v696_v9 = vpack.c.bf16 %v657_v18, %v656_v23  ;;  %v659_v17 = vld [vmem:[#allocation2 + $0x52] sm:$0xff]  ;;  %v5707_v39 = vld [vmem:[%s7971_s4 + $0x68] sm:$0xff]  }
 0x128   : > { %v4730_v26 = vadd.f32 %v4729_v6, %v4728_v25  ;;  %v4625_v27 = vpop.f32.mrf.mxu0  ;;  %v5708_v25 = vld [vmem:[%s7971_s4 + $0x28] sm:$0xff]   ;;  %5058 = vmatprep.subr.bf16.mxu1 %v5707_v39 }
 0x129   : > { %v4731_v35 = vpop.f32.mrf.mxu1 }
 0x12a   : > { %v6528_v36 = vadd.f32 %v4730_v26, %v4618_v28  ;;  %v4626_v38 = vpop.f32.mrf.mxu0  ;;  %v661_v26 = vld [vmem:[#allocation2 + $0x6a] sm:$0xff] }
 0x12b   : > { %v4732_v52 = vpop.f32.mrf.mxu1  ;;  %v4627_v40 = vadd.f32 %v4626_v38, %v4625_v27  ;;  %5059 = vmatpush3.bf16.msra.mxu1 %v5708_v25 }
 0x12c   : > { %v4733_v53 = vadd.f32 %v4732_v52, %v4731_v35  ;;  %v4628_v56 = vpop.f32.mrf.mxu0  ;;  %1867 = vmatmul.mubr.bf16.gmra.mxu0 %v6410_v42  ;;  %v590_v42 = vld [vmem:[#allocation2 + $0x18a] sm:$0xff]  ;;  %v705_v52 = vpack.c.bf16 %v659_v17, %v658_v15 }
 0x12d   : > { %v4734_v41 = vpop.f32.mrf.mxu1  ;;  %2020 = vmatmul.mubr.bf16.gmra.mxu1 %v6412_v45  ;;  %1874 = vmatprep.mubr.bf16.mxu0 %v6434_v48  ;;  %v6542_v61 = vpack.c.bf16 %v590_v42, %v589_v34  ;;  %v669_v15 = vld [vmem:[#allocation2 + $0xca] sm:$0xff] }
 0x12e   : > { %v6539_v7 = vadd.f32 %v4733_v53, %v4621_v5  ;;  %2027 = vmatprep.mubr.bf16.mxu1 %v6281_v14  ;;  %v4629_v13 = vpop.f32.mrf.mxu0  ;;  %v5775_v53 = vld [vmem:[#allocation2] sm:$0xff] }
 0x12f   : > { %v4735_v44 = vpop.f32.mrf.mxu1  ;;  %v4630_v59 = vadd.f32 %v4629_v13, %v4628_v56  ;;  %v6564_v56 = vpack.c.bf16 %v5775_v53, %v5775_v53 }
 0x130   : > { %v4736_v45 = vadd.f32 %v4735_v44, %v4734_v41  ;;  %v4631_v48 = vpop.f32.mrf.mxu0 }
 0x131   : > { %v4737_v60 = vpop.f32.mrf.mxu1 }
 0x132   : > { %v6544_v62 = vadd.f32 %v4736_v45, %v4624_v8  ;;  %v4632_v3 = vpop.f32.mrf.mxu0  ;;  %v660_v8 = vld [vmem:[#allocation2 + $0x62] sm:$0xff]  ;;  %v662_v45 = vld [vmem:[#allocation2 + $0x7a] sm:$0xff] }
 0x133   : > { %v4738_v10 = vpop.f32.mrf.mxu1  ;;  %v4633_v33 = vadd.f32 %v4632_v3, %v4631_v48  ;;  %v714_v41 = vpack.c.bf16 %v661_v26, %v660_v8  ;;  %v663_v48 = vld [vmem:[#allocation2 + $0x82] sm:$0xff] }
 0x134   : > { %v4739_v49 = vadd.f32 %v4738_v10, %v4737_v60  ;;  %v4634_v50 = vpop.f32.mrf.mxu0  ;;  %1875 = vmatmul.mubr.bf16.gmra.mxu0 %v6281_v14  ;;  %v665_v10 = vld [vmem:[#allocation2 + $0x9a] sm:$0xff] }
 0x135   : > { %v4740_v51 = vpop.f32.mrf.mxu1  ;;  %2028 = vmatmul.mubr.bf16.gmra.mxu1 %v6420_v21  ;;  %1882 = vmatprep.mubr.bf16.mxu0 %v6542_v61  ;;  %v830_v21 = vpack.c.bf16 %v655_v46, %v654_v43 }
 0x136   : > { %v6551_v0 = vadd.f32 %v4739_v49, %v4627_v40  ;;  %2035 = vmatprep.mubr.bf16.mxu1 %v821_v12  ;;  %v4635_v2 = vpop.f32.mrf.mxu0 }
 0x137   : > { %v4741_v19 = vpop.f32.mrf.mxu1  ;;  %v4636_v24 = vadd.f32 %v4635_v2, %v4634_v50  ;;  %v723_v2 = vpack.c.bf16 %v663_v48, %v662_v45 }
 0x138   : > { %v4742_v1 = vadd.f32 %v4741_v19, %v4740_v51  ;;  %v4637_v16 = vpop.f32.mrf.mxu0 }
 0x139   : > { %v4743_v58 = vpop.f32.mrf.mxu1 }
 0x13a   : > { %v6553_v14 = vadd.f32 %v4742_v1, %v4630_v59  ;;  %v4638_v28 = vpop.f32.mrf.mxu0 }
 0x13b   : > { %v4744_v22 = vpop.f32.mrf.mxu1  ;;  %v4639_v29 = vadd.f32 %v4638_v28, %v4637_v16  ;;  %v667_v28 = vld [vmem:[#allocation2 + $0xb2] sm:$0xff] }
 0x13c   : > { %v4745_v20 = vadd.f32 %v4744_v22, %v4743_v58  ;;  %v4640_v47 = vpop.f32.mrf.mxu0  ;;  %1883 = vmatmul.mubr.bf16.gmra.mxu0 %v821_v12  ;;  %v664_v12 = vld [vmem:[#allocation2 + $0x92] sm:$0xff]  ;;  %v666_v58 = vld [vmem:[#allocation2 + $0xaa] sm:$0xff]  ;;  %v5710_v22 = vld [vmem:[%s7971_s4 + $0x20] sm:$0xff]  }
 0x13d   : > { %v4746_v5 = vpop.f32.mrf.mxu1  ;;  %2036 = vmatmul.mubr.bf16.gmra.mxu1 %v6428_v31  ;;  %5542 = vmatprep.mubr.bf16.mxu0 %v696_v9  ;;  %v732_v18 = vpack.c.bf16 %v665_v10, %v664_v12 }
 0x13e   : > { %v6562_v63 = vadd.f32 %v4745_v20, %v4633_v33  ;;  %2043 = vmatprep.mubr.bf16.mxu1 %v830_v21  ;;  %v4641_v6 = vpop.f32.mrf.mxu0  ;;  %v5709_v21 = vld [vmem:[%s7971_s4 + $0x60] sm:$0xff]  }
 0x13f   : > { %v4747_v27 = vpop.f32.mrf.mxu1  ;;  %v4642_v35 = vadd.f32 %v4641_v6, %v4640_v47  ;;  %v668_v47 = vld [vmem:[#allocation2 + $0xc2] sm:$0xff]  ;;  %5060 = vmatprep.subr.bf16.mxu1 %v5709_v21  ;;  %v741_v6 = vpack.c.bf16 %v667_v28, %v666_v58  ;;  %v677_v21 = vld [vmem:[#allocation2 + $0x12a] sm:$0xff] }
 0x140   : > { %v4748_v31 = vadd.f32 %v4747_v27, %v4746_v5  ;;  %v4643_v38 = vpop.f32.mrf.mxu0  ;;  %5061 = vmatpush3.bf16.msra.mxu1 %v5710_v22  ;;  %v750_v26 = vpack.c.bf16 %v669_v15, %v668_v47  ;;  %v676_v28 = vld [vmem:[#allocation2 + $0x122] sm:$0xff] }
 0x141   : > { %v4749_v40 = vpop.f32.mrf.mxu1 }
 0x142   : > { %v6566_v30 = vadd.f32 %v4748_v31, %v4636_v24  ;;  %v4644_v4 = vpop.f32.mrf.mxu0 }
 0x143   : > { %v4750_v13 = vpop.f32.mrf.mxu1  ;;  %v4645_v34 = vadd.f32 %v4644_v4, %v4643_v38  ;;  %v671_v4 = vld [vmem:[#allocation2 + $0xe2] sm:$0xff] }
 0x144   : > { %v4751_v42 = vadd.f32 %v4750_v13, %v4749_v40  ;;  %v4646_v44 = vpop.f32.mrf.mxu0  ;;  %5543 = vmatmul.mubr.bf16.vlgmr.msra.gmra.mxu0 %v705_v52 }
 0x145   : > { %v4752_v59 = vpop.f32.mrf.mxu1  ;;  %2044 = vmatmul.mubr.bf16.gmra.mxu1 %v6564_v56  ;;  %5546 = vmatprep.mubr.bf16.mxu0 %v714_v41  ;;  %v670_v41 = vld [vmem:[#allocation2 + $0xda] sm:$0xff] }
 0x146   : > { %v6569_v60 = vadd.f32 %v4751_v42, %v4639_v29  ;;  %v4647_v3 = vpop.f32.mrf.mxu0  ;;  %v672_v42 = vld [vmem:[#allocation2 + $0xf2] sm:$0xff]  ;;  %v759_v12 = vpack.c.bf16 %v671_v4, %v670_v41 }
 0x147   : > { %v4753_v33 = vpop.f32.mrf.mxu1  ;;  %v4648_v49 = vadd.f32 %v4647_v3, %v4646_v44  ;;  %v673_v44 = vld [vmem:[#allocation2 + $0xfa] sm:$0xff]  ;;  %v680_v4 = vld [vmem:[#allocation2 + $0x152] sm:$0xff] }
 0x148   : > { %v4754_v50 = vadd.f32 %v4753_v33, %v4752_v59  ;;  %v4649_v51 = vpop.f32.mrf.mxu0  ;;  %v768_v33 = vpack.c.bf16 %v673_v44, %v672_v42 }
 0x149   : > { %v4755_v23 = vpop.f32.mrf.mxu1 }
 0x14a   : > { %v6571_v19 = vadd.f32 %v4754_v50, %v4642_v35  ;;  %v4650_v24 = vpop.f32.mrf.mxu0 }
 0x14b   : > { %v4756_v43 = vpop.f32.mrf.mxu1  ;;  %v4651_v46 = vadd.f32 %v4650_v24, %v4649_v51  ;;  %v674_v24 = vld [vmem:[#allocation2 + $0x10a] sm:$0xff] }
 0x14c   : > { %v4757_v1 = vadd.f32 %v4756_v43, %v4755_v23  ;;  %v4652_v16 = vpop.f32.mrf.mxu0  ;;  %5547 = vmatmul.mubr.bf16.gmra.mxu0 %v723_v2 }
 0x14d   : > { %v4758_v9 = vpop.f32.mrf.mxu1  ;;  %5550 = vmatprep.mubr.bf16.mxu0 %v732_v18 }
 0x14e   : > { %v6579_v29 = vadd.f32 %v4757_v1, %v4645_v34  ;;  %v4653_v20 = vpop.f32.mrf.mxu0  ;;  %v5711_v1 = vld [vmem:[%s7971_s4 + $0x58] sm:$0xff]  }
 0x14f   : > { %v4759_v5 = vpop.f32.mrf.mxu1  ;;  %v4654_v17 = vadd.f32 %v4653_v20, %v4652_v16  ;;  %v5712_v16 = vld [vmem:[%s7971_s4 + $0x18] sm:$0xff]   ;;  %5062 = vmatprep.subr.bf16.mxu1 %v5711_v1 }
 0x150   : > { %v4760_v39 = vadd.f32 %v4759_v5, %v4758_v9  ;;  %v4655_v25 = vpop.f32.mrf.mxu0  ;;  %5063 = vmatpush3.bf16.msra.mxu1 %v5712_v16 }
 0x151   : > { %v4761_v8 = vpop.f32.mrf.mxu1 }
 0x152   : > { %v6581_v27 = vadd.f32 %v4760_v39, %v4648_v49  ;;  %v4656_v35 = vpop.f32.mrf.mxu0  ;;  %v786_v39 = vpack.c.bf16 %v677_v21, %v676_v28 }
 0x153   : > { %v4762_v31 = vpop.f32.mrf.mxu1  ;;  %v4657_v38 = vadd.f32 %v4656_v35, %v4655_v25 }
 0x154   : > { %v4763_v52 = vadd.f32 %v4762_v31, %v4761_v8  ;;  %v4658_v40 = vpop.f32.mrf.mxu0  ;;  %5551 = vmatmul.mubr.bf16.gmra.mxu0 %v741_v6 }
 0x155   : > { %v4764_v53 = vpop.f32.mrf.mxu1  ;;  %5554 = vmatprep.mubr.bf16.mxu0 %v750_v26 }
 0x156   : > { %v6583_v13 = vadd.f32 %v4763_v52, %v4651_v46  ;;  %v4659_v34 = vpop.f32.mrf.mxu0  ;;  %v675_v46 = vld [vmem:[#allocation2 + $0x112] sm:$0xff]  ;;  %v678_v52 = vld [vmem:[#allocation2 + $0x13a] sm:$0xff] }
 0x157   : > { %v4765_v59 = vpop.f32.mrf.mxu1  ;;  %v4660_v45 = vadd.f32 %v4659_v34, %v4658_v40  ;;  %v777_v5 = vpack.c.bf16 %v675_v46, %v674_v24  ;;  %v679_v40 = vld [vmem:[#allocation2 + $0x142] sm:$0xff]  ;;  %v681_v34 = vld [vmem:[#allocation2 + $0x15a] sm:$0xff]  ;;  %v683_v24 = vld [vmem:[#allocation2 + $0x172] sm:$0xff] }
 0x158   : > { %v4766_v48 = vadd.f32 %v4765_v59, %v4764_v53  ;;  %v4661_v3 = vpop.f32.mrf.mxu0  ;;  %v5714_v46 = vld [vmem:[%s7971_s4 + $0x10] sm:$0xff]  }
 0x159   : > { %v4767_v10 = vpop.f32.mrf.mxu1 }
 0x15a   : > { %v6585_v49 = vadd.f32 %v4766_v48, %v4654_v17  ;;  %v4662_v50 = vpop.f32.mrf.mxu0  ;;  %v795_v48 = vpack.c.bf16 %v679_v40, %v678_v52 }
 0x15b   : > { %v4768_v51 = vpop.f32.mrf.mxu1  ;;  %v4663_v2 = vadd.f32 %v4662_v50, %v4661_v3 }
 0x15c   : > { %v4769_v23 = vadd.f32 %v4768_v51, %v4767_v10  ;;  %v4664_v18 = vpop.f32.mrf.mxu0  ;;  %5555 = vmatmul.mubr.bf16.gmra.mxu0 %v759_v12  ;;  %v804_v12 = vpack.c.bf16 %v681_v34, %v680_v4 }
 0x15d   : > { %v4770_v43 = vpop.f32.mrf.mxu1  ;;  %5558 = vmatprep.mubr.bf16.mxu0 %v768_v33 }
 0x15e   : > { %v6593_v58 = vadd.f32 %v4769_v23, %v4657_v38  ;;  %v4665_v9 = vpop.f32.mrf.mxu0 }
 0x15f   : > { %v4771_v22 = vpop.f32.mrf.mxu1  ;;  %v4666_v20 = vadd.f32 %v4665_v9, %v4664_v18  ;;  %v682_v18 = vld [vmem:[#allocation2 + $0x16a] sm:$0xff] }
 0x160   : > { %v4772_v47 = vadd.f32 %v4771_v22, %v4770_v43  ;;  %v4667_v15 = vpop.f32.mrf.mxu0  ;;  %v5713_v43 = vld [vmem:[%s7971_s4 + $0x50] sm:$0xff]  }
 0x161   : > { %v4773_v17 = vpop.f32.mrf.mxu1  ;;  %5064 = vmatprep.subr.bf16.mxu1 %v5713_v43 }
 0x162   : > { %v6595_v25 = vadd.f32 %v4772_v47, %v4660_v45  ;;  %v4668_v6 = vpop.f32.mrf.mxu0  ;;  %5065 = vmatpush3.bf16.msra.mxu1 %v5714_v46 }
 0x163   : > { %v4774_v8 = vpop.f32.mrf.mxu1  ;;  %v4669_v26 = vadd.f32 %v4668_v6, %v4667_v15 }
 0x164   : > { %v4775_v35 = vadd.f32 %v4774_v8, %v4773_v17  ;;  %v4670_v31 = vpop.f32.mrf.mxu0  ;;  %5559 = vmatmul.mubr.bf16.gmra.mxu0 %v777_v5 }
 0x165   : > { %v4776_v38 = vpop.f32.mrf.mxu1  ;;  %5562 = vmatprep.mubr.bf16.mxu0 %v786_v39 }
 0x166   : > { %v6597_v53 = vadd.f32 %v4775_v35, %v4663_v2  ;;  %v4671_v41 = vpop.f32.mrf.mxu0 }
 0x167   : > { %v4777_v42 = vpop.f32.mrf.mxu1  ;;  %v4672_v44 = vadd.f32 %v4671_v41, %v4670_v31  ;;  %v687_v31 = vld [vmem:[#allocation2 + $0x1a2] sm:$0xff] }
 0x168   : > { %v4778_v59 = vadd.f32 %v4777_v42, %v4776_v38  ;;  %v4673_v45 = vpop.f32.mrf.mxu0 }
 0x169   : > { %v4779_v3 = vpop.f32.mrf.mxu1 }
 0x16a   : > { %v6599_v10 = vadd.f32 %v4778_v59, %v4666_v20  ;;  %v4674_v33 = vpop.f32.mrf.mxu0  ;;  %v813_v20 = vpack.c.bf16 %v683_v24, %v682_v18 }
 0x16b   : > { %v4780_v50 = vpop.f32.mrf.mxu1  ;;  %v4675_v5 = vadd.f32 %v4674_v33, %v4673_v45 }
 0x16c   : > { %v4781_v51 = vadd.f32 %v4780_v50, %v4779_v3  ;;  %v4676_v23 = vpop.f32.mrf.mxu0  ;;  %5563 = vmatmul.mubr.bf16.gmra.mxu0 %v795_v48  ;;  %v5715_v50 = vld [vmem:[%s7971_s4 + $0x48] sm:$0xff]  }
 0x16d   : > { %v4782_v2 = vpop.f32.mrf.mxu1  ;;  %5566 = vmatprep.mubr.bf16.mxu0 %v804_v12  ;;  %5066 = vmatprep.subr.bf16.mxu1 %v5715_v50  ;;  %v5722_v50 = vld [vmem:[%s7971_s4 + $0xe8] sm:$0xff]  }
 0x16e   : > { %v6607_v1 = vadd.f32 %v4781_v51, %v4669_v26  ;;  %v4677_v16 = vpop.f32.mrf.mxu0  ;;  %v686_v26 = vld [vmem:[#allocation2 + $0x19a] sm:$0xff]  ;;  %v5716_v51 = vld [vmem:[%s7971_s4 + $0x8] sm:$0xff]  }
 0x16f   : > { %v4783_v9 = vpop.f32.mrf.mxu1  ;;  %v4678_v28 = vadd.f32 %v4677_v16, %v4676_v23  ;;  %v831_v42 = vpack.c.bf16 %v687_v31, %v686_v26  ;;  %5067 = vmatpush3.bf16.msra.mxu1 %v5716_v51 }
 0x170   : > { %v4784_v21 = vadd.f32 %v4783_v9, %v4782_v2  ;;  %v4679_v22 = vpop.f32.mrf.mxu0 }
 0x171   : > { %v4785_v47 = vpop.f32.mrf.mxu1 }
 0x172   : > { %v6609_v15 = vadd.f32 %v4784_v21, %v4672_v44  ;;  %v4680_v17 = vpop.f32.mrf.mxu0 }
 0x173   : > { %v4786_v39 = vpop.f32.mrf.mxu1  ;;  %v4681_v45 = vadd.f32 %v4680_v17, %v4679_v22  ;;  %v5717_v17 = vld [vmem:[%s7971_s4 + $0xf8] sm:$0xff]  }
 0x174   : > { %v4787_v6 = vadd.f32 %v4786_v39, %v4785_v47  ;;  %v4682_v8 = vpop.f32.mrf.mxu0  ;;  %5567 = vmatmul.mubr.bf16.gmra.mxu0 %v813_v20  ;;  %v5718_v39 = vld [vmem:[%s7971_s4 + $0xb8] sm:$0xff]   ;;  %5166 = vmatprep.subr.bf16.mxu0 %v5717_v17  ;;  %v5726_v17 = vld [vmem:[%s7971_s4 + $0xa0] sm:$0xff]  }
 0x175   : > { %v4788_v35 = vpop.f32.mrf.mxu1  ;;  %5570 = vmatprep.mubr.bf16.mxu0 %v6542_v61  ;;  %5167 = vmatpush3.bf16.msra.mxu0 %v5718_v39 }
 0x176   : > { %v6612_v38 = vadd.f32 %v4787_v6, %v4675_v5  ;;  %v4683_v52 = vpop.f32.mrf.mxu0 }
 0x177   : > { %v4789_v40 = vpop.f32.mrf.mxu1  ;;  %v4684_v41 = vadd.f32 %v4683_v52, %v4682_v8 }
 0x178   : > { %v4790_v4 = vadd.f32 %v4789_v40, %v4788_v35  ;;  %v4685_v34 = vpop.f32.mrf.mxu0 }
 0x179   : > { %v4791_v44 = vpop.f32.mrf.mxu1 }
 0x17a   : > { %v6614_v59 = vadd.f32 %v4790_v4, %v4678_v28  ;;  %v4686_v48 = vpop.f32.mrf.mxu0  ;;  %v5719_v4 = vld [vmem:[%s7971_s4 + $0xf0] sm:$0xff]  }
 0x17b   : > { %v4792_v3 = vpop.f32.mrf.mxu1  ;;  %v4687_v28 = vadd.f32 %v4686_v48, %v4685_v34  ;;  %v5720_v34 = vld [vmem:[%s7971_s4 + $0xb0] sm:$0xff]   ;;  %5168 = vmatprep.subr.bf16.mxu0 %v5719_v4 }
 0x17c   : > { %v4793_v12 = vadd.f32 %v4792_v3, %v4791_v44  ;;  %v4688_v33 = vpop.f32.mrf.mxu0  ;;  %5571 = vmatmul.mubr.bf16.gmra.mxu0 %v831_v42 }
 0x17d   : > { %v4794_v61 = vpop.f32.mrf.mxu1  ;;  %5169 = vmatpush3.bf16.msra.mxu0 %v5720_v34 }
 0x17e   : > { %v6622_v23 = vadd.f32 %v4793_v12, %v4681_v45  ;;  %v4689_v18 = vpop.f32.mrf.mxu0  ;;  %5170 = vmatprep.subr.bf16.mxu0 %v5722_v50  ;;  %v5730_v50 = vld [vmem:[%s7971_s4 + $0x90] sm:$0xff]  }
 0x17f   : > { %v4795_v2 = vpop.f32.mrf.mxu1  ;;  %v4690_v24 = vadd.f32 %v4689_v18, %v4688_v33 }
 0x180   : > { %v4796_v43 = vadd.f32 %v4795_v2, %v4794_v61  ;;  %v4691_v46 = vpop.f32.mrf.mxu0  ;;  %v5724_v2 = vld [vmem:[%s7971_s4 + $0xa8] sm:$0xff]  }
 0x181   : > { %v4797_v16 = vpop.f32.mrf.mxu1  ;;  %5171 = vmatpush3.bf16.msra.mxu0 %v5724_v2 }
 0x182   : > { %v6624_v9 = vadd.f32 %v4796_v43, %v4684_v41  ;;  %v4692_v21 = vpop.f32.mrf.mxu0 }
 0x183   : > { %v4798_v22 = vpop.f32.mrf.mxu1  ;;  %v4693_v44 = vadd.f32 %v4692_v21, %v4691_v46  ;;  %v5721_v46 = vld [vmem:[%s7971_s4 + $0x40] sm:$0xff]  }
 0x184   : > { %v4799_v20 = vadd.f32 %v4798_v22, %v4797_v16  ;;  %v4822_v47 = vpop.f32.mrf.mxu0  ;;  %5068 = vmatprep.subr.bf16.mxu1 %v5721_v46 }
 0x185   : > { %v4800_v5 = vpop.f32.mrf.mxu1 }
 0x186   : > { %v6632_v6 = vadd.f32 %v4799_v20, %v4687_v28  ;;  %v4823_v8 = vpop.f32.mrf.mxu0  ;;  %v5725_v20 = vld [vmem:[%s7971_s4 + $0xe0] sm:$0xff]  }
 0x187   : > { %v4801_v35 = vpop.f32.mrf.mxu1  ;;  %v4824_v26 = vadd.f32 %v4823_v8, %v4822_v47  ;;  %5172 = vmatprep.subr.bf16.mxu0 %v5725_v20 }
 0x188   : > { %v4802_v31 = vadd.f32 %v4801_v35, %v4800_v5  ;;  %v4825_v52 = vpop.f32.mrf.mxu0  ;;  %5173 = vmatpush3.bf16.msra.mxu0 %v5726_v17 }
 0x189   : > { %v4803_v40 = vpop.f32.mrf.mxu1  ;;  %v1765_v41 = vadd.f32 %v4824_v26, %v6498_v37 }
 0x18a   : > { %v6641_v42 = vadd.f32 %v4802_v31, %v4690_v24  ;;  %v4826_v45 = vpop.f32.mrf.mxu0  ;;  %v2443_v31 = vld [vmem:[#allocation3 + $0x9] sm:$0xff] }
 0x18b   : > { %v4804_v48 = vpop.f32.mrf.mxu1  ;;  %v4827_v3 = vadd.f32 %v4826_v45, %v4825_v52  ;;  %v5728_v45 = vld [vmem:[%s7971_s4 + $0x98] sm:$0xff]  }
 0x18c   : > { %7975 = vst [vmem:[#allocation4_spill] sm:$0xff] %v6641_v42  ;;  %v4805_v12 = vadd.f32 %v4804_v48, %v4803_v40  ;;  %v4828_v33 = vpop.f32.mrf.mxu0 }
 0x18d   : > { %v4934_v61 = vpop.f32.mrf.mxu1  ;;  %v1768_v37 = vadd.f32 %v4827_v3, %v6503_v11  ;;  %v5723_v11 = vld [vmem:[%s7971_s4] sm:$0xff]  }
 0x18e   : > { %v6647_v51 = vadd.f32 %v4805_v12, %v4693_v44  ;;  %v4829_v18 = vpop.f32.mrf.mxu0  ;;  %5069 = vmatpush3.bf16.msra.mxu1 %v5723_v11  ;;  %v5733_v11 = vld [vmem:[%s7971_s4 + $0x88] sm:$0xff]  }
 0x18f   : > { %v4935_v24 = vpop.f32.mrf.mxu1  ;;  %v4830_v43 = vadd.f32 %v4829_v18, %v4828_v33 }
 0x190   : > { %7976 = vst [vmem:[#allocation5_spill] sm:$0xff] %v6647_v51  ;;  %v4936_v16 = vadd.f32 %v4935_v24, %v4934_v61  ;;  %v4831_v28 = vpop.f32.mrf.mxu0  ;;  %v5729_v61 = vld [vmem:[%s7971_s4 + $0xd0] sm:$0xff]  }
 0x191   : > { %v4937_v21 = vpop.f32.mrf.mxu1  ;;  %v6659_v22 = vadd.f32 %v4830_v43, %v6506_v54  ;;  %v2442_v54 = vld [vmem:[#allocation3 + $0x1] sm:$0xff]  ;;  %v5731_v43 = vld [vmem:[%s7971_s4 + $0xc8] sm:$0xff]  }
 0x192   : > { %v4832_v47 = vpop.f32.mrf.mxu0  ;;  %v6664_v5 = vadd.f32 %v4936_v16, %v1765_v41  ;;  %v5727_v41 = vld [vmem:[%s7971_s4 + $0xd8] sm:$0xff]   ;;  %v2700_v4 = vpack.c.bf16 %v2443_v31, %v2442_v54 }
 0x193   : > { %v4938_v39 = vpop.f32.mrf.mxu1  ;;  %v4833_v8 = vadd.f32 %v4832_v47, %v4831_v28  ;;  %5174 = vmatprep.subr.bf16.mxu0 %v5727_v41 }
 0x194   : > { %v4939_v35 = vadd.f32 %v4938_v39, %v4937_v21  ;;  %v4834_v26 = vpop.f32.mrf.mxu0  ;;  %3451 = vmatprep.mubr.bf16.mxu1 %v2700_v4  ;;  %5175 = vmatpush3.bf16.msra.mxu0 %v5728_v45  ;;  %v5732_v21 = vld [vmem:[%s7971_s4 + $0x178] sm:$0xff]   ;;  %v5735_v39 = vld [vmem:[%s7971_s4 + $0xc0] sm:$0xff]  }
 0x195   : > { %v6669_v52 = vpop.f32.mrf.mxu1  ;;  %v6672_v40 = vadd.f32 %v4833_v8, %v6517_v55  ;;  %3452 = vmatmul.mubr.bf16.vlgmr.msra.gmra.mxu1 %v6564_v56  ;;  %5176 = vmatprep.subr.bf16.mxu0 %v5729_v61 }
 0x196   : > { %v4835_v34 = vpop.f32.mrf.mxu0  ;;  %v6677_v44 = vadd.f32 %v4939_v35, %v1768_v37  ;;  %5278 = vmatprep.subr.bf16.mxu1 %v5732_v21  ;;  %v5736_v35 = vld [vmem:[%s7971_s4 + $0x80] sm:$0xff]   ;;  %v5737_v21 = vld [vmem:[%s7971_s4 + $0x170] sm:$0xff]  }
 0x197   : > { %v6682_v48 = vpop.f32.mrf.mxu1  ;;  %v4836_v3 = vadd.f32 %v4835_v34, %v4834_v26 }
 0x198   : > { %v4837_v12 = vpop.f32.mrf.mxu0  ;;  %5177 = vmatpush3.bf16.msra.mxu0 %v5730_v50 }
 0x199   : > { %v6685_v55 = vpop.f32.mrf.mxu1  ;;  %v6688_v33 = vadd.f32 %v4836_v3, %v6520_v32  ;;  %5178 = vmatprep.subr.bf16.mxu0 %v5731_v43 }
 0x19a   : > { %v4838_v37 = vpop.f32.mrf.mxu0 }
 0x19b   : > { %v6696_v18 = vpop.f32.mrf.mxu1  ;;  %v4839_v2 = vadd.f32 %v4838_v37, %v4837_v12 }
 0x19c   : > { %v4840_v24 = vpop.f32.mrf.mxu0  ;;  %5179 = vmatpush3.bf16.msra.mxu0 %v5733_v11 }
 0x19d   : > { %v6698_v56 = vpop.f32.mrf.mxu1  ;;  %v6701_v32 = vadd.f32 %v4839_v2, %v6525_v57  ;;  %v5734_v57 = vld [vmem:[%s7971_s4 + $0x138] sm:$0xff]   ;;  %5180 = vmatprep.subr.bf16.mxu0 %v5735_v39 }
 0x19e   : > { %v4841_v46 = vpop.f32.mrf.mxu0  ;;  %5279 = vmatpush3.bf16.msra.mxu1 %v5734_v57 }
 0x19f   : > { %v6709_v16 = vpop.f32.mrf.mxu1  ;;  %v4842_v28 = vadd.f32 %v4841_v46, %v4840_v24  ;;  %5280 = vmatprep.subr.bf16.mxu1 %v5737_v21 }
 0x1a0   : > { %v4843_v20 = vpop.f32.mrf.mxu0  ;;  %5181 = vmatpush3.bf16.msra.mxu0 %v5736_v35 }
 0x1a1   : > { %v6717_v47 = vpop.f32.mrf.mxu1  ;;  %v6720_v17 = vadd.f32 %v4842_v28, %v6528_v36 }
 0x1a2   : > { %v4844_v8 = vpop.f32.mrf.mxu0 }
 0x1a3   : > { %v6728_v26 = vpop.f32.mrf.mxu1  ;;  %v4845_v54 = vadd.f32 %v4844_v8, %v4843_v20 }
 0x1a4   : > { %v4846_v31 = vpop.f32.mrf.mxu0 }
 0x1a5   : > { %v6730_v41 = vpop.f32.mrf.mxu1  ;;  %v6733_v36 = vadd.f32 %v4845_v54, %v6539_v7 }
 0x1a6   : > { %v4847_v4 = vpop.f32.mrf.mxu0 }
 0x1a7   : > { %v6735_v34 = vpop.f32.mrf.mxu1  ;;  %v4848_v45 = vadd.f32 %v4847_v4, %v4846_v31 }
 0x1a8   : > { %v4849_v3 = vpop.f32.mrf.mxu0 }
 0x1a9   : > { %v6737_v12 = vpop.f32.mrf.mxu1  ;;  %v6740_v61 = vadd.f32 %v4848_v45, %v6544_v62  ;;  %v5738_v62 = vld [vmem:[%s7971_s4 + $0x130] sm:$0xff]  }
 0x1aa   : > { %v4850_v37 = vpop.f32.mrf.mxu0  ;;  %5281 = vmatpush3.bf16.msra.mxu1 %v5738_v62 }
 0x1ab   : > { %v6742_v50 = vpop.f32.mrf.mxu1  ;;  %v4851_v2 = vadd.f32 %v4850_v37, %v4849_v3 }
 0x1ac   : > { %v4852_v24 = vpop.f32.mrf.mxu0 }
 0x1ad   : > { %v6744_v43 = vpop.f32.mrf.mxu1  ;;  %v6747_v7 = vadd.f32 %v4851_v2, %v6551_v0 }
 0x1ae   : > { %v4853_v46 = vpop.f32.mrf.mxu0 }
 0x1af   : > { %7977 = vst [vmem:[#allocation6_spill] sm:$0xff] %v6747_v7  ;;  %v6749_v11 = vpop.f32.mrf.mxu1  ;;  %v4854_v28 = vadd.f32 %v4853_v46, %v4852_v24 }
 0x1b0   : > { %v4855_v57 = vpop.f32.mrf.mxu0 }
 0x1b1   : > { %v6757_v20 = vpop.f32.mrf.mxu1  ;;  %v6760_v39 = vadd.f32 %v4854_v28, %v6553_v14 }
 0x1b2   : > { %v4856_v0 = vpop.f32.mrf.mxu0 }
 0x1b3   : > { %v6762_v8 = vpop.f32.mrf.mxu1  ;;  %v4857_v35 = vadd.f32 %v4856_v0, %v4855_v57 }
 0x1b4   : > { %v4858_v54 = vpop.f32.mrf.mxu0 }
 0x1b5   : > { %v6764_v31 = vpop.f32.mrf.mxu1  ;;  %v6767_v4 = vadd.f32 %v4857_v35, %v6562_v63 }
 0x1b6   : > { %v4859_v45 = vpop.f32.mrf.mxu0 }
 0x1b7   : > { %v6769_v3 = vpop.f32.mrf.mxu1  ;;  %v4860_v37 = vadd.f32 %v4859_v45, %v4858_v54  ;;  %v5739_v45 = vld [vmem:[%s7971_s4 + $0x168] sm:$0xff]  }
 0x1b8   : > { %v4861_v2 = vpop.f32.mrf.mxu0  ;;  %5282 = vmatprep.subr.bf16.mxu1 %v5739_v45 }
 0x1b9   : > { %v6771_v24 = vpop.f32.mrf.mxu1  ;;  %v6774_v14 = vadd.f32 %v4860_v37, %v6566_v30  ;;  %v5740_v30 = vld [vmem:[%s7971_s4 + $0x128] sm:$0xff]  }
 0x1ba   : > { %v4862_v46 = vpop.f32.mrf.mxu0  ;;  %5283 = vmatpush3.bf16.msra.mxu1 %v5740_v30 }
 0x1bb   : > { %7978 = vst [vmem:[#allocation7_spill] sm:$0xff] %v6774_v14  ;;  %v6776_v28 = vpop.f32.mrf.mxu1  ;;  %v4863_v21 = vadd.f32 %v4862_v46, %v4861_v2 }
 0x1bc   : > { %v4864_v62 = vpop.f32.mrf.mxu0 }
 0x1bd   : > { %v6778_v57 = vpop.f32.mrf.mxu1  ;;  %v6781_v63 = vadd.f32 %v4863_v21, %v6569_v60 }
 0x1be   : > { %v4865_v0 = vpop.f32.mrf.mxu0 }
 0x1bf   : > { %7979 = vst [vmem:[#allocation8_spill] sm:$0xff] %v6781_v63  ;;  %v6783_v35 = vpop.f32.mrf.mxu1  ;;  %v4866_v54 = vadd.f32 %v4865_v0, %v4864_v62 }
 0x1c0   : > { %7980 = vst [vmem:[#allocation9_spill] sm:$0xff] %v6783_v35  ;;  %v4867_v37 = vpop.f32.mrf.mxu0 }
 0x1c1   : > { %v6791_v2 = vpop.f32.mrf.mxu1  ;;  %v6794_v46 = vadd.f32 %v4866_v54, %v6571_v19 }
 0x1c2   : > { %7981 = vst [vmem:[#allocation10_spill] sm:$0xff] %v6791_v2  ;;  %v4868_v60 = vpop.f32.mrf.mxu0 }
 0x1c3   : > { %v6796_v21 = vpop.f32.mrf.mxu1  ;;  %v4869_v62 = vadd.f32 %v4868_v60, %v4867_v37  ;;  %v5741_v37 = vld [vmem:[%s7971_s4 + $0x160] sm:$0xff]  }
 0x1c4   : > { %v4870_v0 = vpop.f32.mrf.mxu0  ;;  %5284 = vmatprep.subr.bf16.mxu1 %v5741_v37 }
 0x1c5   : > { %v6798_v51 = vpop.f32.mrf.mxu1  ;;  %v6801_v42 = vadd.f32 %v4869_v62, %v6579_v29  ;;  %v5742_v29 = vld [vmem:[%s7971_s4 + $0x120] sm:$0xff]  }
 0x1c6   : > { %v4871_v63 = vpop.f32.mrf.mxu0  ;;  %5285 = vmatpush3.bf16.msra.mxu1 %v5742_v29 }
 0x1c7   : > { %7982 = vst [vmem:[#allocation11_spill] sm:$0xff] %v6801_v42  ;;  %v6803_v14 = vpop.f32.mrf.mxu1  ;;  %v4872_v7 = vadd.f32 %v4871_v63, %v4870_v0 }
 0x1c8   : > { %v4873_v2 = vpop.f32.mrf.mxu0 }
 0x1c9   : > { %v6805_v35 = vpop.f32.mrf.mxu1  ;;  %v6808_v19 = vadd.f32 %v4872_v7, %v6581_v27 }
 0x1ca   : > { %v4874_v54 = vpop.f32.mrf.mxu0 }
 0x1cb   : > { %7983 = vst [vmem:[#allocation12_spill] sm:$0xff] %v6808_v19  ;;  %v6810_v45 = vpop.f32.mrf.mxu1  ;;  %v4875_v30 = vadd.f32 %v4874_v54, %v4873_v2  ;;  %v5743_v54 = vld [vmem:[%s7971_s4 + $0x1f8] sm:$0xff]  }
 0x1cc   : > { %v4876_v60 = vpop.f32.mrf.mxu0  ;;  %5390 = vmatprep.subr.bf16.mxu0 %v5743_v54  ;;  %v5746_v54 = vld [vmem:[%s7971_s4 + $0x118] sm:$0xff]  }
 0x1cd   : > { %v6818_v63 = vpop.f32.mrf.mxu1  ;;  %v6821_v62 = vadd.f32 %v4875_v30, %v6583_v13 }
 0x1ce   : > { %7984 = vst [vmem:[#allocation13_spill] sm:$0xff] %v6818_v63  ;;  %v4877_v27 = vpop.f32.mrf.mxu0 }
 0x1cf   : > { %7985 = vst [vmem:[#allocation14_spill] sm:$0xff] %v6821_v62  ;;  %v6823_v7 = vpop.f32.mrf.mxu1  ;;  %v4878_v2 = vadd.f32 %v4877_v27, %v4876_v60 }
 0x1d0   : > { %7986 = vst [vmem:[#allocation15_spill] sm:$0xff] %v6823_v7  ;;  %v4879_v0 = vpop.f32.mrf.mxu0 }
 0x1d1   : > { %v6828_v19 = vpop.f32.mrf.mxu1  ;;  %v6831_v42 = vadd.f32 %v4878_v2, %v6585_v49  ;;  %v5745_v49 = vld [vmem:[%s7971_s4 + $0x158] sm:$0xff]  }
 0x1d2   : > { %7987 = vst [vmem:[#allocation16_spill] sm:$0xff] %v6828_v19  ;;  %v4880_v63 = vpop.f32.mrf.mxu0  ;;  %5286 = vmatprep.subr.bf16.mxu1 %v5745_v49 }
 0x1d3   : > { %7988 = vst [vmem:[#allocation17_spill] sm:$0xff] %v6831_v42  ;;  %v6833_v13 = vpop.f32.mrf.mxu1  ;;  %v4881_v30 = vadd.f32 %v4880_v63, %v4879_v0  ;;  %5287 = vmatpush3.bf16.msra.mxu1 %v5746_v54 }
 0x1d4   : > { %7989 = vst [vmem:[#allocation18_spill] sm:$0xff] %v6833_v13  ;;  %v4882_v37 = vpop.f32.mrf.mxu0 }
 0x1d5   : > { %v6835_v29 = vpop.f32.mrf.mxu1  ;;  %v6838_v60 = vadd.f32 %v4881_v30, %v6593_v58 }
 0x1d6   : > { %v4883_v27 = vpop.f32.mrf.mxu0 }
 0x1d7   : > { %7990 = vst [vmem:[#allocation19_spill] sm:$0xff] %v6838_v60  ;;  %v6840_v62 = vpop.f32.mrf.mxu1  ;;  %v4884_v7 = vadd.f32 %v4883_v27, %v4882_v37 }
 0x1d8   : > { %7991 = vst [vmem:[#allocation20_spill] sm:$0xff] %v6840_v62  ;;  %v4885_v2 = vpop.f32.mrf.mxu0 }
 0x1d9   : > { %v6848_v63 = vpop.f32.mrf.mxu1  ;;  %v6851_v0 = vadd.f32 %v4884_v7, %v6595_v25 }
 0x1da   : > { %7992 = vst [vmem:[#allocation21_spill] sm:$0xff] %v6848_v63  ;;  %v4886_v58 = vpop.f32.mrf.mxu0 }
 0x1db   : > { %7993 = vst [vmem:[#allocation22_spill] sm:$0xff] %v6851_v0  ;;  %v6853_v30 = vpop.f32.mrf.mxu1  ;;  %v4887_v37 = vadd.f32 %v4886_v58, %v4885_v2 }
 0x1dc   : > { %v4888_v27 = vpop.f32.mrf.mxu0 }
 0x1dd   : > { %v6855_v60 = vpop.f32.mrf.mxu1  ;;  %v6858_v13 = vadd.f32 %v4887_v37, %v6597_v53 }
 0x1de   : > { %7994 = vst [vmem:[#allocation23_spill] sm:$0xff] %v6855_v60  ;;  %v4889_v19 = vpop.f32.mrf.mxu0 }
 0x1df   : > { %7995 = vst [vmem:[#allocation24_spill] sm:$0xff] %v6858_v13  ;;  %v6860_v42 = vpop.f32.mrf.mxu1  ;;  %v4890_v62 = vadd.f32 %v4889_v19, %v4888_v27  ;;  %v5749_v19 = vld [vmem:[%s7971_s4 + $0x150] sm:$0xff]  }
 0x1e0   : > { %v4891_v63 = vpop.f32.mrf.mxu0  ;;  %5288 = vmatprep.subr.bf16.mxu1 %v5749_v19 }
 0x1e1   : > { %v6863_v25 = vadd.f32 %v4890_v62, %v6599_v10  ;;  %v6865_v49 = vpop.f32.mrf.mxu1  ;;  %v5750_v10 = vld [vmem:[%s7971_s4 + $0x110] sm:$0xff]  }
 0x1e2   : > { %v4892_v7 = vpop.f32.mrf.mxu0  ;;  %5289 = vmatpush3.bf16.msra.mxu1 %v5750_v10 }
 0x1e3   : > { %v4893_v54 = vadd.f32 %v4892_v7, %v4891_v63  ;;  %v6870_v60 = vpop.f32.mrf.mxu1 }
 0x1e4   : > { %v4894_v0 = vpop.f32.mrf.mxu0  ;;  %7997 = vst [vmem:[#allocation26_spill] sm:$0xff] %v6870_v60 }
 0x1e5   : > { %v6868_v2 = vadd.f32 %v4893_v54, %v6607_v1  ;;  %v6881_v1 = vpop.f32.mrf.mxu1 }
 0x1e6   : > { %v4895_v58 = vpop.f32.mrf.mxu0 }
 0x1e7   : > { %7996 = vst [vmem:[#allocation25_spill] sm:$0xff] %v6868_v2  ;;  %v4896_v53 = vadd.f32 %v4895_v58, %v4894_v0  ;;  %v6886_v58 = vpop.f32.mrf.mxu1 }
 0x1e8   : > { %v4897_v37 = vpop.f32.mrf.mxu0 }
 0x1e9   : > { %v6879_v62 = vadd.f32 %v4896_v53, %v6609_v15  ;;  %v6891_v53 = vpop.f32.mrf.mxu1 }
 0x1ea   : > { %v4898_v63 = vpop.f32.mrf.mxu0 }
 0x1eb   : > { %7998 = vst [vmem:[#allocation27_spill] sm:$0xff] %v6879_v62  ;;  %v4899_v27 = vadd.f32 %v4898_v63, %v4897_v37  ;;  %v6896_v63 = vpop.f32.mrf.mxu1 }
 0x1ec   : > { %v4900_v7 = vpop.f32.mrf.mxu0 }
 0x1ed   : > { %v6884_v0 = vadd.f32 %v4899_v27, %v6612_v38  ;;  %v5753_v27 = vld [vmem:[%s7971_s4 + $0x148] sm:$0xff]  }
 0x1ee   : > { %v4901_v54 = vpop.f32.mrf.mxu0  ;;  %5290 = vmatprep.subr.bf16.mxu1 %v5753_v27  ;;  %v4945_v27 = vadd.f32 %v6696_v18, %v6685_v55 }
 0x1ef   : > { %7999 = vst [vmem:[#allocation28_spill] sm:$0xff] %v6884_v0  ;;  %v4902_v13 = vadd.f32 %v4901_v54, %v4900_v7 }
 0x1f0   : > { %v4903_v2 = vpop.f32.mrf.mxu0  ;;  %v1937_v18 = vadd.f32 %v4945_v27, %v6672_v40 }
 0x1f1   : > { %v6889_v60 = vadd.f32 %v4902_v13, %v6614_v59  ;;  %v5754_v59 = vld [vmem:[%s7971_s4 + $0x108] sm:$0xff]  }
 0x1f2   : > { %v4904_v15 = vpop.f32.mrf.mxu0  ;;  %5291 = vmatpush3.bf16.msra.mxu1 %v5754_v59 }
 0x1f3   : > { %v4905_v19 = vadd.f32 %v4904_v15, %v4903_v2 }
 0x1f4   : > { %v4906_v10 = vpop.f32.mrf.mxu0 }
 0x1f5   : > { %v6894_v62 = vadd.f32 %v4905_v19, %v6622_v23  ;;  %v6907_v23 = vpop.f32.mrf.mxu1 }
 0x1f6   : > { %v4907_v37 = vpop.f32.mrf.mxu0 }
 0x1f7   : > { %v4908_v38 = vadd.f32 %v4907_v37, %v4906_v10  ;;  %v4942_v37 = vadd.f32 %v6682_v48, %v6669_v52  ;;  %v6918_v0 = vpop.f32.mrf.mxu1  ;;  %v6934_v52 = vld [vmem:[%s7969_s2] ss:$0 sm:$0xff] }
 0x1f8   : > { %v4909_v7 = vpop.f32.mrf.mxu0 }
 0x1f9   : > { %v6905_v13 = vadd.f32 %v4908_v38, %v6624_v9  ;;  %v1934_v59 = vadd.f32 %v4942_v37, %v6659_v22  ;;  %v5757_v22 = vld [vmem:[%s7971_s4 + $0x140] sm:$0xff]  }
 0x1fa   : > { %v4910_v2 = vpop.f32.mrf.mxu0  ;;  %5292 = vmatprep.subr.bf16.mxu1 %v5757_v22 }
 0x1fb   : > { %8000 = vst [vmem:[#allocation29_spill] sm:$0xff] %v6905_v13  ;;  %v4911_v54 = vadd.f32 %v4910_v2, %v4909_v7  ;;  %v6926_v7 = vpop.f32.mrf.mxu1 }
 0x1fc   : > { %v6909_v15 = vpop.f32.mrf.mxu0 }
 0x1fd   : > { %v6912_v19 = vadd.f32 %v4911_v54, %v6632_v6  ;;  %v4954_v54 = vadd.f32 %v6735_v34, %v6730_v41  ;;  %v4948_v41 = vadd.f32 %v6709_v16, %v6698_v56  ;;  %v6948_v34 = vld [vmem:[%s7970_s3] ss:$0 sm:$0xff] }
 0x1fe   : > { %v6914_v10 = vpop.f32.mrf.mxu0 }
 0x1ff   : > { %8001 = vst [vmem:[#allocation30_spill] sm:$0xff] %v6912_v19  ;;  %v6936_v19 = vpop.f32.mrf.mxu1  ;;  %v1950_v56 = vadd.f32 %v4954_v54, %v6720_v17 }
 0x200   : > { %v6920_v9 = vpop.f32.mrf.mxu0 }
 0x201   : > { %8002 = vst [vmem:[#allocation31_spill] sm:$0xff] %v6920_v9  ;;  %v6957_v16 = vpop.f32.mrf.mxu1 }
 0x202   : > { %v6922_v38 = vpop.f32.mrf.mxu0 }
 0x203   : > { %8003 = vst [vmem:[#allocation32_spill] sm:$0xff] %v6922_v38 }
 0x204   : > { %v5544_v6 = vpop.f32.mrf.mxu0 }
 0x205   : > { %v2095_v2 = vadd.f32 %v5544_v6, %v1934_v59  ;;  %v5758_v59 = vld [vmem:[%s7971_s4 + $0x100] sm:$0xff]   ;;  %v4957_v6 = vadd.f32 %v6742_v50, %v6737_v12  ;;  %v1942_v12 = vadd.f32 %v4948_v41, %v6688_v33 }
 0x206   : > { %v2086_v48 = vpop.f32.mrf.mxu0  ;;  %5293 = vmatpush3.bf16.msra.mxu1 %v5758_v59 }
 0x207   : > { %v2215_v13 = vmax.f32 %v2095_v2, 0.0  ;;  %v2087_v55 = vadd.f32 %v2086_v48, %v6664_v5 }
 0x208   : > { %v5545_v37 = vpop.f32.mrf.mxu0 }
 0x209   : > { %v2254_v5 = vmul.f32 %v6934_v52, %v2215_v13  ;;  %v2213_v40 = vmax.f32 %v2087_v55, 0.0  ;;  %v2098_v27 = vadd.f32 %v5545_v37, %v1937_v18  ;;  %v4951_v55 = vadd.f32 %v6728_v26, %v6717_v47 }
 0x20a   : > { %v2089_v2 = vpop.f32.mrf.mxu0  ;;  %v4966_v37 = vadd.f32 %v6769_v3, %v6764_v31 }
 0x20b   : > { %v6960_v48 = vadd.f32 %v6948_v34, %v2254_v5  ;;  %v2252_v38 = vmul.f32 %v6934_v52, %v2213_v40  ;;  %v2216_v9 = vmax.f32 %v2098_v27, 0.0  ;;  %v2090_v13 = vadd.f32 %v2089_v2, %v6677_v44  ;;  %v6973_v5 = vpop.f32.mrf.mxu1 }
 0x20c   : > { %v5548_v18 = vpop.f32.mrf.mxu0  ;;  %v1953_v44 = vadd.f32 %v4957_v6, %v6733_v36  ;;  %v1945_v40 = vadd.f32 %v4951_v55, %v6701_v32  ;;  %v4969_v6 = vadd.f32 %v6776_v28, %v6771_v24 }
 0x20d   : > { %2380 = vst [vmem:[#allocation3 + $0x31] sm:$0xff] %v6960_v48  ;;  %v2291_v17 = vadd.f32 %v6948_v34, %v2252_v38  ;;  %v2255_v50 = vmul.f32 %v6934_v52, %v2216_v9  ;;  %v2214_v54 = vmax.f32 %v2090_v13, 0.0  ;;  %v2111_v22 = vadd.f32 %v5548_v18, %v1950_v56 }
 0x20e   : > { %v2102_v59 = vpop.f32.mrf.mxu0  ;;  %v4960_v9 = vadd.f32 %v6749_v11, %v6744_v43  ;;  %v1966_v56 = vadd.f32 %v4966_v37, %v6760_v39  ;;  %v6990_v11 = vpop.f32.mrf.mxu1 }
 0x20f   : > { %2378 = vst [vmem:[#allocation3 + $0x19] sm:$0xff] %v2291_v17  ;;  %v6976_v47 = vadd.f32 %v6948_v34, %v2255_v50  ;;  %v2253_v33 = vmul.f32 %v6934_v52, %v2214_v54  ;;  %v2219_v26 = vmax.f32 %v2111_v22, 0.0  ;;  %v2103_v38 = vadd.f32 %v2102_v59, %v1942_v12 }
 0x210   : > { %v5549_v41 = vpop.f32.mrf.mxu0  ;;  %v4963_v12 = vadd.f32 %v6762_v8, %v6757_v20  ;;  %v1958_v28 = vadd.f32 %v4960_v9, %v6740_v61  ;;  %v4978_v59 = vadd.f32 %v6803_v14, %v6798_v51  ;;  %v7007_v20 = vpop.f32.mrf.mxu1  ;;  %v2475_v9 = vld [vmem:[#allocation3 + $0xa] sm:$0xff] }
 0x211   : > { %2381 = vst [vmem:[#allocation3 + $0x39] sm:$0xff] %v6976_v47  ;;  %v2292_v36 = vadd.f32 %v6948_v34, %v2253_v33  ;;  %v2258_v31 = vmul.f32 %v6934_v52, %v2219_v26  ;;  %v2217_v3 = vmax.f32 %v2103_v38, 0.0  ;;  %v2114_v27 = vadd.f32 %v5549_v41, %v1953_v44  ;;  %v2474_v38 = vld [vmem:[#allocation3 + $0x2] sm:$0xff] }
 0x212   : > { %v2105_v2 = vpop.f32.mrf.mxu0  ;;  %v2718_v43 = vpack.c.bf16 %v6976_v47, %v6960_v48  ;;  %v1969_v33 = vadd.f32 %v4969_v6, %v6767_v4  ;;  %v7017_v51 = vld [vmem:[%s7971_s4 + $0x238] sm:$0xff]   ;;  %v8004_v4 = vld [vmem:[#allocation9_spill] sm:$0xff] }
 0x213   : > { %2379 = vst [vmem:[#allocation3 + $0x21] sm:$0xff] %v2292_v36  ;;  %v6993_v32 = vadd.f32 %v6948_v34, %v2258_v31  ;;  %v2256_v13 = vmul.f32 %v6934_v52, %v2217_v3  ;;  %v2220_v55 = vmax.f32 %v2114_v27, 0.0  ;;  %v2106_v18 = vadd.f32 %v2105_v2, %v1945_v40  ;;  %v8005_v40 = vld [vmem:[#allocation6_spill] sm:$0xff]  ;;  %5574 = vmatprep.subr.bf16.mxu1 %v7017_v51 }
 0x214   : > { %v5552_v24 = vpop.f32.mrf.mxu0  ;;  %v2709_v39 = vpack.c.bf16 %v2292_v36, %v2291_v17  ;;  %v4972_v14 = vadd.f32 %v8004_v4, %v6778_v57  ;;  %v1961_v36 = vadd.f32 %v4963_v12, %v8005_v40  ;;  %v4981_v2 = vadd.f32 %v6810_v45, %v6805_v35  ;;  %v7033_v12 = vpop.f32.mrf.mxu1  ;;  %v2508_v4 = vld [vmem:[#allocation3 + $0x30] sm:$0xff] }
 0x215   : > { %2384 = vst [vmem:[#allocation3 + $0x61] sm:$0xff] %v6993_v32  ;;  %v7001_v50 = vadd.f32 %v6948_v34, %v2256_v13  ;;  %v2259_v54 = vmul.f32 %v6934_v52, %v2220_v55  ;;  %v2218_v22 = vmax.f32 %v2106_v18, 0.0  ;;  %v2127_v37 = vadd.f32 %v5552_v24, %v1966_v56 }
 0x216   : > { %v2118_v44 = vpop.f32.mrf.mxu0  ;;  %3459 = vmatprep.mubr.bf16.mxu1 %v2709_v39  ;;  %v1982_v57 = vadd.f32 %v4978_v59, %v6794_v46  ;;  %v2701_v55 = vpack.c.bf16 %v2475_v9, %v2474_v38  ;;  %v2506_v35 = vld [vmem:[#allocation3 + $0x18] sm:$0xff] }
 0x217   : > { %2382 = vst [vmem:[#allocation3 + $0x49] sm:$0xff] %v7001_v50  ;;  %v7011_v61 = vadd.f32 %v6948_v34, %v2259_v54  ;;  %v2257_v8 = vmul.f32 %v6934_v52, %v2218_v22  ;;  %v2223_v17 = vmax.f32 %v2127_v37, 0.0  ;;  %v2119_v26 = vadd.f32 %v2118_v44, %v1958_v28  ;;  %v8006_v22 = vld [vmem:[#allocation10_spill] sm:$0xff]  ;;  %v8007_v44 = vld [vmem:[#allocation7_spill] sm:$0xff] }
 0x218   : > { %v5553_v41 = vpop.f32.mrf.mxu0  ;;  %v2509_v45 = vld [vmem:[#allocation3 + $0x38] sm:$0xff]  ;;  %v4975_v46 = vadd.f32 %v6796_v21, %v8006_v22 }
 0x219   : > { %2385 = vst [vmem:[#allocation3 + $0x69] sm:$0xff] %v7011_v61  ;;  %v7024_v31 = vadd.f32 %v6948_v34, %v2257_v8  ;;  %v2262_v3 = vmul.f32 %v6934_v52, %v2223_v17  ;;  %v2221_v27 = vmax.f32 %v2119_v26, 0.0  ;;  %v2130_v6 = vadd.f32 %v5553_v41, %v1969_v33  ;;  %v5744_v17 = vld [vmem:[%s7971_s4 + $0x1b8] sm:$0xff]   ;;  %v8008_v41 = vld [vmem:[#allocation20_spill] sm:$0xff] }
 0x21a   : > { %v2121_v56 = vpop.f32.mrf.mxu0  ;;  %v2507_v13 = vld [vmem:[#allocation3 + $0x20] sm:$0xff]  ;;  %v2736_v18 = vpack.c.bf16 %v7011_v61, %v6993_v32  ;;  %v1974_v33 = vadd.f32 %v4972_v14, %v8007_v44  ;;  %v4990_v40 = vadd.f32 %v8008_v41, %v6835_v29  ;;  %v8010_v29 = vld [vmem:[#allocation13_spill] sm:$0xff] }
 0x21b   : > { %2383 = vst [vmem:[#allocation3 + $0x51] sm:$0xff] %v7024_v31  ;;  %v7037_v24 = vadd.f32 %v6948_v34, %v2262_v3  ;;  %v2260_v28 = vmul.f32 %v6934_v52, %v2221_v27  ;;  %v2224_v39 = vmax.f32 %v2130_v6, 0.0  ;;  %v2122_v54 = vadd.f32 %v2121_v56, %v1961_v36  ;;  %v5747_v14 = vld [vmem:[%s7971_s4 + $0x1f0] sm:$0xff]   ;;  %v8009_v27 = vld [vmem:[#allocation11_spill] sm:$0xff]  ;;  %v7061_v56 = vpop.f32.mrf.mxu1 }
 0x21c   : > { %v5556_v37 = vpop.f32.mrf.mxu0  ;;  %v2702_v59 = vpack.c.bf16 %v2507_v13, %v2506_v35  ;;  %v2727_v8 = vpack.c.bf16 %v7024_v31, %v7001_v50  ;;  %v7058_v3 = vpack.c.bf16 %v2509_v45, %v2508_v4  ;;  %v1985_v6 = vadd.f32 %v4981_v2, %v8009_v27  ;;  %v8012_v45 = vld [vmem:[#allocation8_spill] sm:$0xff]  ;;  %v2477_v44 = vld [vmem:[#allocation3 + $0x22] sm:$0xff] }
 0x21d   : > { %2388 = vst [vmem:[#allocation3 + $0x91] sm:$0xff] %v7037_v24  ;;  %v7050_v26 = vadd.f32 %v6948_v34, %v2260_v28  ;;  %v2263_v38 = vmul.f32 %v6934_v52, %v2224_v39  ;;  %v2222_v9 = vmax.f32 %v2122_v54, 0.0  ;;  %v2143_v21 = vadd.f32 %v5556_v37, %v1982_v57  ;;  %v8011_v54 = vld [vmem:[#allocation15_spill] sm:$0xff]  ;;  %v5748_v37 = vld [vmem:[%s7971_s4 + $0x1b0] sm:$0xff]   ;;  %v7091_v41 = vpop.f32.mrf.mxu1 }
 0x21e   : > { %3612 = vmatprep.mubr.bf16.mxu0 %v2702_v59  ;;  %v2134_v36 = vpop.f32.mrf.mxu0  ;;  %3460 = vmatmul.mubr.bf16.gmra.mxu1 %v2702_v59  ;;  %v4984_v35 = vadd.f32 %v8011_v54, %v8010_v29  ;;  %v1977_v22 = vadd.f32 %v4975_v46, %v8012_v45  ;;  %v2476_v59 = vld [vmem:[#allocation3 + $0x1a] sm:$0xff] }
 0x21f   : > { %2386 = vst [vmem:[#allocation3 + $0x79] sm:$0xff] %v7050_v26  ;;  %v7065_v57 = vadd.f32 %v6948_v34, %v2263_v38  ;;  %v2261_v13 = vmul.f32 %v6934_v52, %v2222_v9  ;;  %v2227_v28 = vmax.f32 %v2143_v21, 0.0  ;;  %v2135_v39 = vadd.f32 %v2134_v36, %v1974_v33  ;;  %3613 = vmatmul.mubr.bf16.vlgmr.msra.gmra.mxu0 %v2701_v55  ;;  %v5751_v46 = vld [vmem:[%s7971_s4 + $0x1e8] sm:$0xff]  }
 0x220   : > { %3467 = vmatprep.mubr.bf16.mxu1 %v2718_v43  ;;  %3620 = vmatprep.mubr.bf16.mxu0 %v7058_v3  ;;  %v5557_v2 = vpop.f32.mrf.mxu0  ;;  %v8013_v33 = vld [vmem:[#allocation21_spill] sm:$0xff] }
 0x221   : > { %5391 = vmatpush3.bf16.msra.mxu0 %v5744_v17  ;;  %2389 = vst [vmem:[#allocation3 + $0x99] sm:$0xff] %v7065_v57  ;;  %v7080_v55 = vadd.f32 %v6948_v34, %v2261_v13  ;;  %v2266_v48 = vmul.f32 %v6934_v52, %v2227_v28  ;;  %v2225_v47 = vmax.f32 %v2135_v39, 0.0  ;;  %v2146_v43 = vadd.f32 %v5557_v2, %v1985_v6  ;;  %v8014_v9 = vld [vmem:[#allocation17_spill] sm:$0xff]  ;;  %v8015_v28 = vld [vmem:[#allocation16_spill] sm:$0xff] }
 0x222   : > { %5392 = vmatprep.subr.bf16.mxu0 %v5747_v14  ;;  %v4993_v17 = vadd.f32 %v6853_v30, %v8013_v33  ;;  %v2137_v38 = vpop.f32.mrf.mxu0  ;;  %v1998_v21 = vadd.f32 %v4990_v40, %v8014_v9  ;;  %v2754_v4 = vpack.c.bf16 %v7065_v57, %v7037_v24  ;;  %v2511_v13 = vld [vmem:[#allocation3 + $0x50] sm:$0xff]  ;;  %v8016_v30 = vld [vmem:[#allocation18_spill] sm:$0xff]  ;;  %v7101_v2 = vpack.c.bf16 %v2477_v44, %v2476_v59  ;;  %v8018_v9 = vld [vmem:[#allocation19_spill] sm:$0xff] }
 0x223   : > { %2387 = vst [vmem:[#allocation3 + $0x81] sm:$0xff] %v7080_v55  ;;  %v7095_v36 = vadd.f32 %v6948_v34, %v2266_v48  ;;  %v2264_v14 = vmul.f32 %v6934_v52, %v2225_v47  ;;  %v2228_v27 = vmax.f32 %v2146_v43, 0.0  ;;  %v2138_v6 = vadd.f32 %v2137_v38, %v1977_v22  ;;  %v8017_v40 = vld [vmem:[#allocation12_spill] sm:$0xff]  ;;  %v5752_v48 = vld [vmem:[%s7971_s4 + $0x1a8] sm:$0xff]  }
 0x224   : > { %v4987_v39 = vadd.f32 %v8016_v30, %v8015_v28  ;;  %v5560_v29 = vpop.f32.mrf.mxu0  ;;  %v1990_v54 = vadd.f32 %v4984_v35, %v8017_v40  ;;  %v2745_v45 = vpack.c.bf16 %v7080_v55, %v7050_v26  ;;  %v2510_v35 = vld [vmem:[#allocation3 + $0x48] sm:$0xff]  ;;  %v5755_v59 = vld [vmem:[%s7971_s4 + $0x1e0] sm:$0xff]   ;;  %v7122_v28 = vpop.f32.mrf.mxu1 }
 0x225   : > { %5393 = vmatpush3.bf16.msra.mxu0 %v5748_v37  ;;  %2392 = vst [vmem:[#allocation3 + $0xc1] sm:$0xff] %v7095_v36  ;;  %v7110_v22 = vadd.f32 %v6948_v34, %v2264_v14  ;;  %v2267_v47 = vmul.f32 %v6934_v52, %v2228_v27  ;;  %v2226_v43 = vmax.f32 %v2138_v6, 0.0  ;;  %v2159_v33 = vadd.f32 %v5560_v29, %v1998_v21  ;;  %v5756_v29 = vld [vmem:[%s7971_s4 + $0x1a0] sm:$0xff]  }
 0x226   : > { %5394 = vmatprep.subr.bf16.mxu0 %v5751_v46  ;;  %v5002_v37 = vadd.f32 %v6886_v58, %v6881_v1  ;;  %v2150_v44 = vpop.f32.mrf.mxu0  ;;  %3468 = vmatmul.mubr.bf16.gmra.mxu1 %v7058_v3  ;;  %v7119_v38 = vpack.c.bf16 %v2511_v13, %v2510_v35  ;;  %v2001_v14 = vadd.f32 %v4993_v17, %v8018_v9  ;;  %v8019_v1 = vld [vmem:[#allocation23_spill] sm:$0xff]  ;;  %v8020_v13 = vld [vmem:[#allocation14_spill] sm:$0xff]  ;;  %v7153_v35 = vpop.f32.mrf.mxu1 }
 0x227   : > { %2390 = vst [vmem:[#allocation3 + $0xa9] sm:$0xff] %v7110_v22  ;;  %v7126_v46 = vadd.f32 %v6948_v34, %v2267_v47  ;;  %v2265_v21 = vmul.f32 %v6934_v52, %v2226_v43  ;;  %v2231_v27 = vmax.f32 %v2159_v33, 0.0  ;;  %v2151_v6 = vadd.f32 %v2150_v44, %v1990_v54  ;;  %3621 = vmatmul.mubr.bf16.gmra.mxu0 %v7101_v2  ;;  %v2479_v54 = vld [vmem:[#allocation3 + $0x3a] sm:$0xff] }
 0x228   : > { %3475 = vmatprep.mubr.bf16.mxu1 %v2727_v8  ;;  %v4996_v58 = vadd.f32 %v6860_v42, %v8019_v1  ;;  %3628 = vmatprep.mubr.bf16.mxu0 %v7119_v38  ;;  %v5561_v17 = vpop.f32.mrf.mxu0  ;;  %v1993_v30 = vadd.f32 %v4987_v39, %v8020_v13  ;;  %v2478_v42 = vld [vmem:[#allocation3 + $0x32] sm:$0xff]  ;;  %v5759_v39 = vld [vmem:[%s7971_s4 + $0x1d8] sm:$0xff]   ;;  %v2014_v43 = vadd.f32 %v5002_v37, %v6863_v25  ;;  %v8022_v25 = vld [vmem:[#allocation22_spill] sm:$0xff] }
 0x229   : > { %5395 = vmatpush3.bf16.msra.mxu0 %v5752_v48  ;;  %2393 = vst [vmem:[#allocation3 + $0xc9] sm:$0xff] %v7126_v46  ;;  %v7142_v40 = vadd.f32 %v6948_v34, %v2265_v21  ;;  %v2270_v50 = vmul.f32 %v6934_v52, %v2231_v27  ;;  %v2229_v31 = vmax.f32 %v2151_v6, 0.0  ;;  %v2162_v8 = vadd.f32 %v5561_v17, %v2001_v14  ;;  %v2513_v21 = vld [vmem:[#allocation3 + $0x68] sm:$0xff] }
 0x22a   : > { %5396 = vmatprep.subr.bf16.mxu0 %v5755_v59  ;;  %v5005_v48 = vadd.f32 %v6896_v63, %v6891_v53  ;;  %v2153_v47 = vpop.f32.mrf.mxu0  ;;  %v2772_v33 = vpack.c.bf16 %v7126_v46, %v7095_v36  ;;  %v8021_v53 = vld [vmem:[#allocation26_spill] sm:$0xff]  ;;  %v2006_v37 = vadd.f32 %v4996_v58, %v8022_v25  ;;  %v7163_v6 = vpack.c.bf16 %v2479_v54, %v2478_v42  ;;  %v5760_v17 = vld [vmem:[%s7971_s4 + $0x198] sm:$0xff]  }
 0x22b   : > { %2391 = vst [vmem:[#allocation3 + $0xb1] sm:$0xff] %v7142_v40  ;;  %v7157_v44 = vadd.f32 %v6948_v34, %v2270_v50  ;;  %v2268_v59 = vmul.f32 %v6934_v52, %v2229_v31  ;;  %v2232_v9 = vmax.f32 %v2162_v8, 0.0  ;;  %v2154_v14 = vadd.f32 %v2153_v47, %v1993_v30  ;;  %v2512_v58 = vld [vmem:[#allocation3 + $0x60] sm:$0xff]  ;;  %v8023_v47 = vld [vmem:[#allocation25_spill] sm:$0xff] }
 0x22c   : > { %v4999_v63 = vadd.f32 %v8021_v53, %v6865_v49  ;;  %v5564_v27 = vpop.f32.mrf.mxu0  ;;  %v2763_v1 = vpack.c.bf16 %v7142_v40, %v7110_v22  ;;  %v5761_v31 = vld [vmem:[%s7971_s4 + $0x1d0] sm:$0xff]   ;;  %v5014_v8 = vadd.f32 %v6973_v5, %v6957_v16  ;;  %v7183_v54 = vpack.c.bf16 %v2513_v21, %v2512_v58  ;;  %v8024_v5 = vld [vmem:[#allocation24_spill] sm:$0xff] }
 0x22d   : > { %5397 = vmatpush3.bf16.msra.mxu0 %v5756_v29  ;;  %2396 = vst [vmem:[#allocation3 + $0xf1] sm:$0xff] %v7157_v44  ;;  %v7172_v13 = vadd.f32 %v6948_v34, %v2268_v59  ;;  %v2271_v49 = vmul.f32 %v6934_v52, %v2232_v9  ;;  %v2230_v30 = vmax.f32 %v2154_v14, 0.0  ;;  %v2175_v50 = vadd.f32 %v5564_v27, %v2014_v43  ;;  %v5025_v43 = vpop.f32.mrf.mxu1  ;;  %v5762_v21 = vld [vmem:[%s7971_s4 + $0x190] sm:$0xff]  }
 0x22e   : > { %5398 = vmatprep.subr.bf16.mxu0 %v5759_v39  ;;  %v5008_v29 = vadd.f32 %v6918_v0, %v6907_v23  ;;  %v2166_v42 = vpop.f32.mrf.mxu0  ;;  %3476 = vmatmul.mubr.bf16.gmra.mxu1 %v7119_v38  ;;  %v2017_v59 = vadd.f32 %v5005_v48, %v8023_v47  ;;  %v5017_v23 = vadd.f32 %v7007_v20, %v6990_v11  ;;  %v2480_v11 = vld [vmem:[#allocation3 + $0x4a] sm:$0xff]  ;;  %v2481_v20 = vld [vmem:[#allocation3 + $0x52] sm:$0xff] }
 0x22f   : > { %2394 = vst [vmem:[#allocation3 + $0xd9] sm:$0xff] %v7172_v13  ;;  %v7188_v39 = vadd.f32 %v6948_v34, %v2271_v49  ;;  %v2269_v9 = vmul.f32 %v6934_v52, %v2230_v30  ;;  %v2235_v14 = vmax.f32 %v2175_v50, 0.0  ;;  %v2167_v0 = vadd.f32 %v2166_v42, %v2006_v37  ;;  %3629 = vmatmul.mubr.bf16.gmra.mxu0 %v7163_v6  ;;  %v5027_v50 = vpop.f32.mrf.mxu1 }
 0x230   : > { %3483 = vmatprep.mubr.bf16.mxu1 %v2736_v18  ;;  %3636 = vmatprep.mubr.bf16.mxu0 %v7183_v54  ;;  %v5565_v16 = vpop.f32.mrf.mxu0  ;;  %v2009_v48 = vadd.f32 %v4999_v63, %v8024_v5  ;;  %v5763_v63 = vld [vmem:[%s7971_s4 + $0x1c8] sm:$0xff]   ;;  %v4914_v27 = vadd.f32 %v6914_v10, %v6909_v15  ;;  %v2030_v37 = vadd.f32 %v5014_v8, %v6889_v60  ;;  %v2490_v46 = vld [vmem:[#allocation3 + $0xc2] sm:$0xff] }
 0x231   : > { %5399 = vmatpush3.bf16.msra.mxu0 %v5760_v17  ;;  %2397 = vst [vmem:[#allocation3 + $0xf9] sm:$0xff] %v7188_v39  ;;  %v7204_v53 = vadd.f32 %v6948_v34, %v2269_v9  ;;  %v2274_v32 = vmul.f32 %v6934_v52, %v2235_v14  ;;  %v2233_v61 = vmax.f32 %v2167_v0, 0.0  ;;  %v2178_v18 = vadd.f32 %v5565_v16, %v2017_v59  ;;  %v8025_v17 = vld [vmem:[#allocation27_spill] sm:$0xff]  ;;  %v2515_v59 = vld [vmem:[#allocation3 + $0x80] sm:$0xff]  ;;  %v5765_v9 = vld [vmem:[%s7971_s4 + $0x188] sm:$0xff]  }
 0x232   : > { %5400 = vmatprep.subr.bf16.mxu0 %v5761_v31  ;;  %v2169_v25 = vpop.f32.mrf.mxu0  ;;  %v2022_v49 = vadd.f32 %v5008_v29, %v8025_v17  ;;  %v2790_v30 = vpack.c.bf16 %v7188_v39, %v7157_v44  ;;  %v5011_v15 = vadd.f32 %v6936_v19, %v6926_v7  ;;  %v7223_v10 = vpack.c.bf16 %v2481_v20, %v2480_v11  ;;  %v2514_v16 = vld [vmem:[#allocation3 + $0x78] sm:$0xff]  ;;  %v5028_v20 = vpop.f32.mrf.mxu1  ;;  %v8029_v17 = vld [vmem:[#allocation28_spill] sm:$0xff] }
 0x233   : > { %2395 = vst [vmem:[#allocation3 + $0xe1] sm:$0xff] %v7204_v53  ;;  %v7218_v58 = vadd.f32 %v6948_v34, %v2274_v32  ;;  %v2272_v31 = vmul.f32 %v6934_v52, %v2233_v61  ;;  %v2236_v42 = vmax.f32 %v2178_v18, 0.0  ;;  %v2170_v47 = vadd.f32 %v2169_v25, %v2009_v48  ;;  %v8028_v32 = vld [vmem:[#allocation32_spill] sm:$0xff] }
 0x234   : > { %v5568_v60 = vpop.f32.mrf.mxu0  ;;  %v2033_v29 = vadd.f32 %v5017_v23, %v6894_v62  ;;  %v2781_v8 = vpack.c.bf16 %v7204_v53, %v7172_v13  ;;  %v5766_v62 = vld [vmem:[%s7971_s4 + $0x1c0] sm:$0xff]   ;;  %v5026_v48 = vadd.f32 %v5025_v43, %v7153_v35  ;;  %v7244_v11 = vpack.c.bf16 %v2515_v59, %v2514_v16 }
 0x235   : > { %5401 = vmatpush3.bf16.msra.mxu0 %v5762_v21  ;;  %2400 = vst [vmem:[#allocation3 + $0x121] sm:$0xff] %v7218_v58  ;;  %v7233_v14 = vadd.f32 %v6948_v34, %v2272_v31  ;;  %v2275_v19 = vmul.f32 %v6934_v52, %v2236_v42  ;;  %v2234_v7 = vmax.f32 %v2170_v47, 0.0  ;;  %v2191_v0 = vadd.f32 %v5568_v60, %v2030_v37  ;;  %v8026_v23 = vld [vmem:[#allocation4_spill] sm:$0xff]  ;;  %v8027_v21 = vld [vmem:[#allocation31_spill] sm:$0xff]  ;;  %v8030_v47 = vld [vmem:[#allocation5_spill] sm:$0xff] }
 0x236   : > { %5402 = vmatprep.subr.bf16.mxu0 %v5763_v63  ;;  %v1885_v5 = vadd.f32 %v4914_v27, %v8026_v23  ;;  %v4917_v61 = vadd.f32 %v8028_v32, %v8027_v21  ;;  %v2182_v18 = vpop.f32.mrf.mxu0  ;;  %3484 = vmatmul.mubr.bf16.gmra.mxu1 %v7183_v54  ;;  %v5020_v35 = vadd.f32 %v7061_v56, %v7033_v12  ;;  %v5767_v42 = vld [vmem:[%s7971_s4 + $0x180] sm:$0xff]   ;;  %v2482_v12 = vld [vmem:[#allocation3 + $0x62] sm:$0xff]  ;;  %v2517_v23 = vld [vmem:[#allocation3 + $0x98] sm:$0xff] }
 0x237   : > { %2398 = vst [vmem:[#allocation3 + $0x109] sm:$0xff] %v7233_v14  ;;  %v7248_v63 = vadd.f32 %v6948_v34, %v2275_v19  ;;  %v2273_v25 = vmul.f32 %v6934_v52, %v2234_v7  ;;  %v2239_v37 = vmax.f32 %v2191_v0, 0.0  ;;  %v2183_v27 = vadd.f32 %v2182_v18, %v2022_v49  ;;  %3637 = vmatmul.mubr.bf16.gmra.mxu0 %v7223_v10  ;;  %v2483_v56 = vld [vmem:[#allocation3 + $0x6a] sm:$0xff]  ;;  %v2489_v40 = vld [vmem:[#allocation3 + $0xb2] sm:$0xff] }
 0x238   : > { %3491 = vmatprep.mubr.bf16.mxu1 %v2745_v45  ;;  %3644 = vmatprep.mubr.bf16.mxu0 %v7244_v11  ;;  %v5569_v43 = vpop.f32.mrf.mxu0  ;;  %v2025_v31 = vadd.f32 %v5011_v15, %v8029_v17  ;;  %v1888_v59 = vadd.f32 %v4917_v61, %v8030_v47  ;;  %v5029_v15 = vadd.f32 %v5028_v20, %v5027_v50  ;;  %v8031_v50 = vld [vmem:[#allocation29_spill] sm:$0xff] }
 0x239   : > { %5403 = vmatpush3.bf16.msra.mxu0 %v5765_v9  ;;  %2401 = vst [vmem:[#allocation3 + $0x129] sm:$0xff] %v7248_v63  ;;  %v7264_v49 = vadd.f32 %v6948_v34, %v2273_v25  ;;  %v2278_v26 = vmul.f32 %v6934_v52, %v2239_v37  ;;  %v2237_v55 = vmax.f32 %v2183_v27, 0.0  ;;  %v2194_v45 = vadd.f32 %v5569_v43, %v2033_v29  ;;  %v2516_v37 = vld [vmem:[#allocation3 + $0x90] sm:$0xff]  ;;  %v2495_v39 = vld [vmem:[#allocation3 + $0xfa] sm:$0xff] }
 0x23a   : > { %5404 = vmatprep.subr.bf16.mxu0 %v5766_v62  ;;  %v2185_v60 = vpop.f32.mrf.mxu0  ;;  %v2046_v9 = vadd.f32 %v5026_v48, %v1885_v5  ;;  %v2808_v19 = vpack.c.bf16 %v7248_v63, %v7218_v58  ;;  %v5023_v62 = vadd.f32 %v7122_v28, %v7091_v41  ;;  %v2038_v32 = vadd.f32 %v5020_v35, %v8031_v50  ;;  %v2492_v13 = vld [vmem:[#allocation3 + $0xda] sm:$0xff]  ;;  %v2493_v53 = vld [vmem:[#allocation3 + $0xe2] sm:$0xff]  ;;  %v2494_v44 = vld [vmem:[#allocation3 + $0xf2] sm:$0xff] }
 0x23b   : > { %2399 = vst [vmem:[#allocation3 + $0x111] sm:$0xff] %v7264_v49  ;;  %v7272_v7 = vadd.f32 %v6948_v34, %v2278_v26  ;;  %v2276_v0 = vmul.f32 %v6934_v52, %v2237_v55  ;;  %v2240_v16 = vmax.f32 %v2194_v45, 0.0  ;;  %v2186_v29 = vadd.f32 %v2185_v60, %v2025_v31  ;;  %v8032_v26 = vld [vmem:[#allocation30_spill] sm:$0xff] }
 0x23c   : > { %v5572_v21 = vpop.f32.mrf.mxu0  ;;  %v7278_v5 = vpack.c.bf16 %v2483_v56, %v2482_v12  ;;  %v2799_v48 = vpack.c.bf16 %v7264_v49, %v7233_v14  ;;  %v7288_v28 = vpack.c.bf16 %v2517_v23, %v2516_v37  ;;  %v2049_v27 = vadd.f32 %v5029_v15, %v1888_v59  ;;  %v2484_v15 = vld [vmem:[#allocation3 + $0x7a] sm:$0xff]  ;;  %v2485_v60 = vld [vmem:[#allocation3 + $0x82] sm:$0xff] }
 0x23d   : > { %5405 = vmatpush3.bf16.msra.mxu0 %v5767_v42  ;;  %2404 = vst [vmem:[#allocation3 + $0x151] sm:$0xff] %v7272_v7  ;;  %v7284_v61 = vadd.f32 %v6948_v34, %v2276_v0  ;;  %v2279_v18 = vmul.f32 %v6934_v52, %v2240_v16  ;;  %v2238_v20 = vmax.f32 %v2186_v29, 0.0  ;;  %v2207_v25 = vadd.f32 %v5572_v21, %v2046_v9  ;;  %v2519_v16 = vld [vmem:[#allocation3 + $0xb0] sm:$0xff] }
 0x23e   : > { %v2198_v41 = vpop.f32.mrf.mxu0  ;;  %3492 = vmatmul.mubr.bf16.gmra.mxu1 %v7244_v11  ;;  %v2041_v55 = vadd.f32 %v5023_v62, %v8032_v26  ;;  %v7317_v50 = vpack.c.bf16 %v2485_v60, %v2484_v15  ;;  %v2522_v26 = vld [vmem:[#allocation3 + $0xd8] sm:$0xff]  ;;  %v2524_v15 = vld [vmem:[#allocation3 + $0xf0] sm:$0xff] }
 0x23f   : > { %2402 = vst [vmem:[#allocation3 + $0x139] sm:$0xff] %v7284_v61  ;;  %v7292_v35 = vadd.f32 %v6948_v34, %v2279_v18  ;;  %v2277_v43 = vmul.f32 %v6934_v52, %v2238_v20  ;;  %v2243_v17 = vmax.f32 %v2207_v25, 0.0  ;;  %v2199_v31 = vadd.f32 %v2198_v41, %v2038_v32  ;;  %3645 = vmatmul.mubr.bf16.gmra.mxu0 %v7278_v5  ;;  %v2518_v32 = vld [vmem:[#allocation3 + $0xa8] sm:$0xff]  ;;  %v2486_v41 = vld [vmem:[#allocation3 + $0x92] sm:$0xff] }
 0x240   : > { %3499 = vmatprep.mubr.bf16.mxu1 %v2754_v4  ;;  %3652 = vmatprep.mubr.bf16.mxu0 %v7288_v28  ;;  %v5573_v42 = vpop.f32.mrf.mxu0  ;;  %v7320_v18 = vpack.c.bf16 %v2519_v16, %v2518_v32  ;;  %v2528_v16 = vld [vmem:[#allocation3 + $0x120] sm:$0xff]  ;;  %v2499_v63 = vld [vmem:[#allocation3 + $0x12a] sm:$0xff] }
 0x241   : > { %2405 = vst [vmem:[#allocation3 + $0x159] sm:$0xff] %v7292_v35  ;;  %v7303_v45 = vadd.f32 %v6948_v34, %v2277_v43  ;;  %v2282_v12 = vmul.f32 %v6934_v52, %v2243_v17  ;;  %v2241_v56 = vmax.f32 %v2199_v31, 0.0  ;;  %v2210_v47 = vadd.f32 %v5573_v42, %v2049_v27  ;;  %v2487_v27 = vld [vmem:[#allocation3 + $0x9a] sm:$0xff]  ;;  %v2521_v43 = vld [vmem:[#allocation3 + $0xc8] sm:$0xff] }
 0x242   : > { %v2201_v59 = vpop.f32.mrf.mxu0  ;;  %v2826_v24 = vpack.c.bf16 %v7292_v35, %v7272_v7  ;;  %v7336_v17 = vpack.c.bf16 %v2487_v27, %v2486_v41  ;;  %v2520_v31 = vld [vmem:[#allocation3 + $0xc0] sm:$0xff]  ;;  %v2496_v14 = vld [vmem:[#allocation3 + $0x10a] sm:$0xff]  ;;  %v2497_v49 = vld [vmem:[#allocation3 + $0x112] sm:$0xff] }
 0x243   : > { %2403 = vst [vmem:[#allocation3 + $0x141] sm:$0xff] %v7303_v45  ;;  %v2321_v57 = vadd.f32 %v6948_v34, %v2282_v12  ;;  %v2280_v4 = vmul.f32 %v6934_v52, %v2241_v56  ;;  %v2244_v9 = vmax.f32 %v2210_v47, 0.0  ;;  %v2202_v0 = vadd.f32 %v2201_v59, %v2041_v55  ;;  %v2525_v56 = vld [vmem:[#allocation3 + $0xf8] sm:$0xff]  ;;  %v2498_v58 = vld [vmem:[#allocation3 + $0x122] sm:$0xff] }
 0x244   : > { %v2817_v29 = vpack.c.bf16 %v7303_v45, %v7284_v61  ;;  %v7339_v22 = vpack.c.bf16 %v2521_v43, %v2520_v31  ;;  %v7361_v60 = vpack.c.bf16 %v2525_v56, %v2524_v15  ;;  %v2532_v41 = vld [vmem:[#allocation3 + $0x150] sm:$0xff]  ;;  %v5768_v15 = vld [vmem:[%s7971_s4 + $0x230] sm:$0xff]  }
 0x245   : > { %2408 = vst [vmem:[#allocation3 + $0x181] sm:$0xff] %v2321_v57  ;;  %v7314_v23 = vadd.f32 %v6948_v34, %v2280_v4  ;;  %v2283_v62 = vmul.f32 %v6934_v52, %v2244_v9  ;;  %v2242_v21 = vmax.f32 %v2202_v0, 0.0  ;;  %v7368_v57 = vpack.c.bf16 %v2493_v53, %v2492_v13  ;;  %v2526_v4 = vld [vmem:[#allocation3 + $0x108] sm:$0xff]  ;;  %v2635_v56 = vld [vmem:[#allocation3 + $0x31] sm:$0xff] }
 0x246   : > { %3500 = vmatmul.mubr.bf16.gmra.mxu1 %v7288_v28  ;;  %v7378_v0 = vpack.c.bf16 %v2495_v39, %v2494_v44  ;;  %v2530_v32 = vld [vmem:[#allocation3 + $0x138] sm:$0xff]  ;;  %v2639_v39 = vld [vmem:[#allocation3 + $0x61] sm:$0xff] }
 0x247   : > { %2406 = vst [vmem:[#allocation3 + $0x169] sm:$0xff] %v7314_v23  ;;  %v2322_v20 = vadd.f32 %v6948_v34, %v2283_v62  ;;  %v2281_v25 = vmul.f32 %v6934_v52, %v2242_v21  ;;  %3653 = vmatmul.mubr.bf16.gmra.mxu0 %v7317_v50  ;;  %3507 = vmatprep.mubr.bf16.mxu1 %v2763_v1  ;;  %v2523_v1 = vld [vmem:[#allocation3 + $0xe0] sm:$0xff]  ;;  %v2638_v53 = vld [vmem:[#allocation3 + $0x51] sm:$0xff] }
 0x248   : > { %3660 = vmatprep.mubr.bf16.mxu0 %v7320_v18  ;;  %v7349_v55 = vpack.c.bf16 %v2523_v1, %v2522_v26  ;;  %v7388_v21 = vpack.c.bf16 %v2497_v49, %v2496_v14  ;;  %v2502_v7 = vld [vmem:[#allocation3 + $0x152] sm:$0xff]  ;;  %v2503_v35 = vld [vmem:[#allocation3 + $0x15a] sm:$0xff] }
 0x249   : > { %2409 = vst [vmem:[#allocation3 + $0x189] sm:$0xff] %v2322_v20  ;;  %v7331_v37 = vadd.f32 %v6948_v34, %v2281_v25  ;;  %v2488_v34 = vld [vmem:[#allocation3 + $0xaa] sm:$0xff]  ;;  %v7398_v25 = vpack.c.bf16 %v2499_v63, %v2498_v58  ;;  %v2641_v14 = vld [vmem:[#allocation3 + $0x79] sm:$0xff] }
 0x24a   : > { %v7346_v42 = vpack.c.bf16 %v2489_v40, %v2488_v34  ;;  %v2500_v61 = vld [vmem:[#allocation3 + $0x13a] sm:$0xff]  ;;  %v2501_v45 = vld [vmem:[#allocation3 + $0x142] sm:$0xff]  ;;  %v7418_v40 = vpack.c.bf16 %v2503_v35, %v2502_v7  ;;  %v5774_v49 = vld [vmem:[%s7971_s4 + $0x200] sm:$0xff]  }
 0x24b   : > { %2407 = vst [vmem:[#allocation3 + $0x171] sm:$0xff] %v7331_v37  ;;  %v2835_v52 = vpack.c.bf16 %v7331_v37, %v7314_v23  ;;  %v7408_v43 = vpack.c.bf16 %v2501_v45, %v2500_v61  ;;  %v2539_v23 = vld [vmem:[#allocation3 + $0x21] sm:$0xff]  ;;  %v2646_v58 = vld [vmem:[#allocation3 + $0xb1] sm:$0xff]  ;;  %v2645_v63 = vld [vmem:[#allocation3 + $0xa9] sm:$0xff] }
 0x24c   : > { %v2536_v1 = vld [vmem:[#allocation3 + $0x180] sm:$0xff] }
 0x24e   : > { %3508 = vmatmul.mubr.bf16.gmra.mxu1 %v7320_v18  ;;  %v2534_v31 = vld [vmem:[#allocation3 + $0x168] sm:$0xff] }
 0x24f   : > { %3661 = vmatmul.mubr.bf16.gmra.mxu0 %v7336_v17  ;;  %3515 = vmatprep.mubr.bf16.mxu1 %v2772_v33  ;;  %v2491_v33 = vld [vmem:[#allocation3 + $0xca] sm:$0xff] }
 0x250   : > { %3668 = vmatprep.mubr.bf16.mxu0 %v7339_v22  ;;  %v7358_v59 = vpack.c.bf16 %v2491_v33, %v2490_v46  ;;  %v2636_v46 = vld [vmem:[#allocation3 + $0x39] sm:$0xff] }
 0x251   : > { %v2706_v13 = vpack.c.bf16 %v2636_v46, %v2635_v56  ;;  %v2655_v56 = vld [vmem:[#allocation3 + $0x121] sm:$0xff] }
 0x252   : > { %v2504_v37 = vld [vmem:[#allocation3 + $0x16a] sm:$0xff] }
 0x255   : > { %v5070_v36 = vpop.f32.mrf.mxu1 }
 0x256   : > { %3516 = vmatmul.mubr.bf16.gmra.mxu1 %v7339_v22 }
 0x257   : > { %3669 = vmatmul.mubr.bf16.gmra.mxu0 %v7346_v42  ;;  %3523 = vmatprep.mubr.bf16.mxu1 %v2781_v8  ;;  %v5071_v12 = vpop.f32.mrf.mxu1  ;;  %v2527_v8 = vld [vmem:[#allocation3 + $0x110] sm:$0xff] }
 0x258   : > { %3676 = vmatprep.mubr.bf16.mxu0 %v7349_v55  ;;  %v7356_v47 = vadd.f32 %v5071_v12, %v5070_v36  ;;  %v7371_v9 = vpack.c.bf16 %v2527_v8, %v2526_v4  ;;  %v2538_v36 = vld [vmem:[#allocation3 + $0x19] sm:$0xff]  ;;  %v2637_v8 = vld [vmem:[#allocation3 + $0x49] sm:$0xff] }
 0x259   : > { %v2703_v33 = vpack.c.bf16 %v2539_v23, %v2538_v36  ;;  %v5770_v4 = vld [vmem:[%s7971_s4 + $0x220] sm:$0xff]   ;;  %v2715_v44 = vpack.c.bf16 %v2638_v53, %v2637_v8 }
 0x25e   : > { %3524 = vmatmul.mubr.bf16.gmra.mxu1 %v7349_v55 }
 0x25f   : > { %3677 = vmatmul.mubr.bf16.gmra.mxu0 %v7358_v59  ;;  %3531 = vmatprep.mubr.bf16.mxu1 %v2790_v30  ;;  %v2529_v30 = vld [vmem:[#allocation3 + $0x128] sm:$0xff] }
 0x260   : > { %3684 = vmatprep.mubr.bf16.mxu0 %v7361_v60  ;;  %v7381_v62 = vpack.c.bf16 %v2529_v30, %v2528_v16  ;;  %v5772_v30 = vld [vmem:[%s7971_s4 + $0x210] sm:$0xff]  }
 0x266   : > { %3532 = vmatmul.mubr.bf16.gmra.mxu1 %v7361_v60 }
 0x267   : > { %3685 = vmatmul.mubr.bf16.gmra.mxu0 %v7368_v57  ;;  %3539 = vmatprep.mubr.bf16.mxu1 %v2799_v48  ;;  %v2531_v48 = vld [vmem:[#allocation3 + $0x140] sm:$0xff] }
 0x268   : > { %3692 = vmatprep.mubr.bf16.mxu0 %v7371_v9  ;;  %v7391_v20 = vpack.c.bf16 %v2531_v48, %v2530_v32 }
 0x26e   : > { %3540 = vmatmul.mubr.bf16.gmra.mxu1 %v7371_v9 }
 0x26f   : > { %3693 = vmatmul.mubr.bf16.gmra.mxu0 %v7378_v0  ;;  %3547 = vmatprep.mubr.bf16.mxu1 %v2808_v19  ;;  %v2533_v19 = vld [vmem:[#allocation3 + $0x158] sm:$0xff] }
 0x270   : > { %3700 = vmatprep.mubr.bf16.mxu0 %v7381_v62  ;;  %v7401_v27 = vpack.c.bf16 %v2533_v19, %v2532_v41  ;;  %v2751_v19 = vpack.c.bf16 %v2646_v58, %v2645_v63 }
 0x276   : > { %3548 = vmatmul.mubr.bf16.gmra.mxu1 %v7381_v62 }
 0x277   : > { %3701 = vmatmul.mubr.bf16.gmra.mxu0 %v7388_v21  ;;  %3555 = vmatprep.mubr.bf16.mxu1 %v2817_v29  ;;  %v2535_v29 = vld [vmem:[#allocation3 + $0x170] sm:$0xff] }
 0x278   : > { %3708 = vmatprep.mubr.bf16.mxu0 %v7391_v20  ;;  %v7411_v34 = vpack.c.bf16 %v2535_v29, %v2534_v31  ;;  %v2653_v31 = vld [vmem:[#allocation3 + $0x109] sm:$0xff] }
 0x27e   : > { %3556 = vmatmul.mubr.bf16.gmra.mxu1 %v7391_v20 }
 0x27f   : > { %3709 = vmatmul.mubr.bf16.gmra.mxu0 %v7398_v25  ;;  %3563 = vmatprep.mubr.bf16.mxu1 %v2826_v24  ;;  %v2537_v24 = vld [vmem:[#allocation3 + $0x188] sm:$0xff] }
 0x280   : > { %3716 = vmatprep.mubr.bf16.mxu0 %v7401_v27  ;;  %v7421_v26 = vpack.c.bf16 %v2537_v24, %v2536_v1 }
 0x286   : > { %3564 = vmatmul.mubr.bf16.gmra.mxu1 %v7401_v27 }
 0x287   : > { %3717 = vmatmul.mubr.bf16.gmra.mxu0 %v7408_v43  ;;  %3571 = vmatprep.mubr.bf16.mxu1 %v2835_v52  ;;  %v2505_v52 = vld [vmem:[#allocation3 + $0x172] sm:$0xff] }
 0x288   : > { %3724 = vmatprep.mubr.bf16.mxu0 %v7411_v34  ;;  %v7426_v12 = vpack.c.bf16 %v2505_v52, %v2504_v37  ;;  %v2656_v37 = vld [vmem:[#allocation3 + $0x129] sm:$0xff] }
 0x28e   : > { %3572 = vmatmul.mubr.bf16.gmra.mxu1 %v7411_v34 }
 0x28f   : > { %3725 = vmatmul.mubr.bf16.gmra.mxu0 %v7418_v40  ;;  %3773 = vmatprep.mubr.bf16.mxu1 %v7101_v2  ;;  %v5769_v2 = vld [vmem:[%s7971_s4 + $0x228] sm:$0xff]  }
 0x290   : > { %3732 = vmatprep.mubr.bf16.mxu0 %v7421_v26 }
 0x296   : > { %3774 = vmatmul.mubr.bf16.vlgmr.msra.gmra.mxu1 %v2703_v33 }
 0x297   : > { %3733 = vmatmul.mubr.bf16.gmra.mxu0 %v7426_v12  ;;  %3781 = vmatprep.mubr.bf16.mxu1 %v7163_v6  ;;  %v2640_v6 = vld [vmem:[#allocation3 + $0x69] sm:$0xff] }
 0x298   : > { %3934 = vmatprep.mubr.bf16.mxu0 %v2706_v13  ;;  %5575 = vmatpush3.bf16.msra.mxu1 %v7017_v51  ;;  %v5771_v51 = vld [vmem:[%s7971_s4 + $0x218] sm:$0xff]   ;;  %v2724_v16 = vpack.c.bf16 %v2640_v6, %v2639_v39 }
 0x299   : > { %5576 = vmatprep.subr.bf16.mxu1 %v5768_v15  ;;  %v2658_v39 = vld [vmem:[#allocation3 + $0x141] sm:$0xff] }
 0x29c   : > { %5577 = vmatpush3.bf16.msra.mxu1 %v5768_v15 }
 0x29d   : > { %5578 = vmatprep.subr.bf16.mxu1 %v5769_v2 }
 0x29e   : > { %3782 = vmatmul.mubr.bf16.gmra.mxu1 %v2706_v13 }
 0x29f   : > { %3935 = vmatmul.mubr.bf16.vlgmr.msra.gmra.mxu0 %v7058_v3  ;;  %3789 = vmatprep.mubr.bf16.mxu1 %v7223_v10  ;;  %v5773_v3 = vld [vmem:[%s7971_s4 + $0x208] sm:$0xff]   ;;  %v2642_v10 = vld [vmem:[#allocation3 + $0x81] sm:$0xff] }
 0x2a0   : > { %3942 = vmatprep.mubr.bf16.mxu0 %v2715_v44  ;;  %5579 = vmatpush3.bf16.msra.mxu1 %v5769_v2  ;;  %v2733_v48 = vpack.c.bf16 %v2642_v10, %v2641_v14  ;;  %v2657_v14 = vld [vmem:[#allocation3 + $0x139] sm:$0xff] }
 0x2a1   : > { %5580 = vmatprep.subr.bf16.mxu1 %v5770_v4 }
 0x2a4   : > { %5581 = vmatpush3.bf16.msra.mxu1 %v5770_v4 }
 0x2a5   : > { %5582 = vmatprep.subr.bf16.mxu1 %v5771_v51 }
 0x2a6   : > { %3790 = vmatmul.mubr.bf16.gmra.mxu1 %v2715_v44 }
 0x2a7   : > { %3943 = vmatmul.mubr.bf16.gmra.mxu0 %v7119_v38  ;;  %3797 = vmatprep.mubr.bf16.mxu1 %v7278_v5  ;;  %v2644_v38 = vld [vmem:[#allocation3 + $0x99] sm:$0xff]  ;;  %v2643_v5 = vld [vmem:[#allocation3 + $0x91] sm:$0xff] }
 0x2a8   : > { %3950 = vmatprep.mubr.bf16.mxu0 %v2724_v16  ;;  %5583 = vmatpush3.bf16.msra.mxu1 %v5771_v51  ;;  %v2742_v32 = vpack.c.bf16 %v2644_v38, %v2643_v5 }
 0x2a9   : > { %5584 = vmatprep.subr.bf16.mxu1 %v5772_v30 }
 0x2ac   : > { %5585 = vmatpush3.bf16.msra.mxu1 %v5772_v30 }
 0x2ad   : > { %5586 = vmatprep.subr.bf16.mxu1 %v5773_v3 }
 0x2ae   : > { %3798 = vmatmul.mubr.bf16.gmra.mxu1 %v2724_v16 }
 0x2af   : > { %3951 = vmatmul.mubr.bf16.gmra.mxu0 %v7183_v54  ;;  %3805 = vmatprep.mubr.bf16.mxu1 %v7317_v50  ;;  %v2648_v54 = vld [vmem:[#allocation3 + $0xc9] sm:$0xff]  ;;  %v2647_v50 = vld [vmem:[#allocation3 + $0xc1] sm:$0xff] }
 0x2b0   : > { %3958 = vmatprep.mubr.bf16.mxu0 %v2733_v48  ;;  %5587 = vmatpush3.bf16.msra.mxu1 %v5773_v3  ;;  %v2760_v41 = vpack.c.bf16 %v2648_v54, %v2647_v50  ;;  %v2660_v50 = vld [vmem:[#allocation3 + $0x159] sm:$0xff] }
 0x2b1   : > { %5588 = vmatprep.subr.bf16.mxu1 %v5774_v49 }
 0x2b4   : > { %5589 = vmatpush3.bf16.msra.mxu1 %v5774_v49 }
 0x2b6   : > { %3806 = vmatmul.mubr.bf16.gmra.mxu1 %v2733_v48 }
 0x2b7   : > { %3959 = vmatmul.mubr.bf16.gmra.mxu0 %v7244_v11  ;;  %3813 = vmatprep.mubr.bf16.mxu1 %v7336_v17  ;;  %v2650_v11 = vld [vmem:[#allocation3 + $0xe1] sm:$0xff]  ;;  %v2649_v17 = vld [vmem:[#allocation3 + $0xd9] sm:$0xff] }
 0x2b8   : > { %3966 = vmatprep.mubr.bf16.mxu0 %v2742_v32  ;;  %v2769_v61 = vpack.c.bf16 %v2650_v11, %v2649_v17 }
 0x2be   : > { %3814 = vmatmul.mubr.bf16.gmra.mxu1 %v2742_v32 }
 0x2bf   : > { %3967 = vmatmul.mubr.bf16.gmra.mxu0 %v7288_v28  ;;  %3821 = vmatprep.mubr.bf16.mxu1 %v7346_v42  ;;  %v2652_v28 = vld [vmem:[#allocation3 + $0xf9] sm:$0xff]  ;;  %v2651_v42 = vld [vmem:[#allocation3 + $0xf1] sm:$0xff] }
 0x2c0   : > { %3974 = vmatprep.mubr.bf16.mxu0 %v2751_v19  ;;  %v2778_v45 = vpack.c.bf16 %v2652_v28, %v2651_v42  ;;  %v2659_v28 = vld [vmem:[#allocation3 + $0x151] sm:$0xff] }
 0x2c6   : > { %3822 = vmatmul.mubr.bf16.gmra.mxu1 %v2751_v19 }
 0x2c7   : > { %3975 = vmatmul.mubr.bf16.gmra.mxu0 %v7320_v18  ;;  %3829 = vmatprep.mubr.bf16.mxu1 %v7358_v59  ;;  %v5073_v18 = vpop.f32.mrf.mxu1  ;;  %v2654_v59 = vld [vmem:[#allocation3 + $0x111] sm:$0xff] }
 0x2c8   : > { %3982 = vmatprep.mubr.bf16.mxu0 %v2760_v41  ;;  %v2787_v35 = vpack.c.bf16 %v2654_v59, %v2653_v31 }
 0x2c9   : > { %v5074_v29 = vpop.f32.mrf.mxu1 }
 0x2ca   : > { %v5075_v15 = vadd.f32 %v5074_v29, %v5073_v18 }
 0x2ce   : > { %3830 = vmatmul.mubr.bf16.gmra.mxu1 %v2760_v41 }
 0x2cf   : > { %3983 = vmatmul.mubr.bf16.gmra.mxu0 %v7339_v22  ;;  %3837 = vmatprep.mubr.bf16.mxu1 %v7368_v57 }
 0x2d0   : > { %3990 = vmatprep.mubr.bf16.mxu0 %v2769_v61 }
 0x2d6   : > { %3838 = vmatmul.mubr.bf16.gmra.mxu1 %v2769_v61 }
 0x2d7   : > { %3991 = vmatmul.mubr.bf16.gmra.mxu0 %v7349_v55  ;;  %3845 = vmatprep.mubr.bf16.mxu1 %v7378_v0 }
 0x2d8   : > { %3998 = vmatprep.mubr.bf16.mxu0 %v2778_v45 }
 0x2de   : > { %v5076_v7 = vpop.f32.mrf.mxu1  ;;  %3846 = vmatmul.mubr.bf16.gmra.mxu1 %v2778_v45 }
 0x2df   : > { %v5182_v22 = vpop.f32.mrf.mxu0  ;;  %3999 = vmatmul.mubr.bf16.gmra.mxu0 %v7361_v60  ;;  %3853 = vmatprep.mubr.bf16.mxu1 %v7388_v21  ;;  %v2796_v21 = vpack.c.bf16 %v2656_v37, %v2655_v56 }
 0x2e0   : > { %4006 = vmatprep.mubr.bf16.mxu0 %v2787_v35  ;;  %v5077_v57 = vpop.f32.mrf.mxu1 }
 0x2e1   : > { %v5078_v24 = vadd.f32 %v5077_v57, %v5076_v7  ;;  %v5183_v1 = vpop.f32.mrf.mxu0  ;;  %v2662_v57 = vld [vmem:[#allocation3 + $0x171] sm:$0xff] }
 0x2e2   : > { %v5184_v55 = vadd.f32 %v5183_v1, %v5182_v22  ;;  %v5079_v23 = vpop.f32.mrf.mxu1 }
 0x2e3   : > { %v5185_v0 = vpop.f32.mrf.mxu0 }
 0x2e4   : > { %v7471_v52 = vadd.f32 %v5184_v55, %v7356_v47  ;;  %v5080_v36 = vpop.f32.mrf.mxu1 }
 0x2e5   : > { %v5081_v46 = vadd.f32 %v5080_v36, %v5079_v23  ;;  %v5186_v33 = vpop.f32.mrf.mxu0 }
 0x2e6   : > { %v5187_v13 = vadd.f32 %v5186_v33, %v5185_v0  ;;  %v5082_v60 = vpop.f32.mrf.mxu1  ;;  %3854 = vmatmul.mubr.bf16.gmra.mxu1 %v2787_v35  ;;  %v2661_v0 = vld [vmem:[#allocation3 + $0x169] sm:$0xff] }
 0x2e7   : > { %v5188_v2 = vpop.f32.mrf.mxu0  ;;  %4007 = vmatmul.mubr.bf16.gmra.mxu0 %v7371_v9  ;;  %3861 = vmatprep.mubr.bf16.mxu1 %v7398_v25  ;;  %v2805_v25 = vpack.c.bf16 %v2658_v39, %v2657_v14 }
 0x2e8   : > { %v7475_v53 = vadd.f32 %v5187_v13, %v5075_v15  ;;  %4014 = vmatprep.mubr.bf16.mxu0 %v2796_v21  ;;  %v5083_v8 = vpop.f32.mrf.mxu1 }
 0x2e9   : > { %v5084_v47 = vadd.f32 %v5083_v8, %v5082_v60  ;;  %v5189_v4 = vpop.f32.mrf.mxu0 }
 0x2ea   : > { %v5190_v44 = vadd.f32 %v5189_v4, %v5188_v2  ;;  %v5085_v51 = vpop.f32.mrf.mxu1  ;;  %v2601_v2 = vld [vmem:[#allocation3 + $0x18a] sm:$0xff] }
 0x2eb   : > { %v5191_v6 = vpop.f32.mrf.mxu0 }
 0x2ec   : > { %v7477_v30 = vadd.f32 %v5190_v44, %v5078_v24  ;;  %v5086_v16 = vpop.f32.mrf.mxu1 }
 0x2ed   : > { %v5087_v3 = vadd.f32 %v5086_v16, %v5085_v51  ;;  %v5192_v10 = vpop.f32.mrf.mxu0 }
 0x2ee   : > { %v5193_v49 = vadd.f32 %v5192_v10, %v5191_v6  ;;  %v5088_v9 = vpop.f32.mrf.mxu1  ;;  %3862 = vmatmul.mubr.bf16.gmra.mxu1 %v2796_v21  ;;  %v2600_v21 = vld [vmem:[#allocation3 + $0x182] sm:$0xff] }
 0x2ef   : > { %v5194_v48 = vpop.f32.mrf.mxu0  ;;  %4015 = vmatmul.mubr.bf16.gmra.mxu0 %v7381_v62  ;;  %3869 = vmatprep.mubr.bf16.mxu1 %v7408_v43  ;;  %v2814_v43 = vpack.c.bf16 %v2660_v50, %v2659_v28 }
 0x2f0   : > { %v7481_v38 = vadd.f32 %v5193_v49, %v5081_v46  ;;  %4022 = vmatprep.mubr.bf16.mxu0 %v2805_v25  ;;  %v5089_v5 = vpop.f32.mrf.mxu1 }
 0x2f1   : > { %v5090_v32 = vadd.f32 %v5089_v5, %v5088_v9  ;;  %v5195_v58 = vpop.f32.mrf.mxu0  ;;  %v2666_v5 = vld [vmem:[#allocation3 + $0x1a1] sm:$0xff] }
 0x2f2   : > { %v5196_v63 = vadd.f32 %v5195_v58, %v5194_v48  ;;  %v5091_v19 = vpop.f32.mrf.mxu1  ;;  %v2665_v48 = vld [vmem:[#allocation3 + $0x199] sm:$0xff] }
 0x2f3   : > { %v5197_v54 = vpop.f32.mrf.mxu0 }
 0x2f4   : > { %v7483_v41 = vadd.f32 %v5196_v63, %v5084_v47  ;;  %v5092_v11 = vpop.f32.mrf.mxu1  ;;  %v2664_v47 = vld [vmem:[#allocation3 + $0x189] sm:$0xff]  ;;  %v2667_v63 = vld [vmem:[#allocation3 + $0x32] sm:$0xff] }
 0x2f5   : > { %v5093_v17 = vadd.f32 %v5092_v11, %v5091_v19  ;;  %v5198_v61 = vpop.f32.mrf.mxu0  ;;  %v2668_v19 = vld [vmem:[#allocation3 + $0x3a] sm:$0xff] }
 0x2f6   : > { %v5199_v42 = vadd.f32 %v5198_v61, %v5197_v54  ;;  %v5094_v62 = vpop.f32.mrf.mxu1  ;;  %3870 = vmatmul.mubr.bf16.gmra.mxu1 %v2805_v25  ;;  %v2707_v28 = vpack.c.bf16 %v2668_v19, %v2667_v63 }
 0x2f7   : > { %v5200_v45 = vpop.f32.mrf.mxu0  ;;  %4023 = vmatmul.mubr.bf16.gmra.mxu0 %v7391_v20  ;;  %3877 = vmatprep.mubr.bf16.mxu1 %v7418_v40  ;;  %v2823_v40 = vpack.c.bf16 %v2662_v57, %v2661_v0  ;;  %v5776_v0 = vld [vmem:[#allocation2] sm:$0xff] }
 0x2f8   : > { %v7487_v18 = vadd.f32 %v5199_v42, %v5087_v3  ;;  %4030 = vmatprep.mubr.bf16.mxu0 %v2814_v43  ;;  %v5095_v59 = vpop.f32.mrf.mxu1 }
 0x2f9   : > { %v5096_v29 = vadd.f32 %v5095_v59, %v5094_v62  ;;  %v5201_v31 = vpop.f32.mrf.mxu0 }
 0x2fa   : > { %v5202_v7 = vadd.f32 %v5201_v31, %v5200_v45  ;;  %v5097_v35 = vpop.f32.mrf.mxu1 }
 0x2fb   : > { %v5203_v22 = vpop.f32.mrf.mxu0 }
 0x2fc   : > { %v7489_v24 = vadd.f32 %v5202_v7, %v5090_v32  ;;  %v5098_v1 = vpop.f32.mrf.mxu1  ;;  %v2669_v7 = vld [vmem:[#allocation3 + $0x4a] sm:$0xff] }
 0x2fd   : > { %v5099_v55 = vadd.f32 %v5098_v1, %v5097_v35  ;;  %v5204_v23 = vpop.f32.mrf.mxu0  ;;  %v2670_v35 = vld [vmem:[#allocation3 + $0x52] sm:$0xff]  ;;  %v2671_v1 = vld [vmem:[#allocation3 + $0x62] sm:$0xff] }
 0x2fe   : > { %v5205_v37 = vadd.f32 %v5204_v23, %v5203_v22  ;;  %v5100_v20 = vpop.f32.mrf.mxu1  ;;  %3878 = vmatmul.mubr.bf16.gmra.mxu1 %v2814_v43 }
 0x2ff   : > { %v5206_v36 = vpop.f32.mrf.mxu0  ;;  %4031 = vmatmul.mubr.bf16.gmra.mxu0 %v7401_v27  ;;  %3885 = vmatprep.mubr.bf16.mxu1 %v7426_v12  ;;  %v7497_v27 = vpack.c.bf16 %v2601_v2, %v2600_v21  ;;  %v2663_v12 = vld [vmem:[#allocation3 + $0x181] sm:$0xff] }
 0x300   : > { %v7493_v46 = vadd.f32 %v5205_v37, %v5093_v17  ;;  %4038 = vmatprep.mubr.bf16.mxu0 %v2823_v40  ;;  %v5101_v33 = vpop.f32.mrf.mxu1  ;;  %v2832_v3 = vpack.c.bf16 %v2664_v47, %v2663_v12  ;;  %v2841_v17 = vpack.c.bf16 %v2666_v5, %v2665_v48  ;;  %v2840_v37 = vpack.c.bf16 %v5776_v0, %v5776_v0 }
 0x301   : > { %v5102_v56 = vadd.f32 %v5101_v33, %v5100_v20  ;;  %v5207_v15 = vpop.f32.mrf.mxu0 }
 0x302   : > { %v5208_v13 = vadd.f32 %v5207_v15, %v5206_v36  ;;  %v5103_v60 = vpop.f32.mrf.mxu1 }
 0x303   : > { %v5209_v8 = vpop.f32.mrf.mxu0 }
 0x304   : > { %v7495_v4 = vadd.f32 %v5208_v13, %v5096_v29  ;;  %v5104_v44 = vpop.f32.mrf.mxu1 }
 0x305   : > { %v5105_v51 = vadd.f32 %v5104_v44, %v5103_v60  ;;  %v5210_v6 = vpop.f32.mrf.mxu0  ;;  %v2673_v44 = vld [vmem:[#allocation3 + $0x7a] sm:$0xff] }
 0x306   : > { %v5211_v39 = vadd.f32 %v5210_v6, %v5209_v8  ;;  %v5106_v16 = vpop.f32.mrf.mxu1  ;;  %3886 = vmatmul.mubr.bf16.gmra.mxu1 %v2823_v40 }
 0x307   : > { %v5212_v10 = vpop.f32.mrf.mxu0  ;;  %4039 = vmatmul.mubr.bf16.gmra.mxu0 %v7411_v34  ;;  %3893 = vmatprep.mubr.bf16.mxu1 %v7497_v27 }
 0x308   : > { %v7501_v14 = vadd.f32 %v5211_v39, %v5099_v55  ;;  %4046 = vmatprep.mubr.bf16.mxu0 %v2832_v3  ;;  %v5107_v49 = vpop.f32.mrf.mxu1  ;;  %v2672_v55 = vld [vmem:[#allocation3 + $0x6a] sm:$0xff]  ;;  %v2675_v39 = vld [vmem:[#allocation3 + $0x92] sm:$0xff] }
 0x309   : > { %v5108_v9 = vadd.f32 %v5107_v49, %v5106_v16  ;;  %v5213_v25 = vpop.f32.mrf.mxu0  ;;  %v2676_v16 = vld [vmem:[#allocation3 + $0x9a] sm:$0xff] }
 0x30a   : > { %v5214_v32 = vadd.f32 %v5213_v25, %v5212_v10  ;;  %v5109_v58 = vpop.f32.mrf.mxu1  ;;  %v2743_v5 = vpack.c.bf16 %v2676_v16, %v2675_v39 }
 0x30b   : > { %v5215_v54 = vpop.f32.mrf.mxu0 }
 0x30c   : > { %v7503_v50 = vadd.f32 %v5214_v32, %v5102_v56  ;;  %v5110_v11 = vpop.f32.mrf.mxu1  ;;  %v2725_v56 = vpack.c.bf16 %v2672_v55, %v2671_v1 }
 0x30d   : > { %v5111_v34 = vadd.f32 %v5110_v11, %v5109_v58  ;;  %v5216_v61 = vpop.f32.mrf.mxu0 }
 0x30e   : > { %v5217_v42 = vadd.f32 %v5216_v61, %v5215_v54  ;;  %v5112_v62 = vpop.f32.mrf.mxu1  ;;  %3894 = vmatmul.mubr.bf16.gmra.mxu1 %v2832_v3  ;;  %v2678_v61 = vld [vmem:[#allocation3 + $0xb2] sm:$0xff] }
 0x30f   : > { %v5218_v43 = vpop.f32.mrf.mxu0  ;;  %4047 = vmatmul.mubr.bf16.gmra.mxu0 %v7421_v26  ;;  %5590 = vmatprep.mubr.bf16.mxu1 %v2707_v28  ;;  %v2716_v26 = vpack.c.bf16 %v2670_v35, %v2669_v7 }
 0x310   : > { %v7506_v45 = vadd.f32 %v5217_v42, %v5105_v51  ;;  %v5113_v59 = vpop.f32.mrf.mxu1  ;;  %4054 = vmatprep.mubr.bf16.mxu0 %v2841_v17  ;;  %v2674_v51 = vld [vmem:[#allocation3 + $0x82] sm:$0xff] }
 0x311   : > { %v5114_v29 = vadd.f32 %v5113_v59, %v5112_v62  ;;  %v5219_v31 = vpop.f32.mrf.mxu0  ;;  %v2679_v62 = vld [vmem:[#allocation3 + $0xc2] sm:$0xff] }
 0x312   : > { %v5220_v22 = vadd.f32 %v5219_v31, %v5218_v43  ;;  %v5115_v57 = vpop.f32.mrf.mxu1  ;;  %v2680_v43 = vld [vmem:[#allocation3 + $0xca] sm:$0xff] }
 0x313   : > { %v5221_v23 = vpop.f32.mrf.mxu0 }
 0x314   : > { %v7508_v20 = vadd.f32 %v5220_v22, %v5108_v9  ;;  %v5116_v40 = vpop.f32.mrf.mxu1  ;;  %v2734_v9 = vpack.c.bf16 %v2674_v51, %v2673_v44 }
 0x315   : > { %v5117_v36 = vadd.f32 %v5116_v40, %v5115_v57  ;;  %v5222_v33 = vpop.f32.mrf.mxu0  ;;  %v2761_v57 = vpack.c.bf16 %v2680_v43, %v2679_v62 }
 0x316   : > { %v5223_v15 = vadd.f32 %v5222_v33, %v5221_v23  ;;  %v5118_v13 = vpop.f32.mrf.mxu1  ;;  %5591 = vmatmul.mubr.bf16.vlgmr.msra.gmra.mxu1 %v2716_v26  ;;  %v2682_v33 = vld [vmem:[#allocation3 + $0xe2] sm:$0xff] }
 0x317   : > { %v5224_v60 = vpop.f32.mrf.mxu0  ;;  %4055 = vmatmul.mubr.bf16.gmra.mxu0 %v2840_v37  ;;  %5594 = vmatprep.mubr.bf16.mxu1 %v2725_v56 }
 0x318   : > { %v7510_v21 = vadd.f32 %v5223_v15, %v5111_v34  ;;  %v5119_v2 = vpop.f32.mrf.mxu1  ;;  %v2677_v34 = vld [vmem:[#allocation3 + $0xaa] sm:$0xff] }
 0x319   : > { %v5120_v8 = vadd.f32 %v5119_v2, %v5118_v13  ;;  %v5225_v47 = vpop.f32.mrf.mxu0  ;;  %v2752_v7 = vpack.c.bf16 %v2678_v61, %v2677_v34  ;;  %v2683_v13 = vld [vmem:[#allocation3 + $0xf2] sm:$0xff] }
 0x31a   : > { %v5226_v6 = vadd.f32 %v5225_v47, %v5224_v60  ;;  %v5121_v12 = vpop.f32.mrf.mxu1  ;;  %v2684_v60 = vld [vmem:[#allocation3 + $0xfa] sm:$0xff] }
 0x31b   : > { %v5227_v3 = vpop.f32.mrf.mxu0 }
 0x31c   : > { %v7512_v10 = vadd.f32 %v5226_v6, %v5114_v29  ;;  %v5122_v49 = vpop.f32.mrf.mxu1 }
 0x31d   : > { %v5123_v25 = vadd.f32 %v5122_v49, %v5121_v12  ;;  %v5228_v48 = vpop.f32.mrf.mxu0  ;;  %v2779_v12 = vpack.c.bf16 %v2684_v60, %v2683_v13 }
 0x31e   : > { %v5229_v32 = vadd.f32 %v5228_v48, %v5227_v3  ;;  %v5124_v58 = vpop.f32.mrf.mxu1  ;;  %5595 = vmatmul.mubr.bf16.gmra.mxu1 %v2734_v9 }
 0x31f   : > { %v5230_v63 = vpop.f32.mrf.mxu0  ;;  %5598 = vmatprep.mubr.bf16.mxu1 %v2743_v5  ;;  %v2685_v5 = vld [vmem:[#allocation3 + $0x10a] sm:$0xff] }
 0x320   : > { %v7514_v19 = vadd.f32 %v5229_v32, %v5117_v36  ;;  %v5125_v54 = vpop.f32.mrf.mxu1  ;;  %v2681_v36 = vld [vmem:[#allocation3 + $0xda] sm:$0xff]  ;;  %v2686_v32 = vld [vmem:[#allocation3 + $0x112] sm:$0xff] }
 0x321   : > { %v5126_v11 = vadd.f32 %v5125_v54, %v5124_v58  ;;  %v5231_v17 = vpop.f32.mrf.mxu0  ;;  %v2770_v44 = vpack.c.bf16 %v2682_v33, %v2681_v36  ;;  %v2687_v54 = vld [vmem:[#allocation3 + $0x122] sm:$0xff]  ;;  %v2692_v36 = vld [vmem:[#allocation3 + $0x15a] sm:$0xff] }
 0x322   : > { %v5232_v28 = vadd.f32 %v5231_v17, %v5230_v63  ;;  %v5127_v42 = vpop.f32.mrf.mxu1 }
 0x323   : > { %v5233_v59 = vpop.f32.mrf.mxu0 }
 0x324   : > { %v7516_v29 = vadd.f32 %v5232_v28, %v5120_v8  ;;  %v5128_v31 = vpop.f32.mrf.mxu1  ;;  %v2788_v28 = vpack.c.bf16 %v2686_v32, %v2685_v5 }
 0x325   : > { %v5129_v35 = vadd.f32 %v5128_v31, %v5127_v42  ;;  %v5234_v22 = vpop.f32.mrf.mxu0 }
 0x326   : > { %v5235_v1 = vadd.f32 %v5234_v22, %v5233_v59  ;;  %v5130_v55 = vpop.f32.mrf.mxu1  ;;  %5599 = vmatmul.mubr.bf16.gmra.mxu1 %v2752_v7 }
 0x327   : > { %v5236_v23 = vpop.f32.mrf.mxu0  ;;  %5602 = vmatprep.mubr.bf16.mxu1 %v2761_v57 }
 0x328   : > { %v7518_v0 = vadd.f32 %v5235_v1, %v5123_v25  ;;  %v5131_v37 = vpop.f32.mrf.mxu1 }
 0x329   : > { %v5132_v40 = vadd.f32 %v5131_v37, %v5130_v55  ;;  %v5237_v26 = vpop.f32.mrf.mxu0  ;;  %v2689_v55 = vld [vmem:[#allocation3 + $0x13a] sm:$0xff] }
 0x32a   : > { %v5238_v56 = vadd.f32 %v5237_v26, %v5236_v23  ;;  %v5133_v15 = vpop.f32.mrf.mxu1  ;;  %v2690_v23 = vld [vmem:[#allocation3 + $0x142] sm:$0xff]  ;;  %v2691_v26 = vld [vmem:[#allocation3 + $0x152] sm:$0xff] }
 0x32b   : > { %v5239_v2 = vpop.f32.mrf.mxu0  ;;  %v2806_v13 = vpack.c.bf16 %v2690_v23, %v2689_v55 }
 0x32c   : > { %v7520_v8 = vadd.f32 %v5238_v56, %v5126_v11  ;;  %v5134_v47 = vpop.f32.mrf.mxu1  ;;  %v2688_v11 = vld [vmem:[#allocation3 + $0x12a] sm:$0xff] }
 0x32d   : > { %v5135_v51 = vadd.f32 %v5134_v47, %v5133_v15  ;;  %v5240_v6 = vpop.f32.mrf.mxu0  ;;  %v2797_v43 = vpack.c.bf16 %v2688_v11, %v2687_v54  ;;  %v2815_v47 = vpack.c.bf16 %v2692_v36, %v2691_v26 }
 0x32e   : > { %v5241_v39 = vadd.f32 %v5240_v6, %v5239_v2  ;;  %v5136_v16 = vpop.f32.mrf.mxu1  ;;  %5603 = vmatmul.mubr.bf16.gmra.mxu1 %v2770_v44 }
 0x32f   : > { %v5242_v3 = vpop.f32.mrf.mxu0  ;;  %5606 = vmatprep.mubr.bf16.mxu1 %v2779_v12 }
 0x330   : > { %v7522_v49 = vadd.f32 %v5241_v39, %v5129_v35  ;;  %v5137_v9 = vpop.f32.mrf.mxu1 }
 0x331   : > { %v5138_v25 = vadd.f32 %v5137_v9, %v5136_v16  ;;  %v5243_v48 = vpop.f32.mrf.mxu0  ;;  %v2693_v9 = vld [vmem:[#allocation3 + $0x16a] sm:$0xff] }
 0x332   : > { %v5244_v58 = vadd.f32 %v5243_v48, %v5242_v3  ;;  %v5139_v63 = vpop.f32.mrf.mxu1  ;;  %v2694_v48 = vld [vmem:[#allocation3 + $0x172] sm:$0xff] }
 0x333   : > { %v5245_v17 = vpop.f32.mrf.mxu0  ;;  %v2824_v54 = vpack.c.bf16 %v2694_v48, %v2693_v9 }
 0x334   : > { %v7524_v34 = vadd.f32 %v5244_v58, %v5132_v40  ;;  %v5140_v61 = vpop.f32.mrf.mxu1 }
 0x335   : > { %v5141_v42 = vadd.f32 %v5140_v61, %v5139_v63  ;;  %v5246_v62 = vpop.f32.mrf.mxu0 }
 0x336   : > { %v5247_v59 = vadd.f32 %v5246_v62, %v5245_v17  ;;  %v5142_v31 = vpop.f32.mrf.mxu1  ;;  %5607 = vmatmul.mubr.bf16.gmra.mxu1 %v2788_v28 }
 0x337   : > { %v5248_v7 = vpop.f32.mrf.mxu0  ;;  %5610 = vmatprep.mubr.bf16.mxu1 %v2797_v43  ;;  %v2698_v43 = vld [vmem:[#allocation3 + $0x1a2] sm:$0xff] }
 0x338   : > { %v7526_v35 = vadd.f32 %v5247_v59, %v5135_v51  ;;  %v5143_v22 = vpop.f32.mrf.mxu1 }
 0x339   : > { %v5144_v57 = vadd.f32 %v5143_v22, %v5142_v31  ;;  %v5249_v1 = vpop.f32.mrf.mxu0 }
 0x33a   : > { %v5250_v37 = vadd.f32 %v5249_v1, %v5248_v7  ;;  %v5145_v40 = vpop.f32.mrf.mxu1 }
 0x33b   : > { %v5251_v33 = vpop.f32.mrf.mxu0 }
 0x33c   : > { %v7528_v56 = vadd.f32 %v5250_v37, %v5138_v25  ;;  %v5146_v15 = vpop.f32.mrf.mxu1 }
 0x33d   : > { %v5147_v60 = vadd.f32 %v5146_v15, %v5145_v40  ;;  %v5252_v2 = vpop.f32.mrf.mxu0 }
 0x33e   : > { %v5253_v44 = vadd.f32 %v5252_v2, %v5251_v33  ;;  %v5148_v51 = vpop.f32.mrf.mxu1  ;;  %5611 = vmatmul.mubr.bf16.gmra.mxu1 %v2806_v13 }
 0x33f   : > { %v5254_v6 = vpop.f32.mrf.mxu0  ;;  %5614 = vmatprep.mubr.bf16.mxu1 %v2815_v47 }
 0x340   : > { %v7530_v12 = vadd.f32 %v5253_v44, %v5141_v42  ;;  %v5149_v39 = vpop.f32.mrf.mxu1  ;;  %v2697_v42 = vld [vmem:[#allocation3 + $0x19a] sm:$0xff] }
 0x341   : > { %v5150_v16 = vadd.f32 %v5149_v39, %v5148_v51  ;;  %v5255_v3 = vpop.f32.mrf.mxu0  ;;  %v2842_v55 = vpack.c.bf16 %v2698_v43, %v2697_v42 }
 0x342   : > { %v5256_v5 = vadd.f32 %v5255_v3, %v5254_v6  ;;  %v5151_v25 = vpop.f32.mrf.mxu1 }
 0x343   : > { %v5257_v32 = vpop.f32.mrf.mxu0 }
 0x344   : > { %v7532_v58 = vadd.f32 %v5256_v5, %v5144_v57  ;;  %v5152_v63 = vpop.f32.mrf.mxu1 }
 0x345   : > { %v5153_v11 = vadd.f32 %v5152_v63, %v5151_v25  ;;  %v5258_v17 = vpop.f32.mrf.mxu0 }
 0x346   : > { %v5259_v61 = vadd.f32 %v5258_v17, %v5257_v32  ;;  %v5154_v28 = vpop.f32.mrf.mxu1  ;;  %5615 = vmatmul.mubr.bf16.gmra.mxu1 %v2824_v54 }
 0x347   : > { %v5260_v62 = vpop.f32.mrf.mxu0  ;;  %5618 = vmatprep.mubr.bf16.mxu1 %v7497_v27 }
 0x348   : > { %v7535_v59 = vadd.f32 %v5259_v61, %v5147_v60  ;;  %v5155_v31 = vpop.f32.mrf.mxu1 }
 0x349   : > { %v5156_v7 = vadd.f32 %v5155_v31, %v5154_v28  ;;  %v5261_v22 = vpop.f32.mrf.mxu0 }
 0x34a   : > { %v5262_v1 = vadd.f32 %v5261_v22, %v5260_v62  ;;  %v5157_v57 = vpop.f32.mrf.mxu1 }
 0x34b   : > { %v5263_v23 = vpop.f32.mrf.mxu0 }
 0x34c   : > { %v7537_v37 = vadd.f32 %v5262_v1, %v5150_v16  ;;  %v5158_v40 = vpop.f32.mrf.mxu1 }
 0x34d   : > { %v5159_v26 = vadd.f32 %v5158_v40, %v5157_v57  ;;  %v5264_v36 = vpop.f32.mrf.mxu0 }
 0x34e   : > { %v5265_v33 = vadd.f32 %v5264_v36, %v5263_v23  ;;  %v5160_v15 = vpop.f32.mrf.mxu1  ;;  %5619 = vmatmul.mubr.bf16.gmra.mxu1 %v2842_v55 }
 0x34f   : > { %v5266_v27 = vpop.f32.mrf.mxu0 }
 0x350   : > { %v7539_v13 = vadd.f32 %v5265_v33, %v5153_v11  ;;  %v5161_v60 = vpop.f32.mrf.mxu1 }
 0x351   : > { %v5162_v2 = vadd.f32 %v5161_v60, %v5160_v15  ;;  %v5267_v47 = vpop.f32.mrf.mxu0 }
 0x352   : > { %v5268_v44 = vadd.f32 %v5267_v47, %v5266_v27  ;;  %v5163_v51 = vpop.f32.mrf.mxu1 }
 0x353   : > { %v5269_v6 = vpop.f32.mrf.mxu0 }
 0x354   : > { %v7541_v39 = vadd.f32 %v5268_v44, %v5156_v7  ;;  %v5164_v3 = vpop.f32.mrf.mxu1 }
 0x355   : > { %v5165_v16 = vadd.f32 %v5164_v3, %v5163_v51  ;;  %v5270_v9 = vpop.f32.mrf.mxu0 }
 0x356   : > { %v5271_v48 = vadd.f32 %v5270_v9, %v5269_v6  ;;  %v5294_v5 = vpop.f32.mrf.mxu1 }
 0x357   : > { %v5272_v25 = vpop.f32.mrf.mxu0 }
 0x358   : > { %v7543_v32 = vadd.f32 %v5271_v48, %v5159_v26  ;;  %v5295_v63 = vpop.f32.mrf.mxu1 }
 0x359   : > { %v5273_v54 = vpop.f32.mrf.mxu0  ;;  %v5296_v11 = vadd.f32 %v5295_v63, %v5294_v5 }
 0x35a   : > { %v5274_v17 = vadd.f32 %v5273_v54, %v5272_v25  ;;  %v5297_v61 = vpop.f32.mrf.mxu1 }
 0x35b   : > { %v3776_v28 = vadd.f32 %v5296_v11, %v7471_v52  ;;  %v5275_v62 = vpop.f32.mrf.mxu0 }
 0x35c   : > { %v7546_v42 = vadd.f32 %v5274_v17, %v5162_v2  ;;  %v5298_v43 = vpop.f32.mrf.mxu1 }
 0x35d   : > { %v5276_v31 = vpop.f32.mrf.mxu0  ;;  %v5299_v7 = vadd.f32 %v5298_v43, %v5297_v61 }
 0x35e   : > { %8033 = vst [vmem:[#allocation9_spill] sm:$0xff] %v7546_v42  ;;  %v5277_v22 = vadd.f32 %v5276_v31, %v5275_v62  ;;  %v5300_v1 = vpop.f32.mrf.mxu1 }
 0x35f   : > { %v3779_v57 = vadd.f32 %v5299_v7, %v7475_v53  ;;  %v5406_v55 = vpop.f32.mrf.mxu0 }
 0x360   : > { %v7549_v23 = vadd.f32 %v5277_v22, %v5165_v16  ;;  %v5301_v40 = vpop.f32.mrf.mxu1 }
 0x361   : > { %v5302_v26 = vadd.f32 %v5301_v40, %v5300_v1  ;;  %v5407_v36 = vpop.f32.mrf.mxu0 }
 0x362   : > { %8034 = vst [vmem:[#allocation6_spill] sm:$0xff] %v7549_v23  ;;  %v5408_v33 = vadd.f32 %v5407_v36, %v5406_v55  ;;  %v5303_v15 = vpop.f32.mrf.mxu1 }
 0x363   : > { %v7552_v52 = vadd.f32 %v5302_v26, %v7477_v30  ;;  %v5409_v27 = vpop.f32.mrf.mxu0 }
 0x364   : > { %v5304_v60 = vpop.f32.mrf.mxu1  ;;  %v7554_v2 = vadd.f32 %v5408_v33, %v3776_v28 }
 0x365   : > { %v5305_v47 = vadd.f32 %v5304_v60, %v5303_v15  ;;  %v5410_v44 = vpop.f32.mrf.mxu0 }
 0x366   : > { %v5411_v51 = vadd.f32 %v5410_v44, %v5409_v27  ;;  %v5306_v6 = vpop.f32.mrf.mxu1 }
 0x367   : > { %v7557_v53 = vadd.f32 %v5305_v47, %v7481_v38  ;;  %v7559_v3 = vpop.f32.mrf.mxu0 }
 0x368   : > { %v5307_v16 = vpop.f32.mrf.mxu1  ;;  %v7561_v9 = vadd.f32 %v5411_v51, %v3779_v57 }
 0x369   : > { %v5308_v48 = vadd.f32 %v5307_v16, %v5306_v6  ;;  %v7563_v5 = vpop.f32.mrf.mxu0 }
 0x36a   : > { %v5309_v30 = vpop.f32.mrf.mxu1 }
 0x36b   : > { %v7566_v25 = vadd.f32 %v5308_v48, %v7483_v41  ;;  %v7568_v63 = vpop.f32.mrf.mxu0 }
 0x36c   : > { %v5310_v54 = vpop.f32.mrf.mxu1 }
 0x36d   : > { %v5311_v11 = vadd.f32 %v5310_v54, %v5309_v30  ;;  %v7570_v17 = vpop.f32.mrf.mxu0 }
 0x36e   : > { %v5312_v38 = vpop.f32.mrf.mxu1 }
 0x36f   : > { %v7573_v61 = vadd.f32 %v5311_v11, %v7487_v18  ;;  %v7575_v28 = vpop.f32.mrf.mxu0 }
 0x370   : > { %v5313_v62 = vpop.f32.mrf.mxu1 }
 0x371   : > { %v5314_v43 = vadd.f32 %v5313_v62, %v5312_v38  ;;  %v7577_v31 = vpop.f32.mrf.mxu0 }
 0x372   : > { %v5315_v7 = vpop.f32.mrf.mxu1 }
 0x373   : > { %v7580_v41 = vadd.f32 %v5314_v43, %v7489_v24  ;;  %v7582_v22 = vpop.f32.mrf.mxu0 }
 0x374   : > { %v5316_v1 = vpop.f32.mrf.mxu1 }
 0x375   : > { %v5317_v57 = vadd.f32 %v5316_v1, %v5315_v7  ;;  %v7584_v55 = vpop.f32.mrf.mxu0 }
 0x376   : > { %v5318_v40 = vpop.f32.mrf.mxu1 }
 0x377   : > { %v7587_v18 = vadd.f32 %v5317_v57, %v7493_v46  ;;  %v7589_v26 = vpop.f32.mrf.mxu0 }
 0x378   : > { %v5319_v36 = vpop.f32.mrf.mxu1 }
 0x379   : > { %v5320_v33 = vadd.f32 %v5319_v36, %v5318_v40  ;;  %v7591_v15 = vpop.f32.mrf.mxu0 }
 0x37a   : > { %v5321_v27 = vpop.f32.mrf.mxu1 }
 0x37b   : > { %v7594_v24 = vadd.f32 %v5320_v33, %v7495_v4  ;;  %v7596_v60 = vpop.f32.mrf.mxu0 }
 0x37c   : > { %v5322_v47 = vpop.f32.mrf.mxu1 }
 0x37d   : > { %v5323_v44 = vadd.f32 %v5322_v47, %v5321_v27  ;;  %v7598_v51 = vpop.f32.mrf.mxu0 }
 0x37e   : > { %v5324_v6 = vpop.f32.mrf.mxu1 }
 0x37f   : > { %v7601_v46 = vadd.f32 %v5323_v44, %v7501_v14  ;;  %v7603_v16 = vpop.f32.mrf.mxu0 }
 0x380   : > { %v5325_v48 = vpop.f32.mrf.mxu1 }
 0x381   : > { %v5326_v30 = vadd.f32 %v5325_v48, %v5324_v6  ;;  %v7605_v54 = vpop.f32.mrf.mxu0 }
 0x382   : > { %v5327_v11 = vpop.f32.mrf.mxu1 }
 0x383   : > { %v7608_v4 = vadd.f32 %v5326_v30, %v7503_v50  ;;  %v7610_v38 = vpop.f32.mrf.mxu0 }
 0x384   : > { %v5328_v62 = vpop.f32.mrf.mxu1 }
 0x385   : > { %v5329_v43 = vadd.f32 %v5328_v62, %v5327_v11  ;;  %v7612_v7 = vpop.f32.mrf.mxu0 }
 0x386   : > { %v5330_v1 = vpop.f32.mrf.mxu1 }
 0x387   : > { %v7615_v14 = vadd.f32 %v5329_v43, %v7506_v45  ;;  %v7617_v57 = vpop.f32.mrf.mxu0 }
 0x388   : > { %v5331_v40 = vpop.f32.mrf.mxu1 }
 0x389   : > { %v5332_v36 = vadd.f32 %v5331_v40, %v5330_v1  ;;  %v7619_v33 = vpop.f32.mrf.mxu0 }
 0x38a   : > { %v5333_v27 = vpop.f32.mrf.mxu1 }
 0x38b   : > { %v7622_v50 = vadd.f32 %v5332_v36, %v7508_v20  ;;  %v7624_v47 = vpop.f32.mrf.mxu0 }
 0x38c   : > { %v5334_v44 = vpop.f32.mrf.mxu1 }
 0x38d   : > { %8035 = vst [vmem:[#allocation10_spill] sm:$0xff] %v7622_v50  ;;  %v5335_v6 = vadd.f32 %v5334_v44, %v5333_v27  ;;  %v7626_v48 = vpop.f32.mrf.mxu0 }
 0x38e   : > { %v5336_v30 = vpop.f32.mrf.mxu1 }
 0x38f   : > { %v7629_v45 = vadd.f32 %v5335_v6, %v7510_v21  ;;  %v7631_v11 = vpop.f32.mrf.mxu0 }
 0x390   : > { %v5337_v62 = vpop.f32.mrf.mxu1 }
 0x391   : > { %8036 = vst [vmem:[#allocation7_spill] sm:$0xff] %v7629_v45  ;;  %v5338_v43 = vadd.f32 %v5337_v62, %v5336_v30  ;;  %v7633_v1 = vpop.f32.mrf.mxu0 }
 0x392   : > { %v5339_v40 = vpop.f32.mrf.mxu1 }
 0x393   : > { %v7636_v20 = vadd.f32 %v5338_v43, %v7512_v10  ;;  %v7638_v36 = vpop.f32.mrf.mxu0 }
 0x394   : > { %8038 = vst [vmem:[#allocation11_spill] sm:$0xff] %v7638_v36  ;;  %v5340_v23 = vpop.f32.mrf.mxu1 }
 0x395   : > { %8037 = vst [vmem:[#allocation20_spill] sm:$0xff] %v7636_v20  ;;  %v5341_v27 = vadd.f32 %v5340_v23, %v5339_v40  ;;  %v7640_v44 = vpop.f32.mrf.mxu0 }
 0x396   : > { %8039 = vst [vmem:[#allocation13_spill] sm:$0xff] %v7640_v44  ;;  %v5342_v42 = vpop.f32.mrf.mxu1 }
 0x397   : > { %v7643_v21 = vadd.f32 %v5341_v27, %v7514_v19  ;;  %v7645_v6 = vpop.f32.mrf.mxu0 }
 0x398   : > { %v5343_v45 = vpop.f32.mrf.mxu1 }
 0x399   : > { %8040 = vst [vmem:[#allocation15_spill] sm:$0xff] %v7643_v21  ;;  %v5344_v30 = vadd.f32 %v5343_v45, %v5342_v42  ;;  %v7647_v62 = vpop.f32.mrf.mxu0 }
 0x39a   : > { %v5345_v50 = vpop.f32.mrf.mxu1 }
 0x39b   : > { %v7650_v10 = vadd.f32 %v5344_v30, %v7516_v29  ;;  %v7652_v43 = vpop.f32.mrf.mxu0 }
 0x39c   : > { %v5346_v36 = vpop.f32.mrf.mxu1 }
 0x39d   : > { %8041 = vst [vmem:[#allocation8_spill] sm:$0xff] %v7650_v10  ;;  %v5347_v23 = vadd.f32 %v5346_v36, %v5345_v50  ;;  %v7654_v40 = vpop.f32.mrf.mxu0 }
 0x39e   : > { %8042 = vst [vmem:[#allocation21_spill] sm:$0xff] %v7654_v40  ;;  %v5348_v44 = vpop.f32.mrf.mxu1 }
 0x39f   : > { %v7657_v19 = vadd.f32 %v5347_v23, %v7518_v0  ;;  %v7659_v27 = vpop.f32.mrf.mxu0 }
 0x3a0   : > { %v5349_v21 = vpop.f32.mrf.mxu1 }
 0x3a1   : > { %8043 = vst [vmem:[#allocation17_spill] sm:$0xff] %v7657_v19  ;;  %v5350_v42 = vadd.f32 %v5349_v21, %v5348_v44  ;;  %v7661_v45 = vpop.f32.mrf.mxu0 }
 0x3a2   : > { %8044 = vst [vmem:[#allocation16_spill] sm:$0xff] %v7661_v45  ;;  %v5351_v20 = vpop.f32.mrf.mxu1 }
 0x3a3   : > { %v7664_v29 = vadd.f32 %v5350_v42, %v7520_v8  ;;  %v7666_v30 = vpop.f32.mrf.mxu0 }
 0x3a4   : > { %8046 = vst [vmem:[#allocation12_spill] sm:$0xff] %v7666_v30  ;;  %v5352_v10 = vpop.f32.mrf.mxu1 }
 0x3a5   : > { %8045 = vst [vmem:[#allocation18_spill] sm:$0xff] %v7664_v29  ;;  %v5353_v50 = vadd.f32 %v5352_v10, %v5351_v20  ;;  %v7668_v36 = vpop.f32.mrf.mxu0 }
 0x3a6   : > { %8047 = vst [vmem:[#allocation19_spill] sm:$0xff] %v7668_v36  ;;  %v5354_v40 = vpop.f32.mrf.mxu1 }
 0x3a7   : > { %v7671_v0 = vadd.f32 %v5353_v50, %v7522_v49  ;;  %v7673_v23 = vpop.f32.mrf.mxu0 }
 0x3a8   : > { %v5355_v19 = vpop.f32.mrf.mxu1 }
 0x3a9   : > { %8048 = vst [vmem:[#allocation23_spill] sm:$0xff] %v7671_v0  ;;  %v5356_v44 = vadd.f32 %v5355_v19, %v5354_v40  ;;  %v7675_v21 = vpop.f32.mrf.mxu0 }
 0x3aa   : > { %v5357_v45 = vpop.f32.mrf.mxu1 }
 0x3ab   : > { %v7678_v8 = vadd.f32 %v5356_v44, %v7524_v34  ;;  %v7680_v42 = vpop.f32.mrf.mxu0 }
 0x3ac   : > { %v5358_v30 = vpop.f32.mrf.mxu1 }
 0x3ad   : > { %8049 = vst [vmem:[#allocation14_spill] sm:$0xff] %v7678_v8  ;;  %v5359_v20 = vadd.f32 %v5358_v30, %v5357_v45  ;;  %v7682_v10 = vpop.f32.mrf.mxu0 }
 0x3ae   : > { %8050 = vst [vmem:[#allocation26_spill] sm:$0xff] %v7682_v10  ;;  %v5360_v36 = vpop.f32.mrf.mxu1 }
 0x3af   : > { %v7685_v49 = vadd.f32 %v5359_v20, %v7526_v35  ;;  %v7687_v50 = vpop.f32.mrf.mxu0 }
 0x3b0   : > { %8052 = vst [vmem:[#allocation25_spill] sm:$0xff] %v7687_v50  ;;  %v5361_v0 = vpop.f32.mrf.mxu1 }
 0x3b1   : > { %8051 = vst [vmem:[#allocation22_spill] sm:$0xff] %v7685_v49  ;;  %v5362_v40 = vadd.f32 %v5361_v0, %v5360_v36  ;;  %v7689_v19 = vpop.f32.mrf.mxu0 }
 0x3b2   : > { %8053 = vst [vmem:[#allocation24_spill] sm:$0xff] %v7689_v19  ;;  %v5363_v29 = vpop.f32.mrf.mxu1 }
 0x3b3   : > { %v7692_v34 = vadd.f32 %v5362_v40, %v7528_v56  ;;  %v7694_v8 = vpop.f32.mrf.mxu0 }
 0x3b4   : > { %v5364_v44 = vpop.f32.mrf.mxu1  ;;  %8054 = vst [vmem:[#allocation27_spill] sm:$0xff] %v7694_v8 }
 0x3b5   : > { %v5365_v45 = vadd.f32 %v5364_v44, %v5363_v29  ;;  %v7699_v20 = vpop.f32.mrf.mxu0 }
 0x3b6   : > { %v5366_v30 = vpop.f32.mrf.mxu1 }
 0x3b7   : > { %v7697_v10 = vadd.f32 %v5365_v45, %v7530_v12  ;;  %v7704_v19 = vpop.f32.mrf.mxu0 }
 0x3b8   : > { %v5367_v35 = vpop.f32.mrf.mxu1 }
 0x3b9   : > { %8055 = vst [vmem:[#allocation4_spill] sm:$0xff] %v7697_v10  ;;  %v5368_v49 = vadd.f32 %v5367_v35, %v5366_v30  ;;  %v7709_v44 = vpop.f32.mrf.mxu0 }
 0x3ba   : > { %v5369_v50 = vpop.f32.mrf.mxu1 }
 0x3bb   : > { %v7702_v36 = vadd.f32 %v5368_v49, %v7532_v58  ;;  %v7714_v35 = vpop.f32.mrf.mxu0 }
 0x3bc   : > { %v5370_v0 = vpop.f32.mrf.mxu1 }
 0x3bd   : > { %8056 = vst [vmem:[#allocation31_spill] sm:$0xff] %v7702_v36  ;;  %v5371_v56 = vadd.f32 %v5370_v0, %v5369_v50  ;;  %v7719_v0 = vpop.f32.mrf.mxu0 }
 0x3be   : > { %v5372_v40 = vpop.f32.mrf.mxu1 }
 0x3bf   : > { %v7707_v8 = vadd.f32 %v5371_v56, %v7535_v59 }
 0x3c0   : > { %v5373_v29 = vpop.f32.mrf.mxu1 }
 0x3c1   : > { %8057 = vst [vmem:[#allocation32_spill] sm:$0xff] %v7707_v8  ;;  %v5374_v12 = vadd.f32 %v5373_v29, %v5372_v40  ;;  %v7724_v29 = vpop.f32.mrf.mxu0 }
 0x3c2   : > { %v5375_v45 = vpop.f32.mrf.mxu1 }
 0x3c3   : > { %v7712_v10 = vadd.f32 %v5374_v12, %v7537_v37 }
 0x3c4   : > { %v5376_v30 = vpop.f32.mrf.mxu1 }
 0x3c5   : > { %v5377_v58 = vadd.f32 %v5376_v30, %v5375_v45 }
 0x3c6   : > { %v5378_v49 = vpop.f32.mrf.mxu1 }
 0x3c7   : > { %v7717_v36 = vadd.f32 %v5377_v58, %v7539_v13  ;;  %v5414_v13 = vadd.f32 %v7563_v5, %v7559_v3  ;;  %v7735_v58 = vpop.f32.mrf.mxu0  ;;  %v7751_v3 = vld [vmem:[%s7972_s5] ss:$0 sm:$0xff] }
 0x3c8   : > { %v5379_v50 = vpop.f32.mrf.mxu1 }
 0x3c9   : > { %v5380_v59 = vadd.f32 %v5379_v50, %v5378_v49  ;;  %v5417_v50 = vadd.f32 %v7570_v17, %v7568_v63 }
 0x3ca   : > { %v5381_v56 = vpop.f32.mrf.mxu1 }
 0x3cb   : > { %v7722_v8 = vadd.f32 %v5380_v59, %v7541_v39  ;;  %v7743_v59 = vpop.f32.mrf.mxu0  ;;  %v3948_v17 = vadd.f32 %v5417_v50, %v7557_v53 }
 0x3cc   : > { %v5382_v40 = vpop.f32.mrf.mxu1 }
 0x3cd   : > { %8058 = vst [vmem:[#allocation28_spill] sm:$0xff] %v7722_v8  ;;  %v5383_v37 = vadd.f32 %v5382_v40, %v5381_v56  ;;  %v3945_v56 = vadd.f32 %v5414_v13, %v7552_v52  ;;  %v5420_v52 = vadd.f32 %v7577_v31, %v7575_v28 }
 0x3ce   : > { %v7726_v12 = vpop.f32.mrf.mxu1 }
 0x3cf   : > { %v7729_v45 = vadd.f32 %v5383_v37, %v7543_v32  ;;  %v5426_v37 = vadd.f32 %v7591_v15, %v7589_v26  ;;  %v7762_v26 = vld [vmem:[%s7973_s6] ss:$0 sm:$0xff] }
 0x3d0   : > { %v7731_v30 = vpop.f32.mrf.mxu1 }
 0x3d1   : > { %8059 = vst [vmem:[#allocation5_spill] sm:$0xff] %v7729_v45  ;;  %v7753_v45 = vpop.f32.mrf.mxu0  ;;  %v3961_v53 = vadd.f32 %v5426_v37, %v7580_v41 }
 0x3d2   : > { %v7737_v49 = vpop.f32.mrf.mxu1 }
 0x3d3   : > { %v7775_v28 = vpop.f32.mrf.mxu0 }
 0x3d4   : > { %v7739_v39 = vpop.f32.mrf.mxu1 }
 0x3d6   : > { %v5592_v32 = vpop.f32.mrf.mxu1 }
 0x3d7   : > { %v4106_v40 = vadd.f32 %v5592_v32, %v3945_v56 }
 0x3d8   : > { %v4097_v5 = vpop.f32.mrf.mxu1 }
 0x3d9   : > { %v4226_v8 = vmax.f32 %v4106_v40, 0.0  ;;  %v4098_v63 = vadd.f32 %v4097_v5, %v7554_v2  ;;  %v5429_v40 = vadd.f32 %v7598_v51, %v7596_v60  ;;  %v5423_v51 = vadd.f32 %v7584_v55, %v7582_v22 }
 0x3da   : > { %v5593_v15 = vpop.f32.mrf.mxu1 }
 0x3db   : > { %v4265_v13 = vmul.f32 %v7751_v3, %v4226_v8  ;;  %v4224_v56 = vmax.f32 %v4098_v63, 0.0  ;;  %v4109_v32 = vadd.f32 %v5593_v15, %v3948_v17  ;;  %v3953_v63 = vadd.f32 %v5420_v52, %v7566_v25 }
 0x3dc   : > { %v4100_v2 = vpop.f32.mrf.mxu1 }
 0x3dd   : > { %v4304_v31 = vadd.f32 %v7762_v26, %v4265_v13  ;;  %v4263_v8 = vmul.f32 %v7751_v3, %v4224_v56  ;;  %v4227_v50 = vmax.f32 %v4109_v32, 0.0  ;;  %v4101_v60 = vadd.f32 %v4100_v2, %v7561_v9  ;;  %v7789_v32 = vpop.f32.mrf.mxu0 }
 0x3de   : > { %v5596_v5 = vpop.f32.mrf.mxu1  ;;  %v5438_v13 = vadd.f32 %v7619_v33, %v7617_v57  ;;  %v3964_v9 = vadd.f32 %v5429_v40, %v7587_v18  ;;  %v5432_v2 = vadd.f32 %v7605_v54, %v7603_v16 }
 0x3df   : > { %4336 = vst [vmem:[%s7772_s28 + $0x10] sm:$0xff] %v4304_v31  ;;  %v4302_v17 = vadd.f32 %v7762_v26, %v4263_v8  ;;  %v4266_v41 = vmul.f32 %v7751_v3, %v4227_v50  ;;  %v4225_v37 = vmax.f32 %v4101_v60, 0.0  ;;  %v4122_v15 = vadd.f32 %v5596_v5, %v3961_v53  ;;  %v7803_v5 = vpop.f32.mrf.mxu0 }
 0x3e0   : > { %v4113_v56 = vpop.f32.mrf.mxu1  ;;  %v3956_v31 = vadd.f32 %v5423_v51, %v7573_v61  ;;  %v5441_v8 = vadd.f32 %v7626_v48, %v7624_v47  ;;  %v3977_v60 = vadd.f32 %v5438_v13, %v7608_v4 }
 0x3e1   : > { %4334 = vst [vmem:[%s7772_s28] sm:$0xff] %v4302_v17  ;;  %v4305_v22 = vadd.f32 %v7762_v26, %v4266_v41  ;;  %v4264_v25 = vmul.f32 %v7751_v3, %v4225_v37  ;;  %v4230_v55 = vmax.f32 %v4122_v15, 0.0  ;;  %v4114_v52 = vadd.f32 %v4113_v56, %v3953_v63 }
 0x3e2   : > { %v5597_v53 = vpop.f32.mrf.mxu1  ;;  %v5435_v63 = vadd.f32 %v7612_v7, %v7610_v38  ;;  %v3969_v41 = vadd.f32 %v5432_v2, %v7594_v24  ;;  %v5450_v15 = vadd.f32 %v7647_v62, %v7645_v6  ;;  %v3980_v56 = vadd.f32 %v5441_v8, %v7615_v14 }
 0x3e3   : > { %4337 = vst [vmem:[%s7772_s28 + $0x18] sm:$0xff] %v4305_v22  ;;  %v4303_v57 = vadd.f32 %v7762_v26, %v4264_v25  ;;  %v4269_v18 = vmul.f32 %v7751_v3, %v4230_v55  ;;  %v4228_v33 = vmax.f32 %v4114_v52, 0.0  ;;  %v4125_v40 = vadd.f32 %v5597_v53, %v3964_v9  ;;  %v7817_v9 = vpop.f32.mrf.mxu0  ;;  %v8060_v53 = vld [vmem:[#allocation21_spill] sm:$0xff] }
 0x3e4   : > { %v4116_v50 = vpop.f32.mrf.mxu1  ;;  %v5444_v25 = vadd.f32 %v7633_v1, %v7631_v11  ;;  %v3972_v52 = vadd.f32 %v5435_v63, %v7601_v46 }
 0x3e5   : > { %4335 = vst [vmem:[%s7772_s28 + $0x8] sm:$0xff] %v4303_v57  ;;  %v4308_v16 = vadd.f32 %v7762_v26, %v4269_v18  ;;  %v4267_v61 = vmul.f32 %v7751_v3, %v4228_v33  ;;  %v4231_v54 = vmax.f32 %v4125_v40, 0.0  ;;  %v4117_v51 = vadd.f32 %v4116_v50, %v3956_v31  ;;  %v8061_v18 = vld [vmem:[#allocation20_spill] sm:$0xff]  ;;  %v7831_v40 = vpop.f32.mrf.mxu0  ;;  %v8062_v50 = vld [vmem:[#allocation11_spill] sm:$0xff] }
 0x3e6   : > { %v5600_v17 = vpop.f32.mrf.mxu1  ;;  %v5453_v31 = vadd.f32 %v8060_v53, %v7652_v43  ;;  %v3993_v33 = vadd.f32 %v5450_v15, %v8061_v18 }
 0x3e7   : > { %4340 = vst [vmem:[%s7772_s28 + $0x30] sm:$0xff] %v4308_v16  ;;  %v4306_v47 = vadd.f32 %v7762_v26, %v4267_v61  ;;  %v4270_v4 = vmul.f32 %v7751_v3, %v4231_v54  ;;  %v4229_v48 = vmax.f32 %v4117_v51, 0.0  ;;  %v4138_v37 = vadd.f32 %v5600_v17, %v3977_v60  ;;  %v8063_v60 = vld [vmem:[#allocation13_spill] sm:$0xff]  ;;  %v8064_v54 = vld [vmem:[#allocation10_spill] sm:$0xff]  ;;  %v7845_v15 = vpop.f32.mrf.mxu0 }
 0x3e8   : > { %v4129_v13 = vpop.f32.mrf.mxu1  ;;  %v5447_v16 = vadd.f32 %v8063_v60, %v8062_v50  ;;  %v3985_v51 = vadd.f32 %v5444_v25, %v8064_v54 }
 0x3e9   : > { %4338 = vst [vmem:[%s7772_s28 + $0x20] sm:$0xff] %v4306_v47  ;;  %v4309_v38 = vadd.f32 %v7762_v26, %v4270_v4  ;;  %v4268_v24 = vmul.f32 %v7751_v3, %v4229_v48  ;;  %v4234_v7 = vmax.f32 %v4138_v37, 0.0  ;;  %v4130_v22 = vadd.f32 %v4129_v13, %v3969_v41  ;;  %v8065_v48 = vld [vmem:[#allocation15_spill] sm:$0xff]  ;;  %v7859_v18 = vpop.f32.mrf.mxu0 }
 0x3ea   : > { %v5601_v55 = vpop.f32.mrf.mxu1  ;;  %v5462_v47 = vadd.f32 %v7675_v21, %v7673_v23  ;;  %v3996_v37 = vadd.f32 %v5453_v31, %v8065_v48  ;;  %v8069_v31 = vld [vmem:[#allocation18_spill] sm:$0xff] }
 0x3eb   : > { %4341 = vst [vmem:[%s7772_s28 + $0x38] sm:$0xff] %v4309_v38  ;;  %v4307_v6 = vadd.f32 %v7762_v26, %v4268_v24  ;;  %v4273_v14 = vmul.f32 %v7751_v3, %v4234_v7  ;;  %v4232_v62 = vmax.f32 %v4130_v22, 0.0  ;;  %v4141_v2 = vadd.f32 %v5601_v55, %v3980_v56  ;;  %v8066_v7 = vld [vmem:[#allocation16_spill] sm:$0xff]  ;;  %v8067_v55 = vld [vmem:[#allocation7_spill] sm:$0xff] }
 0x3ec   : > { %v4132_v57 = vpop.f32.mrf.mxu1  ;;  %v5456_v22 = vadd.f32 %v8066_v7, %v7659_v27 }
 0x3ed   : > { %4339 = vst [vmem:[%s7772_s28 + $0x28] sm:$0xff] %v4307_v6  ;;  %v4312_v11 = vadd.f32 %v7762_v26, %v4273_v14  ;;  %v4271_v46 = vmul.f32 %v7751_v3, %v4232_v62  ;;  %v4235_v1 = vmax.f32 %v4141_v2, 0.0  ;;  %v4133_v8 = vadd.f32 %v4132_v57, %v3972_v52  ;;  %v8068_v62 = vld [vmem:[#allocation26_spill] sm:$0xff] }
 0x3ee   : > { %v5604_v61 = vpop.f32.mrf.mxu1  ;;  %v3988_v52 = vadd.f32 %v5447_v16, %v8067_v55  ;;  %v5465_v2 = vadd.f32 %v8068_v62, %v7680_v42  ;;  %v4009_v57 = vadd.f32 %v5462_v47, %v8069_v31  ;;  %v8072_v16 = vld [vmem:[#allocation8_spill] sm:$0xff] }
 0x3ef   : > { %4344 = vst [vmem:[%s7772_s28 + $0x50] sm:$0xff] %v4312_v11  ;;  %v4310_v43 = vadd.f32 %v7762_v26, %v4271_v46  ;;  %v4274_v63 = vmul.f32 %v7751_v3, %v4235_v1  ;;  %v4233_v17 = vmax.f32 %v4133_v8, 0.0  ;;  %v4154_v41 = vadd.f32 %v5604_v61, %v3993_v33  ;;  %v8070_v1 = vld [vmem:[#allocation12_spill] sm:$0xff]  ;;  %v8071_v8 = vld [vmem:[#allocation19_spill] sm:$0xff] }
 0x3f0   : > { %v4145_v4 = vpop.f32.mrf.mxu1  ;;  %v5459_v50 = vadd.f32 %v8071_v8, %v8070_v1  ;;  %v4001_v61 = vadd.f32 %v5456_v22, %v8072_v16  ;;  %v8079_v16 = vld [vmem:[#allocation4_spill] sm:$0xff] }
 0x3f1   : > { %4342 = vst [vmem:[%s7772_s28 + $0x40] sm:$0xff] %v4310_v43  ;;  %v4313_v13 = vadd.f32 %v7762_v26, %v4274_v63  ;;  %v4272_v56 = vmul.f32 %v7751_v3, %v4233_v17  ;;  %v4238_v38 = vmax.f32 %v4154_v41, 0.0  ;;  %v4146_v24 = vadd.f32 %v4145_v4, %v3985_v51  ;;  %v8073_v41 = vld [vmem:[#allocation23_spill] sm:$0xff]  ;;  %v7873_v4 = vpop.f32.mrf.mxu0 }
 0x3f2   : > { %v5605_v25 = vpop.f32.mrf.mxu1  ;;  %v5474_v63 = vadd.f32 %v7709_v44, %v7704_v19  ;;  %v4012_v47 = vadd.f32 %v5465_v2, %v8073_v41  ;;  %v8080_v41 = vld [vmem:[#allocation22_spill] sm:$0xff] }
 0x3f3   : > { %4345 = vst [vmem:[%s7772_s28 + $0x58] sm:$0xff] %v4313_v13  ;;  %v4311_v23 = vadd.f32 %v7762_v26, %v4272_v56  ;;  %v4277_v21 = vmul.f32 %v7751_v3, %v4238_v38  ;;  %v4236_v6 = vmax.f32 %v4146_v24, 0.0  ;;  %v4157_v14 = vadd.f32 %v5605_v25, %v3996_v37  ;;  %v8074_v38 = vld [vmem:[#allocation25_spill] sm:$0xff]  ;;  %v8075_v24 = vld [vmem:[#allocation24_spill] sm:$0xff]  ;;  %v5496_v62 = vpop.f32.mrf.mxu0 }
 0x3f4   : > { %v4148_v53 = vpop.f32.mrf.mxu1  ;;  %v5468_v7 = vadd.f32 %v8075_v24, %v8074_v38  ;;  %v8076_v25 = vld [vmem:[#allocation17_spill] sm:$0xff] }
 0x3f5   : > { %4343 = vst [vmem:[%s7772_s28 + $0x48] sm:$0xff] %v4311_v23  ;;  %v4316_v27 = vadd.f32 %v7762_v26, %v4277_v21  ;;  %v4275_v33 = vmul.f32 %v7751_v3, %v4236_v6  ;;  %v4239_v11 = vmax.f32 %v4157_v14, 0.0  ;;  %v4149_v46 = vadd.f32 %v4148_v53, %v3988_v52 }
 0x3f6   : > { %v5608_v60 = vpop.f32.mrf.mxu1  ;;  %v4004_v55 = vadd.f32 %v5459_v50, %v8076_v25  ;;  %v5477_v21 = vadd.f32 %v7719_v0, %v7714_v35  ;;  %v4025_v14 = vadd.f32 %v5474_v63, %v7692_v34  ;;  %v5486_v50 = vadd.f32 %v7789_v32, %v7775_v28 }
 0x3f7   : > { %4348 = vst [vmem:[%s7772_s28 + $0x70] sm:$0xff] %v4316_v27  ;;  %v4314_v42 = vadd.f32 %v7762_v26, %v4275_v33  ;;  %v4278_v54 = vmul.f32 %v7751_v3, %v4239_v11  ;;  %v4237_v51 = vmax.f32 %v4149_v46, 0.0  ;;  %v4170_v43 = vadd.f32 %v5608_v60, %v4009_v57  ;;  %v8077_v27 = vld [vmem:[#allocation27_spill] sm:$0xff]  ;;  %v8078_v46 = vld [vmem:[#allocation14_spill] sm:$0xff] }
 0x3f8   : > { %v4161_v17 = vpop.f32.mrf.mxu1  ;;  %v5471_v33 = vadd.f32 %v7699_v20, %v8077_v27  ;;  %v4017_v1 = vadd.f32 %v5468_v7, %v8078_v46  ;;  %v5480_v63 = vadd.f32 %v7735_v58, %v7724_v29  ;;  %v4041_v38 = vadd.f32 %v5486_v50, %v7712_v10  ;;  %v8084_v50 = vld [vmem:[#allocation6_spill] sm:$0xff] }
 0x3f9   : > { %4346 = vst [vmem:[%s7772_s28 + $0x60] sm:$0xff] %v4314_v42  ;;  %v4317_v48 = vadd.f32 %v7762_v26, %v4278_v54  ;;  %v4276_v37 = vmul.f32 %v7751_v3, %v4237_v51  ;;  %v4242_v13 = vmax.f32 %v4170_v43, 0.0  ;;  %v4162_v56 = vadd.f32 %v4161_v17, %v4001_v61  ;;  %v5497_v42 = vpop.f32.mrf.mxu0 }
 0x3fa   : > { %v5609_v22 = vpop.f32.mrf.mxu1  ;;  %v4028_v61 = vadd.f32 %v5477_v21, %v8079_v16  ;;  %v5483_v25 = vadd.f32 %v7753_v45, %v7743_v59  ;;  %v5498_v21 = vadd.f32 %v5497_v42, %v5496_v62  ;;  %v5389_v62 = vadd.f32 %v7739_v39, %v7737_v49  ;;  %v8085_v42 = vld [vmem:[#allocation28_spill] sm:$0xff] }
 0x3fb   : > { %4349 = vst [vmem:[%s7772_s28 + $0x78] sm:$0xff] %v4317_v48  ;;  %v4315_v19 = vadd.f32 %v7762_v26, %v4276_v37  ;;  %v4281_v44 = vmul.f32 %v7751_v3, %v4242_v13  ;;  %v4240_v52 = vmax.f32 %v4162_v56, 0.0  ;;  %v4173_v23 = vadd.f32 %v5609_v22, %v4012_v47  ;;  %v5499_v24 = vpop.f32.mrf.mxu0 }
 0x3fc   : > { %v4164_v6 = vpop.f32.mrf.mxu1  ;;  %v4020_v47 = vadd.f32 %v5471_v33, %v8080_v41  ;;  %v5489_v13 = vadd.f32 %v7817_v9, %v7803_v5  ;;  %v8081_v5 = vld [vmem:[#allocation31_spill] sm:$0xff]  ;;  %v8083_v33 = vld [vmem:[#allocation32_spill] sm:$0xff]  ;;  %v5495_v16 = vadd.f32 %v7873_v4, %v7859_v18 }
 0x3fd   : > { %4347 = vst [vmem:[%s7772_s28 + $0x68] sm:$0xff] %v4315_v19  ;;  %v4320_v2 = vadd.f32 %v7762_v26, %v4281_v44  ;;  %v4279_v53 = vmul.f32 %v7751_v3, %v4240_v52  ;;  %v4243_v31 = vmax.f32 %v4173_v23, 0.0  ;;  %v4165_v57 = vadd.f32 %v4164_v6, %v4004_v55 }
 0x3fe   : > { %v5612_v11 = vpop.f32.mrf.mxu1  ;;  %v5386_v55 = vadd.f32 %v7731_v30, %v7726_v12  ;;  %v4033_v9 = vadd.f32 %v5480_v63, %v8081_v5 }
 0x3ff   : > { %4352 = vst [vmem:[%s7772_s28 + $0x90] sm:$0xff] %v4320_v2  ;;  %v4318_v35 = vadd.f32 %v7762_v26, %v4279_v53  ;;  %v4282_v34 = vmul.f32 %v7751_v3, %v4243_v31  ;;  %v4241_v0 = vmax.f32 %v4165_v57, 0.0  ;;  %v4186_v8 = vadd.f32 %v5612_v11, %v4025_v14  ;;  %v5500_v2 = vpop.f32.mrf.mxu0  ;;  %v8082_v53 = vld [vmem:[#allocation9_spill] sm:$0xff] }
 0x400   : > { %v4177_v60 = vpop.f32.mrf.mxu1  ;;  %v4044_v14 = vadd.f32 %v5489_v13, %v7717_v36  ;;  %v3896_v31 = vadd.f32 %v5386_v55, %v8082_v53  ;;  %v5492_v57 = vadd.f32 %v7845_v15, %v7831_v40  ;;  %v4036_v36 = vadd.f32 %v5483_v25, %v8083_v33 }
 0x401   : > { %4350 = vst [vmem:[%s7772_s28 + $0x80] sm:$0xff] %v4318_v35  ;;  %v4321_v20 = vadd.f32 %v7762_v26, %v4282_v34  ;;  %v4280_v54 = vmul.f32 %v7751_v3, %v4241_v0  ;;  %v4246_v51 = vmax.f32 %v4186_v8, 0.0  ;;  %v4178_v43 = vadd.f32 %v4177_v60, %v4017_v1 }
 0x402   : > { %v5613_v17 = vpop.f32.mrf.mxu1  ;;  %v5501_v34 = vadd.f32 %v5500_v2, %v5499_v24  ;;  %v4057_v8 = vadd.f32 %v5498_v21, %v3896_v31  ;;  %v3899_v60 = vadd.f32 %v5389_v62, %v8084_v50 }
 0x403   : > { %4353 = vst [vmem:[%s7772_s28 + $0x98] sm:$0xff] %v4321_v20  ;;  %v4319_v28 = vadd.f32 %v7762_v26, %v4280_v54  ;;  %v4285_v32 = vmul.f32 %v7751_v3, %v4246_v51  ;;  %v4244_v48 = vmax.f32 %v4178_v43, 0.0  ;;  %v4189_v37 = vadd.f32 %v5613_v17, %v4028_v61 }
 0x404   : > { %v4180_v56 = vpop.f32.mrf.mxu1  ;;  %v4049_v20 = vadd.f32 %v5492_v57, %v8085_v42  ;;  %v4060_v41 = vadd.f32 %v5501_v34, %v3899_v60 }
 0x405   : > { %4351 = vst [vmem:[%s7772_s28 + $0x88] sm:$0xff] %v4319_v28  ;;  %v4324_v29 = vadd.f32 %v7762_v26, %v4285_v32  ;;  %v4283_v58 = vmul.f32 %v7751_v3, %v4244_v48  ;;  %v4247_v7 = vmax.f32 %v4189_v37, 0.0  ;;  %v4181_v22 = vadd.f32 %v4180_v56, %v4020_v47  ;;  %v8086_v48 = vld [vmem:[#allocation5_spill] sm:$0xff] }
 0x406   : > { %v5616_v19 = vpop.f32.mrf.mxu1  ;;  %v4052_v37 = vadd.f32 %v5495_v16, %v8086_v48 }
 0x407   : > { %4356 = vst [vmem:[%s7772_s28 + $0xb0] sm:$0xff] %v4324_v29  ;;  %v4322_v10 = vadd.f32 %v7762_v26, %v4283_v58  ;;  %v4286_v44 = vmul.f32 %v7751_v3, %v4247_v7  ;;  %v4245_v52 = vmax.f32 %v4181_v22, 0.0  ;;  %v4202_v23 = vadd.f32 %v5616_v19, %v4041_v38 }
 0x408   : > { %v4193_v6 = vpop.f32.mrf.mxu1 }
 0x409   : > { %4354 = vst [vmem:[%s7772_s28 + $0xa0] sm:$0xff] %v4322_v10  ;;  %v4325_v45 = vadd.f32 %v7762_v26, %v4286_v44  ;;  %v4284_v12 = vmul.f32 %v7751_v3, %v4245_v52  ;;  %v4250_v30 = vmax.f32 %v4202_v23, 0.0  ;;  %v4194_v59 = vadd.f32 %v4193_v6, %v4033_v9 }
 0x40a   : > { %v5617_v27 = vpop.f32.mrf.mxu1 }
 0x40b   : > { %4357 = vst [vmem:[%s7772_s28 + $0xb8] sm:$0xff] %v4325_v45  ;;  %v4323_v11 = vadd.f32 %v7762_v26, %v4284_v12  ;;  %v4289_v46 = vmul.f32 %v7751_v3, %v4250_v30  ;;  %v4248_v1 = vmax.f32 %v4194_v59, 0.0  ;;  %v4205_v35 = vadd.f32 %v5617_v27, %v4044_v14 }
 0x40c   : > { %v4196_v0 = vpop.f32.mrf.mxu1 }
 0x40d   : > { %4355 = vst [vmem:[%s7772_s28 + $0xa8] sm:$0xff] %v4323_v11  ;;  %v4328_v40 = vadd.f32 %v7762_v26, %v4289_v46  ;;  %v4287_v49 = vmul.f32 %v7751_v3, %v4248_v1  ;;  %v4251_v39 = vmax.f32 %v4205_v35, 0.0  ;;  %v4197_v15 = vadd.f32 %v4196_v0, %v4036_v36 }
 0x40e   : > { %v5620_v61 = vpop.f32.mrf.mxu1 }
 0x40f   : > { %4360 = vst [vmem:[%s7772_s28 + $0xd0] sm:$0xff] %v4328_v40  ;;  %v4326_v54 = vadd.f32 %v7762_v26, %v4287_v49  ;;  %v4290_v51 = vmul.f32 %v7751_v3, %v4251_v39  ;;  %v4249_v43 = vmax.f32 %v4197_v15, 0.0  ;;  %v4218_v63 = vadd.f32 %v5620_v61, %v4057_v8 }
 0x410   : > { %v4209_v17 = vpop.f32.mrf.mxu1 }
 0x411   : > { %4358 = vst [vmem:[%s7772_s28 + $0xc0] sm:$0xff] %v4326_v54  ;;  %v4329_v47 = vadd.f32 %v7762_v26, %v4290_v51  ;;  %v4288_v28 = vmul.f32 %v7751_v3, %v4249_v43  ;;  %v4254_v18 = vmax.f32 %v4218_v63, 0.0  ;;  %v4210_v4 = vadd.f32 %v4209_v17, %v4049_v20 }
 0x412   : > { %v5621_v32 = vpop.f32.mrf.mxu1 }
 0x413   : > { %4361 = vst [vmem:[%s7772_s28 + $0xd8] sm:$0xff] %v4329_v47  ;;  %v4327_v13 = vadd.f32 %v7762_v26, %v4288_v28  ;;  %v4293_v56 = vmul.f32 %v7751_v3, %v4254_v18  ;;  %v4252_v38 = vmax.f32 %v4210_v4, 0.0  ;;  %v4221_v24 = vadd.f32 %v5621_v32, %v4060_v41 }
 0x414   : > { %v4212_v29 = vpop.f32.mrf.mxu1 }
 0x415   : > { %4359 = vst [vmem:[%s7772_s28 + $0xc8] sm:$0xff] %v4327_v13  ;;  %v4332_v58 = vadd.f32 %v7762_v26, %v4293_v56  ;;  %v4291_v7 = vmul.f32 %v7751_v3, %v4252_v38  ;;  %v4255_v22 = vmax.f32 %v4221_v24, 0.0  ;;  %v4213_v25 = vadd.f32 %v4212_v29, %v4052_v37 }
 0x417   : > { %4364 = vst [vmem:[%s7772_s28 + $0xf0] sm:$0xff] %v4332_v58  ;;  %v4330_v55 = vadd.f32 %v7762_v26, %v4291_v7  ;;  %v4294_v19 = vmul.f32 %v7751_v3, %v4255_v22  ;;  %v4253_v5 = vmax.f32 %v4213_v25, 0.0 }
 0x419   : > { %4362 = vst [vmem:[%s7772_s28 + $0xe0] sm:$0xff] %v4330_v55  ;;  %v4333_v9 = vadd.f32 %v7762_v26, %v4294_v19  ;;  %v4292_v10 = vmul.f32 %v7751_v3, %v4253_v5 }
 0x41b   : > { %4365 = vst [vmem:[%s7772_s28 + $0xf8] sm:$0xff] %v4333_v9  ;;  %v4331_v44 = vadd.f32 %v7762_v26, %v4292_v10 }
 0x41d   : > { %4363 = vst [vmem:[%s7772_s28 + $0xe8] sm:$0xff] %v4331_v44 }
 0x41e PF: > { %s17_s24 = sadd.s32 1, %s5783_s24  }
 0x41f   : > { %p14_p4 = scmp.ge.s32.totalorder %s17_s24, 4  }
 0x421   :  { %16 = sbr.rel (!%p14_p4) target bundleno = 1 (0x1), region = 82 }

</bundles_post_ra>
